<compile_context>
chip_gen: v7x
topology: tpu7x:2x2x1
jax: 0.10.0
libtpu: 0.0.40
codegen_flags: <defaults>
</compile_context>

<pallas_src>
import numpy as np

import jax
import jax.numpy as jnp
from jax.experimental import pallas as pl
from jax.experimental.pallas import tpu as pltpu

_LANE = 128
_SUBLANE = 8


def _round_up(x, m):
    return (x + m - 1) // m * m


def _full_spec(shape):
    # Full-array block for a grid=(1,) kernel.
    return pl.BlockSpec(shape, lambda i, r=len(shape): (0,) * r)


def _length_mask(T, lens, Bp):
    lens_arr = jnp.asarray(list(lens) + [0] * (Bp - len(lens)), jnp.int32)
    return (jnp.arange(T, dtype=jnp.int32)[:, None] < lens_arr[None, :]
            ).astype(jnp.float32)[:, :, None]                       # (T, Bp, 1)


# ----------------------------------------------------------------------------
# In-kernel helper: masked bidirectional LSTM + batch-dim self-attention
# ----------------------------------------------------------------------------

def _encode_level(x2d, mask_ref, wih, b, h0, c0, whh, wsent, bsent, proj,
                  xg_ref, hidf_ref, hidb_ref, hcat_ref, ccat_ref):
    """x2d: (T*Bp, D) value, time-major rows (t*Bp + b).  Returns ctx (Bp, 2H).

    Gate column order is [i, f, o | g] per direction; forward-direction gates
    occupy columns 0:4H and backward-direction gates 4H:8H of the 8H gate axis.
    """
    T, Bp, GG = xg_ref.shape
    G = GG // 2
    H = G // 4
    HH = 2 * H

    # Prologue: input projection for ALL timesteps and BOTH directions as one
    # matmul, written straight into a single (T, Bp, 8H) scratch.
    xg_ref[...] = (jnp.dot(x2d, wih, preferred_element_type=jnp.float32)
                   + b).reshape(T, Bp, GG)
    hcat_ref[...] = jnp.broadcast_to(h0, (Bp, HH))                  # [h_fwd | h_bwd]
    ccat_ref[...] = jnp.broadcast_to(c0, (Bp, HH))

    def cell(g, c_prev):
        # sigmoid(x) = 0.5*tanh(0.5*x) + 0.5 : one EUP op for the contiguous
        # [i, f, o] slice, one tanh for the cell gate, one tanh for c_new.
        s = 0.5 * jnp.tanh(0.5 * g[:, 0:3 * H]) + 0.5
        gg = jnp.tanh(g[:, 3 * H:4 * H])
        c_new = s[:, H:2 * H] * c_prev + s[:, 0:H] * gg
        h_new = s[:, 2 * H:3 * H] * jnp.tanh(c_new)
        return h_new, c_new

    def step(i, carry):
        tf = i                      # forward-direction time index
        tb = T - 1 - i              # backward-direction time index
        mf = mask_ref[tf] > 0.5                                     # (Bp, 1) bool
        mb = mask_ref[tb] > 0.5
        h_prev = hcat_ref[...]
        c_prev = ccat_ref[...]
        # ONE block-diagonal recurrent matmul for both directions (K = 2H).
        g_rec = jnp.dot(h_prev, whh, preferred_element_type=jnp.float32)  # (Bp, 8H)
        g_f = xg_ref[tf][:, 0:G] + g_rec[:, 0:G]
        g_b = xg_ref[tb][:, G:GG] + g_rec[:, G:GG]
        hf_n, cf_n = cell(g_f, c_prev[:, 0:H])
        hb_n, cb_n = cell(g_b, c_prev[:, H:HH])
        # vsel blends: freeze state past each row's length (packed-seq semantics).
        hcat_ref[...] = jnp.concatenate(
            [jnp.where(mf, hf_n, h_prev[:, 0:H]),
             jnp.where(mb, hb_n, h_prev[:, H:HH])], axis=-1)
        ccat_ref[...] = jnp.concatenate(
            [jnp.where(mf, cf_n, c_prev[:, 0:H]),
             jnp.where(mb, cb_n, c_prev[:, H:HH])], axis=-1)
        hidf_ref[tf] = jnp.where(mf, hf_n, 0.0)                     # zeros past length
        hidb_ref[tb] = jnp.where(mb, hb_n, 0.0)
        return carry

    jax.lax.fori_loop(0, T, step, 0, unroll=True if T <= 8 else 8)

    # Epilogue: self-attention.  The reference's legacy implicit-dim F.softmax on
    # the batch-first 3-D tensor normalizes over the BATCH axis (chunks at level
    # 1, sentences at level 2); padded batch rows are excluded (they do not exist
    # in the reference).  Hidden states at padded TIME positions are zero, so
    # their logits are tanh(b_sent)·proj exactly as in the reference.
    hid = jnp.concatenate([hidf_ref[...], hidb_ref[...]], axis=-1)  # (T, Bp, 2H)
    so = jnp.tanh(jnp.dot(hid.reshape(T * Bp, HH), wsent,
                          preferred_element_type=jnp.float32) + bsent)
    so3 = so.reshape(T, Bp, HH)
    logits = jnp.sum(so3 * proj, axis=-1, keepdims=True)            # (T, Bp, 1)
    bvalid = mask_ref[0]            # (Bp, 1); every real row has length >= 1
    e = jnp.exp(logits - jnp.max(logits, axis=1, keepdims=True)) * bvalid
    attn = e / jnp.sum(e, axis=1, keepdims=True) + 1e-8             # softmax + 1e-8
    return jnp.sum(attn * hid, axis=0)                              # (Bp, 2H)


# ----------------------------------------------------------------------------
# Fused two-level kernel
# ----------------------------------------------------------------------------

def _hier_kernel(x1_ref, mask1_ref, gsel_ref, mask2_ref,
                 wih_ref, whh_ref, b_ref, h0_ref, c0_ref,
                 wsent_ref, bsent_ref, proj_ref, decw_ref,
                 out_ref,
                 xg1, hf1, hb1, hc1, cc1,
                 xg2, hf2, hb2, hc2, cc2):
    T1, Bp1, E = x1_ref.shape
    T2, Bp2, _ = mask2_ref.shape
    HH = whh_ref.shape[0]           # 2H

    wih = wih_ref[...]
    whh = whh_ref[...]
    b = b_ref[...]
    h0 = h0_ref[...]
    c0 = c0_ref[...]
    wsent = wsent_ref[...]
    bsent = bsent_ref[...]
    proj = proj_ref[...]

    # ---- level 1: words -> chunk representation (biLSTM + attention + dec_h) --
    ctx1 = _encode_level(x1_ref[...].reshape(T1 * Bp1, E), mask1_ref,
                         wih, b, h0, c0, whh, wsent, bsent, proj,
                         xg1, hf1, hb1, hc1, cc1)                   # (Bp1, 2H)
    chunk_repr = jnp.dot(ctx1, decw_ref[...],
                         preferred_element_type=jnp.float32)        # (Bp1, E)

    # ---- regroup chunk vectors per ORIGINAL sentence (static 0/1 selection
    # matmul; un-selected slots are masked out of level 2 anyway) ----
    x2_2d = jnp.dot(gsel_ref[...], chunk_repr,
                    preferred_element_type=jnp.float32)             # (T2*Bp2, E)

    # ---- level 2: chunks -> sentence representation (identity output proj) ----
    ctx2 = _encode_level(x2_2d, mask2_ref,
                         wih, b, h0, c0, whh, wsent, bsent, proj,
                         xg2, hf2, hb2, hc2, cc2)                   # (Bp2, 2H)
    pad = out_ref.shape[1] - HH
    if pad:
        out_ref[...] = jnp.concatenate(
            [ctx2, jnp.zeros((Bp2, pad), jnp.float32)], axis=-1)
    else:
        out_ref[...] = ctx2


# ----------------------------------------------------------------------------
# HierarchicalWordToSentLSTM forward
# ----------------------------------------------------------------------------

def hierarchical_forward(params, article_sents, sent_lens, divide_num=8):
    B, L = article_sents.shape
    H = params['whh_cat'].shape[0] // 2
    E = params['wih_cat'].shape[0]
    assert all(l >= 1 for l in sent_lens), "zero-length sentences are not supported"

    # ---- sort sentences by length (desc, stable) as in the reference ----
    sort_ind = sorted(range(len(sent_lens)), key=lambda i: sent_lens[i], reverse=True)
    lens_sorted = [sent_lens[i] for i in sort_ind]
    art_sorted = article_sents[jnp.asarray(sort_ind, jnp.int32)]

    # ---- devide(): split every sorted sentence into chunks of divide_num ----
    pad_num = ((L // divide_num + 1) * divide_num - L) % divide_num
    if pad_num:
        art_sorted = jnp.concatenate(
            [art_sorted, jnp.zeros((B, pad_num), art_sorted.dtype)], axis=1)
    chunks_per_row = (L + pad_num) // divide_num
    chunks_all = art_sorted.reshape(-1, divide_num)
    counts = [l // divide_num + (1 if l % divide_num else 0) for l in lens_sorted]
    keep, chunk_lens = [], []
    for i, (l, c) in enumerate(zip(lens_sorted, counts)):
        for k in range(c):
            keep.append(i * chunks_per_row + k)      # chunk kept iff first token != 0
            chunk_lens.append(min(divide_num, l - divide_num * k))
    N = len(keep)
    chunks = chunks_all[jnp.asarray(keep, jnp.int32)]               # (N, divide_num)

    # ---- level-1 inputs: embed, pad batch to a multiple of 8 sublanes ----
    T1 = max(chunk_lens)
    Bp1 = _round_up(N, _SUBLANE)
    emb = jnp.take(params['embedding'], chunks, axis=0)             # (N, divide_num, E)
    x1 = jnp.transpose(emb, (1, 0, 2))[:T1]                         # (T1, N, E)
    if Bp1 != N:
        x1 = jnp.pad(x1, ((0, 0), (0, Bp1 - N), (0, 0)))
    mask1 = _length_mask(T1, chunk_lens, Bp1)                       # (T1, Bp1, 1)

    # ---- level-2 bookkeeping: regroup chunks per original sentence ----
    back_map = {ind: i for i, ind in enumerate(sort_ind)}
    counts_orig = [counts[back_map[bb]] for bb in range(B)]
    T2 = max(counts)
    Bp2 = _round_up(B, _SUBLANE)
    offsets = np.concatenate([[0], np.cumsum(counts)]).astype(np.int64)
    gsel = np.zeros((T2 * Bp2, Bp1), np.float32)                    # row = k*Bp2 + b
    for bb in range(B):
        s = back_map[bb]                         # position of sentence bb after sort
        for k in range(counts_orig[bb]):
            gsel[k * Bp2 + bb, offsets[s] + k] = 1.0
    mask2 = _length_mask(T2, counts_orig, Bp2)                      # (T2, Bp2, 1)

    PC2 = max(_round_up(2 * H, _LANE), _LANE)                       # lane-dense output

    out = pl.pallas_call(
        _hier_kernel,
        out_shape=jax.ShapeDtypeStruct((Bp2, PC2), jnp.float32),
        grid=(1,),
        in_specs=[_full_spec(s) for s in (
            (T1, Bp1, E), (T1, Bp1, 1), (T2 * Bp2, Bp1), (T2, Bp2, 1),
            (E, 8 * H), (2 * H, 8 * H), (1, 8 * H), (1, 2 * H), (1, 2 * H),
            (2 * H, 2 * H), (1, 2 * H), (1, 1, 2 * H), (2 * H, E))],
        out_specs=_full_spec((Bp2, PC2)),
        scratch_shapes=[
            pltpu.VMEM((T1, Bp1, 8 * H), jnp.float32),              # xg1
            pltpu.VMEM((T1, Bp1, H), jnp.float32),                  # hid1 fwd
            pltpu.VMEM((T1, Bp1, H), jnp.float32),                  # hid1 bwd
            pltpu.VMEM((Bp1, 2 * H), jnp.float32),                  # h state lvl1
            pltpu.VMEM((Bp1, 2 * H), jnp.float32),                  # c state lvl1
            pltpu.VMEM((T2, Bp2, 8 * H), jnp.float32),              # xg2
            pltpu.VMEM((T2, Bp2, H), jnp.float32),                  # hid2 fwd
            pltpu.VMEM((T2, Bp2, H), jnp.float32),                  # hid2 bwd
            pltpu.VMEM((Bp2, 2 * H), jnp.float32),                  # h state lvl2
            pltpu.VMEM((Bp2, 2 * H), jnp.float32),                  # c state lvl2
        ],
        compiler_params=pltpu.CompilerParams(
            dimension_semantics=("arbitrary",),
            vmem_limit_bytes=32 * 1024 * 1024),
    )(x1, mask1, jnp.asarray(gsel), mask2,
      params['wih_cat'], params['whh_cat'], params['b_cat'],
      params['h0_cat'], params['c0_cat'],
      params['W_sent'], params['b_sent'], params['proj_sent'], params['dec_w_t'])
    return out[:B, :2 * H]


# ----------------------------------------------------------------------------
# Deterministic parameter initialization (shapes from the module __init__),
# stored directly in the fused-kernel layout.
# ----------------------------------------------------------------------------

def init_params(key, emb_dim, n_hidden, n_layer, vocab_size):
    assert n_layer == 1, "fused kernel implements the exercised n_layer=1 config"
    H = n_hidden
    ks = iter(jax.random.split(key, 16))
    emb = jax.random.normal(next(ks), (vocab_size, emb_dim), jnp.float32)
    emb = emb.at[0].set(0.0)                                        # padding_idx=0
    init_h = jax.random.uniform(next(ks), (2, H), jnp.float32, -0.01, 0.01)
    init_c = jax.random.uniform(next(ks), (2, H), jnp.float32, -0.01, 0.01)
    k_lstm = 1.0 / (H ** 0.5)

    def reorder(w):
        # PyTorch gate row order [i, f, g, o]  ->  kernel order [i, f, o, g]
        return jnp.concatenate([w[0:H], w[H:2 * H], w[3 * H:4 * H], w[2 * H:3 * H]],
                               axis=0)

    dirs = []
    for _ in range(2):                                              # fwd, bwd
        wih = jax.random.uniform(next(ks), (4 * H, emb_dim), jnp.float32, -k_lstm, k_lstm)
        whh = jax.random.uniform(next(ks), (4 * H, H), jnp.float32, -k_lstm, k_lstm)
        bih = jax.random.uniform(next(ks), (4 * H,), jnp.float32, -k_lstm, k_lstm)
        bhh = jax.random.uniform(next(ks), (4 * H,), jnp.float32, -k_lstm, k_lstm)
        dirs.append((reorder(wih).T,                                # (E, 4H)
                     reorder(whh).T,                                # (H, 4H)
                     reorder(bih + bhh).reshape(1, 4 * H)))         # (1, 4H)

    wih_cat = jnp.concatenate([dirs[0][0], dirs[1][0]], axis=1)     # (E, 8H)
    whh_cat = jnp.zeros((2 * H, 8 * H), jnp.float32)                # block diagonal
    whh_cat = whh_cat.at[0:H, 0:4 * H].set(dirs[0][1])
    whh_cat = whh_cat.at[H:2 * H, 4 * H:8 * H].set(dirs[1][1])
    b_cat = jnp.concatenate([dirs[0][2], dirs[1][2]], axis=1)       # (1, 8H)

    W_sent = jax.random.uniform(next(ks), (2 * H, 2 * H), jnp.float32, -0.1, 0.1)
    b_sent = jax.random.uniform(next(ks), (1, 2 * H), jnp.float32, -0.1, 0.1)
    proj_sent = jax.random.uniform(next(ks), (2 * H, 1), jnp.float32, -0.1, 0.1)
    k_dec = 1.0 / ((2 * H) ** 0.5)
    dec_w = jax.random.uniform(next(ks), (emb_dim, 2 * H), jnp.float32, -k_dec, k_dec)
    return dict(
        embedding=emb,
        h0_cat=jnp.concatenate([init_h[0:1], init_h[1:2]], axis=1), # (1, 2H)
        c0_cat=jnp.concatenate([init_c[0:1], init_c[1:2]], axis=1), # (1, 2H)
        wih_cat=wih_cat, whh_cat=whh_cat, b_cat=b_cat,
        W_sent=W_sent, b_sent=b_sent,
        proj_sent=proj_sent.reshape(1, 1, 2 * H),                   # (1, 1, 2H)
        dec_w_t=dec_w.T)                                            # (2H, E)


# ----------------------------------------------------------------------------
# Example run
# ----------------------------------------------------------------------------

if __name__ == "__main__":
    emb_dim, n_hidden, n_layer, vocab_size = 16, 32, 1, 50
    B, L = 3, 20
    sent_lens = [13, 20, 7]

    key = jax.random.PRNGKey(0)
    k_tok, k_par = jax.random.split(key)
    toks = jax.random.randint(k_tok, (B, L), 1, vocab_size, dtype=jnp.int32)
    pos = jnp.arange(L)[None, :]
    article_sents = jnp.where(pos < jnp.asarray(sent_lens)[:, None], toks, 0)
    article_sents = article_sents.astype(jnp.int32)

    params = init_params(k_par, emb_dim, n_hidden, n_layer, vocab_size)

    out = hierarchical_forward(params, article_sents, sent_lens)
    out = jax.block_until_ready(out)
    assert out.shape == (B, 2 * n_hidden), out.shape
    assert bool(jnp.all(jnp.isfinite(out)))
    print("KERNEL_OK")
</pallas_src>

<mosaic_0001>
module attributes {stable_mosaic.version = 11 : i64} {
  func.func @_hier_kernel(%arg0: i32, %arg1: memref<8x8x16xf32, #tpu.memory_space<vmem>>, %arg2: memref<8x8x1xf32, #tpu.memory_space<vmem>>, %arg3: memref<24x8xf32, #tpu.memory_space<vmem>>, %arg4: memref<3x8x1xf32, #tpu.memory_space<vmem>>, %arg5: memref<16x256xf32, #tpu.memory_space<vmem>>, %arg6: memref<64x256xf32, #tpu.memory_space<vmem>>, %arg7: memref<1x256xf32, #tpu.memory_space<vmem>>, %arg8: memref<1x64xf32, #tpu.memory_space<vmem>>, %arg9: memref<1x64xf32, #tpu.memory_space<vmem>>, %arg10: memref<64x64xf32, #tpu.memory_space<vmem>>, %arg11: memref<1x64xf32, #tpu.memory_space<vmem>>, %arg12: memref<1x1x64xf32, #tpu.memory_space<vmem>>, %arg13: memref<64x16xf32, #tpu.memory_space<vmem>>, %arg14: memref<8x128xf32, #tpu.memory_space<vmem>>, %arg15: memref<8x8x256xf32, #tpu.memory_space<vmem>>, %arg16: memref<8x8x32xf32, #tpu.memory_space<vmem>>, %arg17: memref<8x8x32xf32, #tpu.memory_space<vmem>>, %arg18: memref<8x64xf32, #tpu.memory_space<vmem>>, %arg19: memref<8x64xf32, #tpu.memory_space<vmem>>, %arg20: memref<3x8x256xf32, #tpu.memory_space<vmem>>, %arg21: memref<3x8x32xf32, #tpu.memory_space<vmem>>, %arg22: memref<3x8x32xf32, #tpu.memory_space<vmem>>, %arg23: memref<8x64xf32, #tpu.memory_space<vmem>>, %arg24: memref<8x64xf32, #tpu.memory_space<vmem>>) attributes {dimension_semantics = [#tpu.dimension_semantics<arbitrary>], iteration_bounds = array<i64: 1>, scalar_prefetch = 0 : i64, scratch_operands = 10 : i64, tpu.core_type = #tpu.core_type<tc>, window_params = [{pipeline_mode = #tpu.pipeline_mode<synchronous>, transform_indices = @transform_0, window_bounds = array<i64: 8, 8, 16>}, {pipeline_mode = #tpu.pipeline_mode<synchronous>, transform_indices = @transform_1, window_bounds = array<i64: 8, 8, 1>}, {pipeline_mode = #tpu.pipeline_mode<synchronous>, transform_indices = @transform_2, window_bounds = array<i64: 24, 8>}, {pipeline_mode = #tpu.pipeline_mode<synchronous>, transform_indices = @transform_3, window_bounds = array<i64: 3, 8, 1>}, {pipeline_mode = #tpu.pipeline_mode<synchronous>, transform_indices = @transform_4, window_bounds = array<i64: 16, 256>}, {pipeline_mode = #tpu.pipeline_mode<synchronous>, transform_indices = @transform_5, window_bounds = array<i64: 64, 256>}, {pipeline_mode = #tpu.pipeline_mode<synchronous>, transform_indices = @transform_6, window_bounds = array<i64: 1, 256>}, {pipeline_mode = #tpu.pipeline_mode<synchronous>, transform_indices = @transform_7, window_bounds = array<i64: 1, 64>}, {pipeline_mode = #tpu.pipeline_mode<synchronous>, transform_indices = @transform_8, window_bounds = array<i64: 1, 64>}, {pipeline_mode = #tpu.pipeline_mode<synchronous>, transform_indices = @transform_9, window_bounds = array<i64: 64, 64>}, {pipeline_mode = #tpu.pipeline_mode<synchronous>, transform_indices = @transform_10, window_bounds = array<i64: 1, 64>}, {pipeline_mode = #tpu.pipeline_mode<synchronous>, transform_indices = @transform_11, window_bounds = array<i64: 1, 1, 64>}, {pipeline_mode = #tpu.pipeline_mode<synchronous>, transform_indices = @transform_12, window_bounds = array<i64: 64, 16>}, {pipeline_mode = #tpu.pipeline_mode<synchronous>, transform_indices = @transform_13, window_bounds = array<i64: 8, 128>}]} {
    %c0 = arith.constant 0 : index
    %c0_0 = arith.constant 0 : index
    %0 = vector.load %arg5[%c0, %c0_0] : memref<16x256xf32, #tpu.memory_space<vmem>>, vector<16x256xf32>
    %c0_1 = arith.constant 0 : index
    %c0_2 = arith.constant 0 : index
    %1 = vector.load %arg6[%c0_1, %c0_2] : memref<64x256xf32, #tpu.memory_space<vmem>>, vector<64x256xf32>
    %c0_3 = arith.constant 0 : index
    %c0_4 = arith.constant 0 : index
    %2 = vector.load %arg7[%c0_3, %c0_4] : memref<1x256xf32, #tpu.memory_space<vmem>>, vector<1x256xf32>
    %c0_5 = arith.constant 0 : index
    %c0_6 = arith.constant 0 : index
    %3 = vector.load %arg8[%c0_5, %c0_6] : memref<1x64xf32, #tpu.memory_space<vmem>>, vector<1x64xf32>
    %c0_7 = arith.constant 0 : index
    %c0_8 = arith.constant 0 : index
    %4 = vector.load %arg9[%c0_7, %c0_8] : memref<1x64xf32, #tpu.memory_space<vmem>>, vector<1x64xf32>
    %c0_9 = arith.constant 0 : index
    %c0_10 = arith.constant 0 : index
    %5 = vector.load %arg10[%c0_9, %c0_10] : memref<64x64xf32, #tpu.memory_space<vmem>>, vector<64x64xf32>
    %c0_11 = arith.constant 0 : index
    %c0_12 = arith.constant 0 : index
    %6 = vector.load %arg11[%c0_11, %c0_12] : memref<1x64xf32, #tpu.memory_space<vmem>>, vector<1x64xf32>
    %c0_13 = arith.constant 0 : index
    %c0_14 = arith.constant 0 : index
    %c0_15 = arith.constant 0 : index
    %7 = vector.load %arg12[%c0_13, %c0_14, %c0_15] : memref<1x1x64xf32, #tpu.memory_space<vmem>>, vector<1x1x64xf32>
    %c0_16 = arith.constant 0 : index
    %c0_17 = arith.constant 0 : index
    %c0_18 = arith.constant 0 : index
    %8 = vector.load %arg1[%c0_16, %c0_17, %c0_18] : memref<8x8x16xf32, #tpu.memory_space<vmem>>, vector<8x8x16xf32>
    %9 = vector.shape_cast %8 : vector<8x8x16xf32> to vector<64x16xf32>
    %cst = arith.constant dense<0.000000e+00> : vector<64x256xf32>
    %10 = tpu.matmul %9, %0, %cst {dimension_numbers = #tpu.dot_dimension_numbers<[1], [0], [0], [1], [0, 0, 1, 1], [], []>} : vector<64x16xf32>, vector<16x256xf32>, vector<64x256xf32> -> vector<64x256xf32>
    %11 = vector.broadcast %2 : vector<1x256xf32> to vector<64x256xf32>
    %12 = arith.addf %10, %11 : vector<64x256xf32>
    %13 = vector.shape_cast %12 : vector<64x256xf32> to vector<8x8x256xf32>
    %c0_19 = arith.constant 0 : index
    %c0_20 = arith.constant 0 : index
    %c0_21 = arith.constant 0 : index
    %14 = vector.load %arg15[%c0_19, %c0_20, %c0_21] : memref<8x8x256xf32, #tpu.memory_space<vmem>>, vector<8x8x256xf32>
    tpu.vector_store %arg15[%c0_19, %c0_20, %c0_21], %13 {strides = array<i32>} : memref<8x8x256xf32, #tpu.memory_space<vmem>>, vector<8x8x256xf32>,
    %15 = vector.shape_cast %3 : vector<1x64xf32> to vector<1x64xf32>
    %16 = vector.broadcast %15 : vector<1x64xf32> to vector<8x64xf32>
    %c0_22 = arith.constant 0 : index
    %c0_23 = arith.constant 0 : index
    %17 = vector.load %arg18[%c0_22, %c0_23] : memref<8x64xf32, #tpu.memory_space<vmem>>, vector<8x64xf32>
    tpu.vector_store %arg18[%c0_22, %c0_23], %16 {strides = array<i32>} : memref<8x64xf32, #tpu.memory_space<vmem>>, vector<8x64xf32>,
    %18 = vector.shape_cast %4 : vector<1x64xf32> to vector<1x64xf32>
    %19 = vector.broadcast %18 : vector<1x64xf32> to vector<8x64xf32>
    %c0_24 = arith.constant 0 : index
    %c0_25 = arith.constant 0 : index
    %20 = vector.load %arg19[%c0_24, %c0_25] : memref<8x64xf32, #tpu.memory_space<vmem>>, vector<8x64xf32>
    tpu.vector_store %arg19[%c0_24, %c0_25], %19 {strides = array<i32>} : memref<8x64xf32, #tpu.memory_space<vmem>>, vector<8x64xf32>,
    %c0_i32 = arith.constant 0 : i32
    %c7_i32 = arith.constant 7 : i32
    %21 = arith.subi %c7_i32, %c0_i32 : i32
    %22 = arith.index_cast %c0_i32 : i32 to index
    %c0_26 = arith.constant 0 : index
    %c0_27 = arith.constant 0 : index
    %23 = vector.load %arg2[%22, %c0_26, %c0_27] : memref<8x8x1xf32, #tpu.memory_space<vmem>>, vector<1x8x1xf32>
    %24 = vector.shape_cast %23 : vector<1x8x1xf32> to vector<8x1xf32>
    %cst_28 = arith.constant 5.000000e-01 : f32
    %25 = vector.broadcast %cst_28 : f32 to vector<8x1xf32>
    %26 = arith.cmpf ogt, %24, %25 : vector<8x1xf32>
    %27 = arith.index_cast %21 : i32 to index
    %c0_29 = arith.constant 0 : index
    %c0_30 = arith.constant 0 : index
    %28 = vector.load %arg2[%27, %c0_29, %c0_30] : memref<8x8x1xf32, #tpu.memory_space<vmem>>, vector<1x8x1xf32>
    %29 = vector.shape_cast %28 : vector<1x8x1xf32> to vector<8x1xf32>
    %cst_31 = arith.constant 5.000000e-01 : f32
    %30 = vector.broadcast %cst_31 : f32 to vector<8x1xf32>
    %31 = arith.cmpf ogt, %29, %30 : vector<8x1xf32>
    %c0_32 = arith.constant 0 : index
    %c0_33 = arith.constant 0 : index
    %32 = vector.load %arg18[%c0_32, %c0_33] : memref<8x64xf32, #tpu.memory_space<vmem>>, vector<8x64xf32>
    %c0_34 = arith.constant 0 : index
    %c0_35 = arith.constant 0 : index
    %33 = vector.load %arg19[%c0_34, %c0_35] : memref<8x64xf32, #tpu.memory_space<vmem>>, vector<8x64xf32>
    %cst_36 = arith.constant dense<0.000000e+00> : vector<8x256xf32>
    %34 = tpu.matmul %32, %1, %cst_36 {dimension_numbers = #tpu.dot_dimension_numbers<[1], [0], [0], [1], [0, 0, 1, 1], [], []>} : vector<8x64xf32>, vector<64x256xf32>, vector<8x256xf32> -> vector<8x256xf32>
    %35 = arith.index_cast %c0_i32 : i32 to index
    %c0_37 = arith.constant 0 : index
    %c0_38 = arith.constant 0 : index
    %36 = vector.load %arg15[%35, %c0_37, %c0_38] : memref<8x8x256xf32, #tpu.memory_space<vmem>>, vector<1x8x256xf32>
    %37 = vector.shape_cast %36 : vector<1x8x256xf32> to vector<8x256xf32>
    %38 = vector.extract_strided_slice %37 {offsets = [0, 0], sizes = [8, 128], strides = [1, 1]} : vector<8x256xf32> to vector<8x128xf32>
    %39 = vector.extract_strided_slice %34 {offsets = [0, 0], sizes = [8, 128], strides = [1, 1]} : vector<8x256xf32> to vector<8x128xf32>
    %40 = arith.addf %38, %39 : vector<8x128xf32>
    %41 = arith.index_cast %21 : i32 to index
    %c0_39 = arith.constant 0 : index
    %c0_40 = arith.constant 0 : index
    %42 = vector.load %arg15[%41, %c0_39, %c0_40] : memref<8x8x256xf32, #tpu.memory_space<vmem>>, vector<1x8x256xf32>
    %43 = vector.shape_cast %42 : vector<1x8x256xf32> to vector<8x256xf32>
    %44 = vector.extract_strided_slice %43 {offsets = [0, 128], sizes = [8, 128], strides = [1, 1]} : vector<8x256xf32> to vector<8x128xf32>
    %45 = vector.extract_strided_slice %34 {offsets = [0, 128], sizes = [8, 128], strides = [1, 1]} : vector<8x256xf32> to vector<8x128xf32>
    %46 = arith.addf %44, %45 : vector<8x128xf32>
    %47 = vector.extract_strided_slice %33 {offsets = [0, 0], sizes = [8, 32], strides = [1, 1]} : vector<8x64xf32> to vector<8x32xf32>
    %48 = vector.extract_strided_slice %40 {offsets = [0, 0], sizes = [8, 96], strides = [1, 1]} : vector<8x128xf32> to vector<8x96xf32>
    %cst_41 = arith.constant 5.000000e-01 : f32
    %49 = vector.broadcast %cst_41 : f32 to vector<8x96xf32>
    %50 = arith.mulf %49, %48 : vector<8x96xf32>
    %51 = math.tanh %50 : vector<8x96xf32>
    %cst_42 = arith.constant 5.000000e-01 : f32
    %52 = vector.broadcast %cst_42 : f32 to vector<8x96xf32>
    %53 = arith.mulf %52, %51 : vector<8x96xf32>
    %cst_43 = arith.constant 5.000000e-01 : f32
    %54 = vector.broadcast %cst_43 : f32 to vector<8x96xf32>
    %55 = arith.addf %53, %54 : vector<8x96xf32>
    %56 = vector.extract_strided_slice %40 {offsets = [0, 96], sizes = [8, 32], strides = [1, 1]} : vector<8x128xf32> to vector<8x32xf32>
    %57 = math.tanh %56 : vector<8x32xf32>
    %58 = vector.extract_strided_slice %55 {offsets = [0, 32], sizes = [8, 32], strides = [1, 1]} : vector<8x96xf32> to vector<8x32xf32>
    %59 = arith.mulf %58, %47 : vector<8x32xf32>
    %60 = vector.extract_strided_slice %55 {offsets = [0, 0], sizes = [8, 32], strides = [1, 1]} : vector<8x96xf32> to vector<8x32xf32>
    %61 = arith.mulf %60, %57 : vector<8x32xf32>
    %62 = arith.addf %59, %61 : vector<8x32xf32>
    %63 = vector.extract_strided_slice %55 {offsets = [0, 64], sizes = [8, 32], strides = [1, 1]} : vector<8x96xf32> to vector<8x32xf32>
    %64 = math.tanh %62 : vector<8x32xf32>
    %65 = arith.mulf %63, %64 : vector<8x32xf32>
    %66 = vector.extract_strided_slice %33 {offsets = [0, 32], sizes = [8, 32], strides = [1, 1]} : vector<8x64xf32> to vector<8x32xf32>
    %67 = vector.extract_strided_slice %46 {offsets = [0, 0], sizes = [8, 96], strides = [1, 1]} : vector<8x128xf32> to vector<8x96xf32>
    %cst_44 = arith.constant 5.000000e-01 : f32
    %68 = vector.broadcast %cst_44 : f32 to vector<8x96xf32>
    %69 = arith.mulf %68, %67 : vector<8x96xf32>
    %70 = math.tanh %69 : vector<8x96xf32>
    %cst_45 = arith.constant 5.000000e-01 : f32
    %71 = vector.broadcast %cst_45 : f32 to vector<8x96xf32>
    %72 = arith.mulf %71, %70 : vector<8x96xf32>
    %cst_46 = arith.constant 5.000000e-01 : f32
    %73 = vector.broadcast %cst_46 : f32 to vector<8x96xf32>
    %74 = arith.addf %72, %73 : vector<8x96xf32>
    %75 = vector.extract_strided_slice %46 {offsets = [0, 96], sizes = [8, 32], strides = [1, 1]} : vector<8x128xf32> to vector<8x32xf32>
    %76 = math.tanh %75 : vector<8x32xf32>
    %77 = vector.extract_strided_slice %74 {offsets = [0, 32], sizes = [8, 32], strides = [1, 1]} : vector<8x96xf32> to vector<8x32xf32>
    %78 = arith.mulf %77, %66 : vector<8x32xf32>
    %79 = vector.extract_strided_slice %74 {offsets = [0, 0], sizes = [8, 32], strides = [1, 1]} : vector<8x96xf32> to vector<8x32xf32>
    %80 = arith.mulf %79, %76 : vector<8x32xf32>
    %81 = arith.addf %78, %80 : vector<8x32xf32>
    %82 = vector.extract_strided_slice %74 {offsets = [0, 64], sizes = [8, 32], strides = [1, 1]} : vector<8x96xf32> to vector<8x32xf32>
    %83 = math.tanh %81 : vector<8x32xf32>
    %84 = arith.mulf %82, %83 : vector<8x32xf32>
    %85 = vector.extract_strided_slice %32 {offsets = [0, 0], sizes = [8, 32], strides = [1, 1]} : vector<8x64xf32> to vector<8x32xf32>
    %86 = vector.shape_cast %26 : vector<8x1xi1> to vector<8x1xi1>
    %87 = vector.broadcast %86 : vector<8x1xi1> to vector<8x32xi1>
    %88 = arith.select %87, %65, %85 : vector<8x32xi1>, vector<8x32xf32>
    %89 = vector.extract_strided_slice %32 {offsets = [0, 32], sizes = [8, 32], strides = [1, 1]} : vector<8x64xf32> to vector<8x32xf32>
    %90 = vector.shape_cast %31 : vector<8x1xi1> to vector<8x1xi1>
    %91 = vector.broadcast %90 : vector<8x1xi1> to vector<8x32xi1>
    %92 = arith.select %91, %84, %89 : vector<8x32xi1>, vector<8x32xf32>
    %93 = tpu.concatenate %88, %92 in 1 : vector<8x32xf32>, vector<8x32xf32> -> vector<8x64xf32>
    %c0_47 = arith.constant 0 : index
    %c0_48 = arith.constant 0 : index
    %94 = vector.load %arg18[%c0_47, %c0_48] : memref<8x64xf32, #tpu.memory_space<vmem>>, vector<8x64xf32>
    tpu.vector_store %arg18[%c0_47, %c0_48], %93 {strides = array<i32>} : memref<8x64xf32, #tpu.memory_space<vmem>>, vector<8x64xf32>,
    %95 = vector.extract_strided_slice %33 {offsets = [0, 0], sizes = [8, 32], strides = [1, 1]} : vector<8x64xf32> to vector<8x32xf32>
    %96 = vector.shape_cast %26 : vector<8x1xi1> to vector<8x1xi1>
    %97 = vector.broadcast %96 : vector<8x1xi1> to vector<8x32xi1>
    %98 = arith.select %97, %62, %95 : vector<8x32xi1>, vector<8x32xf32>
    %99 = vector.extract_strided_slice %33 {offsets = [0, 32], sizes = [8, 32], strides = [1, 1]} : vector<8x64xf32> to vector<8x32xf32>
    %100 = vector.shape_cast %31 : vector<8x1xi1> to vector<8x1xi1>
    %101 = vector.broadcast %100 : vector<8x1xi1> to vector<8x32xi1>
    %102 = arith.select %101, %81, %99 : vector<8x32xi1>, vector<8x32xf32>
    %103 = tpu.concatenate %98, %102 in 1 : vector<8x32xf32>, vector<8x32xf32> -> vector<8x64xf32>
    %c0_49 = arith.constant 0 : index
    %c0_50 = arith.constant 0 : index
    %104 = vector.load %arg19[%c0_49, %c0_50] : memref<8x64xf32, #tpu.memory_space<vmem>>, vector<8x64xf32>
    tpu.vector_store %arg19[%c0_49, %c0_50], %103 {strides = array<i32>} : memref<8x64xf32, #tpu.memory_space<vmem>>, vector<8x64xf32>,
    %cst_51 = arith.constant 0.000000e+00 : f32
    %105 = vector.shape_cast %26 : vector<8x1xi1> to vector<8x1xi1>
    %106 = vector.broadcast %105 : vector<8x1xi1> to vector<8x32xi1>
    %107 = vector.broadcast %cst_51 : f32 to vector<8x32xf32>
    %108 = arith.select %106, %65, %107 : vector<8x32xi1>, vector<8x32xf32>
    %109 = arith.index_cast %c0_i32 : i32 to index
    %c0_52 = arith.constant 0 : index
    %c0_53 = arith.constant 0 : index
    %110 = vector.load %arg16[%109, %c0_52, %c0_53] : memref<8x8x32xf32, #tpu.memory_space<vmem>>, vector<1x8x32xf32>
    %111 = vector.shape_cast %110 : vector<1x8x32xf32> to vector<8x32xf32>
    %112 = vector.shape_cast %108 : vector<8x32xf32> to vector<1x8x32xf32>
    tpu.vector_store %arg16[%109, %c0_52, %c0_53], %112 {strides = array<i32>} : memref<8x8x32xf32, #tpu.memory_space<vmem>>, vector<1x8x32xf32>,
    %cst_54 = arith.constant 0.000000e+00 : f32
    %113 = vector.shape_cast %31 : vector<8x1xi1> to vector<8x1xi1>
    %114 = vector.broadcast %113 : vector<8x1xi1> to vector<8x32xi1>
    %115 = vector.broadcast %cst_54 : f32 to vector<8x32xf32>
    %116 = arith.select %114, %84, %115 : vector<8x32xi1>, vector<8x32xf32>
    %117 = arith.index_cast %21 : i32 to index
    %c0_55 = arith.constant 0 : index
    %c0_56 = arith.constant 0 : index
    %118 = vector.load %arg17[%117, %c0_55, %c0_56] : memref<8x8x32xf32, #tpu.memory_space<vmem>>, vector<1x8x32xf32>
    %119 = vector.shape_cast %118 : vector<1x8x32xf32> to vector<8x32xf32>
    %120 = vector.shape_cast %116 : vector<8x32xf32> to vector<1x8x32xf32>
    tpu.vector_store %arg17[%117, %c0_55, %c0_56], %120 {strides = array<i32>} : memref<8x8x32xf32, #tpu.memory_space<vmem>>, vector<1x8x32xf32>,
    %c1_i32 = arith.constant 1 : i32
    %c7_i32_57 = arith.constant 7 : i32
    %121 = arith.subi %c7_i32_57, %c1_i32 : i32
    %122 = arith.index_cast %c1_i32 : i32 to index
    %c0_58 = arith.constant 0 : index
    %c0_59 = arith.constant 0 : index
    %123 = vector.load %arg2[%122, %c0_58, %c0_59] : memref<8x8x1xf32, #tpu.memory_space<vmem>>, vector<1x8x1xf32>
    %124 = vector.shape_cast %123 : vector<1x8x1xf32> to vector<8x1xf32>
    %cst_60 = arith.constant 5.000000e-01 : f32
    %125 = vector.broadcast %cst_60 : f32 to vector<8x1xf32>
    %126 = arith.cmpf ogt, %124, %125 : vector<8x1xf32>
    %127 = arith.index_cast %121 : i32 to index
    %c0_61 = arith.constant 0 : index
    %c0_62 = arith.constant 0 : index
    %128 = vector.load %arg2[%127, %c0_61, %c0_62] : memref<8x8x1xf32, #tpu.memory_space<vmem>>, vector<1x8x1xf32>
    %129 = vector.shape_cast %128 : vector<1x8x1xf32> to vector<8x1xf32>
    %cst_63 = arith.constant 5.000000e-01 : f32
    %130 = vector.broadcast %cst_63 : f32 to vector<8x1xf32>
    %131 = arith.cmpf ogt, %129, %130 : vector<8x1xf32>
    %c0_64 = arith.constant 0 : index
    %c0_65 = arith.constant 0 : index
    %132 = vector.load %arg18[%c0_64, %c0_65] : memref<8x64xf32, #tpu.memory_space<vmem>>, vector<8x64xf32>
    %c0_66 = arith.constant 0 : index
    %c0_67 = arith.constant 0 : index
    %133 = vector.load %arg19[%c0_66, %c0_67] : memref<8x64xf32, #tpu.memory_space<vmem>>, vector<8x64xf32>
    %cst_68 = arith.constant dense<0.000000e+00> : vector<8x256xf32>
    %134 = tpu.matmul %132, %1, %cst_68 {dimension_numbers = #tpu.dot_dimension_numbers<[1], [0], [0], [1], [0, 0, 1, 1], [], []>} : vector<8x64xf32>, vector<64x256xf32>, vector<8x256xf32> -> vector<8x256xf32>
    %135 = arith.index_cast %c1_i32 : i32 to index
    %c0_69 = arith.constant 0 : index
    %c0_70 = arith.constant 0 : index
    %136 = vector.load %arg15[%135, %c0_69, %c0_70] : memref<8x8x256xf32, #tpu.memory_space<vmem>>, vector<1x8x256xf32>
    %137 = vector.shape_cast %136 : vector<1x8x256xf32> to vector<8x256xf32>
    %138 = vector.extract_strided_slice %137 {offsets = [0, 0], sizes = [8, 128], strides = [1, 1]} : vector<8x256xf32> to vector<8x128xf32>
    %139 = vector.extract_strided_slice %134 {offsets = [0, 0], sizes = [8, 128], strides = [1, 1]} : vector<8x256xf32> to vector<8x128xf32>
    %140 = arith.addf %138, %139 : vector<8x128xf32>
    %141 = arith.index_cast %121 : i32 to index
    %c0_71 = arith.constant 0 : index
    %c0_72 = arith.constant 0 : index
    %142 = vector.load %arg15[%141, %c0_71, %c0_72] : memref<8x8x256xf32, #tpu.memory_space<vmem>>, vector<1x8x256xf32>
    %143 = vector.shape_cast %142 : vector<1x8x256xf32> to vector<8x256xf32>
    %144 = vector.extract_strided_slice %143 {offsets = [0, 128], sizes = [8, 128], strides = [1, 1]} : vector<8x256xf32> to vector<8x128xf32>
    %145 = vector.extract_strided_slice %134 {offsets = [0, 128], sizes = [8, 128], strides = [1, 1]} : vector<8x256xf32> to vector<8x128xf32>
    %146 = arith.addf %144, %145 : vector<8x128xf32>
    %147 = vector.extract_strided_slice %133 {offsets = [0, 0], sizes = [8, 32], strides = [1, 1]} : vector<8x64xf32> to vector<8x32xf32>
    %148 = vector.extract_strided_slice %140 {offsets = [0, 0], sizes = [8, 96], strides = [1, 1]} : vector<8x128xf32> to vector<8x96xf32>
    %cst_73 = arith.constant 5.000000e-01 : f32
    %149 = vector.broadcast %cst_73 : f32 to vector<8x96xf32>
    %150 = arith.mulf %149, %148 : vector<8x96xf32>
    %151 = math.tanh %150 : vector<8x96xf32>
    %cst_74 = arith.constant 5.000000e-01 : f32
    %152 = vector.broadcast %cst_74 : f32 to vector<8x96xf32>
    %153 = arith.mulf %152, %151 : vector<8x96xf32>
    %cst_75 = arith.constant 5.000000e-01 : f32
    %154 = vector.broadcast %cst_75 : f32 to vector<8x96xf32>
    %155 = arith.addf %153, %154 : vector<8x96xf32>
    %156 = vector.extract_strided_slice %140 {offsets = [0, 96], sizes = [8, 32], strides = [1, 1]} : vector<8x128xf32> to vector<8x32xf32>
    %157 = math.tanh %156 : vector<8x32xf32>
    %158 = vector.extract_strided_slice %155 {offsets = [0, 32], sizes = [8, 32], strides = [1, 1]} : vector<8x96xf32> to vector<8x32xf32>
    %159 = arith.mulf %158, %147 : vector<8x32xf32>
    %160 = vector.extract_strided_slice %155 {offsets = [0, 0], sizes = [8, 32], strides = [1, 1]} : vector<8x96xf32> to vector<8x32xf32>
    %161 = arith.mulf %160, %157 : vector<8x32xf32>
    %162 = arith.addf %159, %161 : vector<8x32xf32>
    %163 = vector.extract_strided_slice %155 {offsets = [0, 64], sizes = [8, 32], strides = [1, 1]} : vector<8x96xf32> to vector<8x32xf32>
    %164 = math.tanh %162 : vector<8x32xf32>
    %165 = arith.mulf %163, %164 : vector<8x32xf32>
    %166 = vector.extract_strided_slice %133 {offsets = [0, 32], sizes = [8, 32], strides = [1, 1]} : vector<8x64xf32> to vector<8x32xf32>
    %167 = vector.extract_strided_slice %146 {offsets = [0, 0], sizes = [8, 96], strides = [1, 1]} : vector<8x128xf32> to vector<8x96xf32>
    %cst_76 = arith.constant 5.000000e-01 : f32
    %168 = vector.broadcast %cst_76 : f32 to vector<8x96xf32>
    %169 = arith.mulf %168, %167 : vector<8x96xf32>
    %170 = math.tanh %169 : vector<8x96xf32>
    %cst_77 = arith.constant 5.000000e-01 : f32
    %171 = vector.broadcast %cst_77 : f32 to vector<8x96xf32>
    %172 = arith.mulf %171, %170 : vector<8x96xf32>
    %cst_78 = arith.constant 5.000000e-01 : f32
    %173 = vector.broadcast %cst_78 : f32 to vector<8x96xf32>
    %174 = arith.addf %172, %173 : vector<8x96xf32>
    %175 = vector.extract_strided_slice %146 {offsets = [0, 96], sizes = [8, 32], strides = [1, 1]} : vector<8x128xf32> to vector<8x32xf32>
    %176 = math.tanh %175 : vector<8x32xf32>
    %177 = vector.extract_strided_slice %174 {offsets = [0, 32], sizes = [8, 32], strides = [1, 1]} : vector<8x96xf32> to vector<8x32xf32>
    %178 = arith.mulf %177, %166 : vector<8x32xf32>
    %179 = vector.extract_strided_slice %174 {offsets = [0, 0], sizes = [8, 32], strides = [1, 1]} : vector<8x96xf32> to vector<8x32xf32>
    %180 = arith.mulf %179, %176 : vector<8x32xf32>
    %181 = arith.addf %178, %180 : vector<8x32xf32>
    %182 = vector.extract_strided_slice %174 {offsets = [0, 64], sizes = [8, 32], strides = [1, 1]} : vector<8x96xf32> to vector<8x32xf32>
    %183 = math.tanh %181 : vector<8x32xf32>
    %184 = arith.mulf %182, %183 : vector<8x32xf32>
    %185 = vector.extract_strided_slice %132 {offsets = [0, 0], sizes = [8, 32], strides = [1, 1]} : vector<8x64xf32> to vector<8x32xf32>
    %186 = vector.shape_cast %126 : vector<8x1xi1> to vector<8x1xi1>
    %187 = vector.broadcast %186 : vector<8x1xi1> to vector<8x32xi1>
    %188 = arith.select %187, %165, %185 : vector<8x32xi1>, vector<8x32xf32>
    %189 = vector.extract_strided_slice %132 {offsets = [0, 32], sizes = [8, 32], strides = [1, 1]} : vector<8x64xf32> to vector<8x32xf32>
    %190 = vector.shape_cast %131 : vector<8x1xi1> to vector<8x1xi1>
    %191 = vector.broadcast %190 : vector<8x1xi1> to vector<8x32xi1>
    %192 = arith.select %191, %184, %189 : vector<8x32xi1>, vector<8x32xf32>
    %193 = tpu.concatenate %188, %192 in 1 : vector<8x32xf32>, vector<8x32xf32> -> vector<8x64xf32>
    %c0_79 = arith.constant 0 : index
    %c0_80 = arith.constant 0 : index
    %194 = vector.load %arg18[%c0_79, %c0_80] : memref<8x64xf32, #tpu.memory_space<vmem>>, vector<8x64xf32>
    tpu.vector_store %arg18[%c0_79, %c0_80], %193 {strides = array<i32>} : memref<8x64xf32, #tpu.memory_space<vmem>>, vector<8x64xf32>,
    %195 = vector.extract_strided_slice %133 {offsets = [0, 0], sizes = [8, 32], strides = [1, 1]} : vector<8x64xf32> to vector<8x32xf32>
    %196 = vector.shape_cast %126 : vector<8x1xi1> to vector<8x1xi1>
    %197 = vector.broadcast %196 : vector<8x1xi1> to vector<8x32xi1>
    %198 = arith.select %197, %162, %195 : vector<8x32xi1>, vector<8x32xf32>
    %199 = vector.extract_strided_slice %133 {offsets = [0, 32], sizes = [8, 32], strides = [1, 1]} : vector<8x64xf32> to vector<8x32xf32>
    %200 = vector.shape_cast %131 : vector<8x1xi1> to vector<8x1xi1>
    %201 = vector.broadcast %200 : vector<8x1xi1> to vector<8x32xi1>
    %202 = arith.select %201, %181, %199 : vector<8x32xi1>, vector<8x32xf32>
    %203 = tpu.concatenate %198, %202 in 1 : vector<8x32xf32>, vector<8x32xf32> -> vector<8x64xf32>
    %c0_81 = arith.constant 0 : index
    %c0_82 = arith.constant 0 : index
    %204 = vector.load %arg19[%c0_81, %c0_82] : memref<8x64xf32, #tpu.memory_space<vmem>>, vector<8x64xf32>
    tpu.vector_store %arg19[%c0_81, %c0_82], %203 {strides = array<i32>} : memref<8x64xf32, #tpu.memory_space<vmem>>, vector<8x64xf32>,
    %cst_83 = arith.constant 0.000000e+00 : f32
    %205 = vector.shape_cast %126 : vector<8x1xi1> to vector<8x1xi1>
    %206 = vector.broadcast %205 : vector<8x1xi1> to vector<8x32xi1>
    %207 = vector.broadcast %cst_83 : f32 to vector<8x32xf32>
    %208 = arith.select %206, %165, %207 : vector<8x32xi1>, vector<8x32xf32>
    %209 = arith.index_cast %c1_i32 : i32 to index
    %c0_84 = arith.constant 0 : index
    %c0_85 = arith.constant 0 : index
    %210 = vector.load %arg16[%209, %c0_84, %c0_85] : memref<8x8x32xf32, #tpu.memory_space<vmem>>, vector<1x8x32xf32>
    %211 = vector.shape_cast %210 : vector<1x8x32xf32> to vector<8x32xf32>
    %212 = vector.shape_cast %208 : vector<8x32xf32> to vector<1x8x32xf32>
    tpu.vector_store %arg16[%209, %c0_84, %c0_85], %212 {strides = array<i32>} : memref<8x8x32xf32, #tpu.memory_space<vmem>>, vector<1x8x32xf32>,
    %cst_86 = arith.constant 0.000000e+00 : f32
    %213 = vector.shape_cast %131 : vector<8x1xi1> to vector<8x1xi1>
    %214 = vector.broadcast %213 : vector<8x1xi1> to vector<8x32xi1>
    %215 = vector.broadcast %cst_86 : f32 to vector<8x32xf32>
    %216 = arith.select %214, %184, %215 : vector<8x32xi1>, vector<8x32xf32>
    %217 = arith.index_cast %121 : i32 to index
    %c0_87 = arith.constant 0 : index
    %c0_88 = arith.constant 0 : index
    %218 = vector.load %arg17[%217, %c0_87, %c0_88] : memref<8x8x32xf32, #tpu.memory_space<vmem>>, vector<1x8x32xf32>
    %219 = vector.shape_cast %218 : vector<1x8x32xf32> to vector<8x32xf32>
    %220 = vector.shape_cast %216 : vector<8x32xf32> to vector<1x8x32xf32>
    tpu.vector_store %arg17[%217, %c0_87, %c0_88], %220 {strides = array<i32>} : memref<8x8x32xf32, #tpu.memory_space<vmem>>, vector<1x8x32xf32>,
    %c2_i32 = arith.constant 2 : i32
    %c7_i32_89 = arith.constant 7 : i32
    %221 = arith.subi %c7_i32_89, %c2_i32 : i32
    %222 = arith.index_cast %c2_i32 : i32 to index
    %c0_90 = arith.constant 0 : index
    %c0_91 = arith.constant 0 : index
    %223 = vector.load %arg2[%222, %c0_90, %c0_91] : memref<8x8x1xf32, #tpu.memory_space<vmem>>, vector<1x8x1xf32>
    %224 = vector.shape_cast %223 : vector<1x8x1xf32> to vector<8x1xf32>
    %cst_92 = arith.constant 5.000000e-01 : f32
    %225 = vector.broadcast %cst_92 : f32 to vector<8x1xf32>
    %226 = arith.cmpf ogt, %224, %225 : vector<8x1xf32>
    %227 = arith.index_cast %221 : i32 to index
    %c0_93 = arith.constant 0 : index
    %c0_94 = arith.constant 0 : index
    %228 = vector.load %arg2[%227, %c0_93, %c0_94] : memref<8x8x1xf32, #tpu.memory_space<vmem>>, vector<1x8x1xf32>
    %229 = vector.shape_cast %228 : vector<1x8x1xf32> to vector<8x1xf32>
    %cst_95 = arith.constant 5.000000e-01 : f32
    %230 = vector.broadcast %cst_95 : f32 to vector<8x1xf32>
    %231 = arith.cmpf ogt, %229, %230 : vector<8x1xf32>
    %c0_96 = arith.constant 0 : index
    %c0_97 = arith.constant 0 : index
    %232 = vector.load %arg18[%c0_96, %c0_97] : memref<8x64xf32, #tpu.memory_space<vmem>>, vector<8x64xf32>
    %c0_98 = arith.constant 0 : index
    %c0_99 = arith.constant 0 : index
    %233 = vector.load %arg19[%c0_98, %c0_99] : memref<8x64xf32, #tpu.memory_space<vmem>>, vector<8x64xf32>
    %cst_100 = arith.constant dense<0.000000e+00> : vector<8x256xf32>
    %234 = tpu.matmul %232, %1, %cst_100 {dimension_numbers = #tpu.dot_dimension_numbers<[1], [0], [0], [1], [0, 0, 1, 1], [], []>} : vector<8x64xf32>, vector<64x256xf32>, vector<8x256xf32> -> vector<8x256xf32>
    %235 = arith.index_cast %c2_i32 : i32 to index
    %c0_101 = arith.constant 0 : index
    %c0_102 = arith.constant 0 : index
    %236 = vector.load %arg15[%235, %c0_101, %c0_102] : memref<8x8x256xf32, #tpu.memory_space<vmem>>, vector<1x8x256xf32>
    %237 = vector.shape_cast %236 : vector<1x8x256xf32> to vector<8x256xf32>
    %238 = vector.extract_strided_slice %237 {offsets = [0, 0], sizes = [8, 128], strides = [1, 1]} : vector<8x256xf32> to vector<8x128xf32>
    %239 = vector.extract_strided_slice %234 {offsets = [0, 0], sizes = [8, 128], strides = [1, 1]} : vector<8x256xf32> to vector<8x128xf32>
    %240 = arith.addf %238, %239 : vector<8x128xf32>
    %241 = arith.index_cast %221 : i32 to index
    %c0_103 = arith.constant 0 : index
    %c0_104 = arith.constant 0 : index
    %242 = vector.load %arg15[%241, %c0_103, %c0_104] : memref<8x8x256xf32, #tpu.memory_space<vmem>>, vector<1x8x256xf32>
    %243 = vector.shape_cast %242 : vector<1x8x256xf32> to vector<8x256xf32>
    %244 = vector.extract_strided_slice %243 {offsets = [0, 128], sizes = [8, 128], strides = [1, 1]} : vector<8x256xf32> to vector<8x128xf32>
    %245 = vector.extract_strided_slice %234 {offsets = [0, 128], sizes = [8, 128], strides = [1, 1]} : vector<8x256xf32> to vector<8x128xf32>
    %246 = arith.addf %244, %245 : vector<8x128xf32>
    %247 = vector.extract_strided_slice %233 {offsets = [0, 0], sizes = [8, 32], strides = [1, 1]} : vector<8x64xf32> to vector<8x32xf32>
    %248 = vector.extract_strided_slice %240 {offsets = [0, 0], sizes = [8, 96], strides = [1, 1]} : vector<8x128xf32> to vector<8x96xf32>
    %cst_105 = arith.constant 5.000000e-01 : f32
    %249 = vector.broadcast %cst_105 : f32 to vector<8x96xf32>
    %250 = arith.mulf %249, %248 : vector<8x96xf32>
    %251 = math.tanh %250 : vector<8x96xf32>
    %cst_106 = arith.constant 5.000000e-01 : f32
    %252 = vector.broadcast %cst_106 : f32 to vector<8x96xf32>
    %253 = arith.mulf %252, %251 : vector<8x96xf32>
    %cst_107 = arith.constant 5.000000e-01 : f32
    %254 = vector.broadcast %cst_107 : f32 to vector<8x96xf32>
    %255 = arith.addf %253, %254 : vector<8x96xf32>
    %256 = vector.extract_strided_slice %240 {offsets = [0, 96], sizes = [8, 32], strides = [1, 1]} : vector<8x128xf32> to vector<8x32xf32>
    %257 = math.tanh %256 : vector<8x32xf32>
    %258 = vector.extract_strided_slice %255 {offsets = [0, 32], sizes = [8, 32], strides = [1, 1]} : vector<8x96xf32> to vector<8x32xf32>
    %259 = arith.mulf %258, %247 : vector<8x32xf32>
    %260 = vector.extract_strided_slice %255 {offsets = [0, 0], sizes = [8, 32], strides = [1, 1]} : vector<8x96xf32> to vector<8x32xf32>
    %261 = arith.mulf %260, %257 : vector<8x32xf32>
    %262 = arith.addf %259, %261 : vector<8x32xf32>
    %263 = vector.extract_strided_slice %255 {offsets = [0, 64], sizes = [8, 32], strides = [1, 1]} : vector<8x96xf32> to vector<8x32xf32>
    %264 = math.tanh %262 : vector<8x32xf32>
    %265 = arith.mulf %263, %264 : vector<8x32xf32>
    %266 = vector.extract_strided_slice %233 {offsets = [0, 32], sizes = [8, 32], strides = [1, 1]} : vector<8x64xf32> to vector<8x32xf32>
    %267 = vector.extract_strided_slice %246 {offsets = [0, 0], sizes = [8, 96], strides = [1, 1]} : vector<8x128xf32> to vector<8x96xf32>
    %cst_108 = arith.constant 5.000000e-01 : f32
    %268 = vector.broadcast %cst_108 : f32 to vector<8x96xf32>
    %269 = arith.mulf %268, %267 : vector<8x96xf32>
    %270 = math.tanh %269 : vector<8x96xf32>
    %cst_109 = arith.constant 5.000000e-01 : f32
    %271 = vector.broadcast %cst_109 : f32 to vector<8x96xf32>
    %272 = arith.mulf %271, %270 : vector<8x96xf32>
    %cst_110 = arith.constant 5.000000e-01 : f32
    %273 = vector.broadcast %cst_110 : f32 to vector<8x96xf32>
    %274 = arith.addf %272, %273 : vector<8x96xf32>
    %275 = vector.extract_strided_slice %246 {offsets = [0, 96], sizes = [8, 32], strides = [1, 1]} : vector<8x128xf32> to vector<8x32xf32>
    %276 = math.tanh %275 : vector<8x32xf32>
    %277 = vector.extract_strided_slice %274 {offsets = [0, 32], sizes = [8, 32], strides = [1, 1]} : vector<8x96xf32> to vector<8x32xf32>
    %278 = arith.mulf %277, %266 : vector<8x32xf32>
    %279 = vector.extract_strided_slice %274 {offsets = [0, 0], sizes = [8, 32], strides = [1, 1]} : vector<8x96xf32> to vector<8x32xf32>
    %280 = arith.mulf %279, %276 : vector<8x32xf32>
    %281 = arith.addf %278, %280 : vector<8x32xf32>
    %282 = vector.extract_strided_slice %274 {offsets = [0, 64], sizes = [8, 32], strides = [1, 1]} : vector<8x96xf32> to vector<8x32xf32>
    %283 = math.tanh %281 : vector<8x32xf32>
    %284 = arith.mulf %282, %283 : vector<8x32xf32>
    %285 = vector.extract_strided_slice %232 {offsets = [0, 0], sizes = [8, 32], strides = [1, 1]} : vector<8x64xf32> to vector<8x32xf32>
    %286 = vector.shape_cast %226 : vector<8x1xi1> to vector<8x1xi1>
    %287 = vector.broadcast %286 : vector<8x1xi1> to vector<8x32xi1>
    %288 = arith.select %287, %265, %285 : vector<8x32xi1>, vector<8x32xf32>
    %289 = vector.extract_strided_slice %232 {offsets = [0, 32], sizes = [8, 32], strides = [1, 1]} : vector<8x64xf32> to vector<8x32xf32>
    %290 = vector.shape_cast %231 : vector<8x1xi1> to vector<8x1xi1>
    %291 = vector.broadcast %290 : vector<8x1xi1> to vector<8x32xi1>
    %292 = arith.select %291, %284, %289 : vector<8x32xi1>, vector<8x32xf32>
    %293 = tpu.concatenate %288, %292 in 1 : vector<8x32xf32>, vector<8x32xf32> -> vector<8x64xf32>
    %c0_111 = arith.constant 0 : index
    %c0_112 = arith.constant 0 : index
    %294 = vector.load %arg18[%c0_111, %c0_112] : memref<8x64xf32, #tpu.memory_space<vmem>>, vector<8x64xf32>
    tpu.vector_store %arg18[%c0_111, %c0_112], %293 {strides = array<i32>} : memref<8x64xf32, #tpu.memory_space<vmem>>, vector<8x64xf32>,
    %295 = vector.extract_strided_slice %233 {offsets = [0, 0], sizes = [8, 32], strides = [1, 1]} : vector<8x64xf32> to vector<8x32xf32>
    %296 = vector.shape_cast %226 : vector<8x1xi1> to vector<8x1xi1>
    %297 = vector.broadcast %296 : vector<8x1xi1> to vector<8x32xi1>
    %298 = arith.select %297, %262, %295 : vector<8x32xi1>, vector<8x32xf32>
    %299 = vector.extract_strided_slice %233 {offsets = [0, 32], sizes = [8, 32], strides = [1, 1]} : vector<8x64xf32> to vector<8x32xf32>
    %300 = vector.shape_cast %231 : vector<8x1xi1> to vector<8x1xi1>
    %301 = vector.broadcast %300 : vector<8x1xi1> to vector<8x32xi1>
    %302 = arith.select %301, %281, %299 : vector<8x32xi1>, vector<8x32xf32>
    %303 = tpu.concatenate %298, %302 in 1 : vector<8x32xf32>, vector<8x32xf32> -> vector<8x64xf32>
    %c0_113 = arith.constant 0 : index
    %c0_114 = arith.constant 0 : index
    %304 = vector.load %arg19[%c0_113, %c0_114] : memref<8x64xf32, #tpu.memory_space<vmem>>, vector<8x64xf32>
    tpu.vector_store %arg19[%c0_113, %c0_114], %303 {strides = array<i32>} : memref<8x64xf32, #tpu.memory_space<vmem>>, vector<8x64xf32>,
    %cst_115 = arith.constant 0.000000e+00 : f32
    %305 = vector.shape_cast %226 : vector<8x1xi1> to vector<8x1xi1>
    %306 = vector.broadcast %305 : vector<8x1xi1> to vector<8x32xi1>
    %307 = vector.broadcast %cst_115 : f32 to vector<8x32xf32>
    %308 = arith.select %306, %265, %307 : vector<8x32xi1>, vector<8x32xf32>
    %309 = arith.index_cast %c2_i32 : i32 to index
    %c0_116 = arith.constant 0 : index
    %c0_117 = arith.constant 0 : index
    %310 = vector.load %arg16[%309, %c0_116, %c0_117] : memref<8x8x32xf32, #tpu.memory_space<vmem>>, vector<1x8x32xf32>
    %311 = vector.shape_cast %310 : vector<1x8x32xf32> to vector<8x32xf32>
    %312 = vector.shape_cast %308 : vector<8x32xf32> to vector<1x8x32xf32>
    tpu.vector_store %arg16[%309, %c0_116, %c0_117], %312 {strides = array<i32>} : memref<8x8x32xf32, #tpu.memory_space<vmem>>, vector<1x8x32xf32>,
    %cst_118 = arith.constant 0.000000e+00 : f32
    %313 = vector.shape_cast %231 : vector<8x1xi1> to vector<8x1xi1>
    %314 = vector.broadcast %313 : vector<8x1xi1> to vector<8x32xi1>
    %315 = vector.broadcast %cst_118 : f32 to vector<8x32xf32>
    %316 = arith.select %314, %284, %315 : vector<8x32xi1>, vector<8x32xf32>
    %317 = arith.index_cast %221 : i32 to index
    %c0_119 = arith.constant 0 : index
    %c0_120 = arith.constant 0 : index
    %318 = vector.load %arg17[%317, %c0_119, %c0_120] : memref<8x8x32xf32, #tpu.memory_space<vmem>>, vector<1x8x32xf32>
    %319 = vector.shape_cast %318 : vector<1x8x32xf32> to vector<8x32xf32>
    %320 = vector.shape_cast %316 : vector<8x32xf32> to vector<1x8x32xf32>
    tpu.vector_store %arg17[%317, %c0_119, %c0_120], %320 {strides = array<i32>} : memref<8x8x32xf32, #tpu.memory_space<vmem>>, vector<1x8x32xf32>,
    %c3_i32 = arith.constant 3 : i32
    %c7_i32_121 = arith.constant 7 : i32
    %321 = arith.subi %c7_i32_121, %c3_i32 : i32
    %322 = arith.index_cast %c3_i32 : i32 to index
    %c0_122 = arith.constant 0 : index
    %c0_123 = arith.constant 0 : index
    %323 = vector.load %arg2[%322, %c0_122, %c0_123] : memref<8x8x1xf32, #tpu.memory_space<vmem>>, vector<1x8x1xf32>
    %324 = vector.shape_cast %323 : vector<1x8x1xf32> to vector<8x1xf32>
    %cst_124 = arith.constant 5.000000e-01 : f32
    %325 = vector.broadcast %cst_124 : f32 to vector<8x1xf32>
    %326 = arith.cmpf ogt, %324, %325 : vector<8x1xf32>
    %327 = arith.index_cast %321 : i32 to index
    %c0_125 = arith.constant 0 : index
    %c0_126 = arith.constant 0 : index
    %328 = vector.load %arg2[%327, %c0_125, %c0_126] : memref<8x8x1xf32, #tpu.memory_space<vmem>>, vector<1x8x1xf32>
    %329 = vector.shape_cast %328 : vector<1x8x1xf32> to vector<8x1xf32>
    %cst_127 = arith.constant 5.000000e-01 : f32
    %330 = vector.broadcast %cst_127 : f32 to vector<8x1xf32>
    %331 = arith.cmpf ogt, %329, %330 : vector<8x1xf32>
    %c0_128 = arith.constant 0 : index
    %c0_129 = arith.constant 0 : index
    %332 = vector.load %arg18[%c0_128, %c0_129] : memref<8x64xf32, #tpu.memory_space<vmem>>, vector<8x64xf32>
    %c0_130 = arith.constant 0 : index
    %c0_131 = arith.constant 0 : index
    %333 = vector.load %arg19[%c0_130, %c0_131] : memref<8x64xf32, #tpu.memory_space<vmem>>, vector<8x64xf32>
    %cst_132 = arith.constant dense<0.000000e+00> : vector<8x256xf32>
    %334 = tpu.matmul %332, %1, %cst_132 {dimension_numbers = #tpu.dot_dimension_numbers<[1], [0], [0], [1], [0, 0, 1, 1], [], []>} : vector<8x64xf32>, vector<64x256xf32>, vector<8x256xf32> -> vector<8x256xf32>
    %335 = arith.index_cast %c3_i32 : i32 to index
    %c0_133 = arith.constant 0 : index
    %c0_134 = arith.constant 0 : index
    %336 = vector.load %arg15[%335, %c0_133, %c0_134] : memref<8x8x256xf32, #tpu.memory_space<vmem>>, vector<1x8x256xf32>
    %337 = vector.shape_cast %336 : vector<1x8x256xf32> to vector<8x256xf32>
    %338 = vector.extract_strided_slice %337 {offsets = [0, 0], sizes = [8, 128], strides = [1, 1]} : vector<8x256xf32> to vector<8x128xf32>
    %339 = vector.extract_strided_slice %334 {offsets = [0, 0], sizes = [8, 128], strides = [1, 1]} : vector<8x256xf32> to vector<8x128xf32>
    %340 = arith.addf %338, %339 : vector<8x128xf32>
    %341 = arith.index_cast %321 : i32 to index
    %c0_135 = arith.constant 0 : index
    %c0_136 = arith.constant 0 : index
    %342 = vector.load %arg15[%341, %c0_135, %c0_136] : memref<8x8x256xf32, #tpu.memory_space<vmem>>, vector<1x8x256xf32>
    %343 = vector.shape_cast %342 : vector<1x8x256xf32> to vector<8x256xf32>
    %344 = vector.extract_strided_slice %343 {offsets = [0, 128], sizes = [8, 128], strides = [1, 1]} : vector<8x256xf32> to vector<8x128xf32>
    %345 = vector.extract_strided_slice %334 {offsets = [0, 128], sizes = [8, 128], strides = [1, 1]} : vector<8x256xf32> to vector<8x128xf32>
    %346 = arith.addf %344, %345 : vector<8x128xf32>
    %347 = vector.extract_strided_slice %333 {offsets = [0, 0], sizes = [8, 32], strides = [1, 1]} : vector<8x64xf32> to vector<8x32xf32>
    %348 = vector.extract_strided_slice %340 {offsets = [0, 0], sizes = [8, 96], strides = [1, 1]} : vector<8x128xf32> to vector<8x96xf32>
    %cst_137 = arith.constant 5.000000e-01 : f32
    %349 = vector.broadcast %cst_137 : f32 to vector<8x96xf32>
    %350 = arith.mulf %349, %348 : vector<8x96xf32>
    %351 = math.tanh %350 : vector<8x96xf32>
    %cst_138 = arith.constant 5.000000e-01 : f32
    %352 = vector.broadcast %cst_138 : f32 to vector<8x96xf32>
    %353 = arith.mulf %352, %351 : vector<8x96xf32>
    %cst_139 = arith.constant 5.000000e-01 : f32
    %354 = vector.broadcast %cst_139 : f32 to vector<8x96xf32>
    %355 = arith.addf %353, %354 : vector<8x96xf32>
    %356 = vector.extract_strided_slice %340 {offsets = [0, 96], sizes = [8, 32], strides = [1, 1]} : vector<8x128xf32> to vector<8x32xf32>
    %357 = math.tanh %356 : vector<8x32xf32>
    %358 = vector.extract_strided_slice %355 {offsets = [0, 32], sizes = [8, 32], strides = [1, 1]} : vector<8x96xf32> to vector<8x32xf32>
    %359 = arith.mulf %358, %347 : vector<8x32xf32>
    %360 = vector.extract_strided_slice %355 {offsets = [0, 0], sizes = [8, 32], strides = [1, 1]} : vector<8x96xf32> to vector<8x32xf32>
    %361 = arith.mulf %360, %357 : vector<8x32xf32>
    %362 = arith.addf %359, %361 : vector<8x32xf32>
    %363 = vector.extract_strided_slice %355 {offsets = [0, 64], sizes = [8, 32], strides = [1, 1]} : vector<8x96xf32> to vector<8x32xf32>
    %364 = math.tanh %362 : vector<8x32xf32>
    %365 = arith.mulf %363, %364 : vector<8x32xf32>
    %366 = vector.extract_strided_slice %333 {offsets = [0, 32], sizes = [8, 32], strides = [1, 1]} : vector<8x64xf32> to vector<8x32xf32>
    %367 = vector.extract_strided_slice %346 {offsets = [0, 0], sizes = [8, 96], strides = [1, 1]} : vector<8x128xf32> to vector<8x96xf32>
    %cst_140 = arith.constant 5.000000e-01 : f32
    %368 = vector.broadcast %cst_140 : f32 to vector<8x96xf32>
    %369 = arith.mulf %368, %367 : vector<8x96xf32>
    %370 = math.tanh %369 : vector<8x96xf32>
    %cst_141 = arith.constant 5.000000e-01 : f32
    %371 = vector.broadcast %cst_141 : f32 to vector<8x96xf32>
    %372 = arith.mulf %371, %370 : vector<8x96xf32>
    %cst_142 = arith.constant 5.000000e-01 : f32
    %373 = vector.broadcast %cst_142 : f32 to vector<8x96xf32>
    %374 = arith.addf %372, %373 : vector<8x96xf32>
    %375 = vector.extract_strided_slice %346 {offsets = [0, 96], sizes = [8, 32], strides = [1, 1]} : vector<8x128xf32> to vector<8x32xf32>
    %376 = math.tanh %375 : vector<8x32xf32>
    %377 = vector.extract_strided_slice %374 {offsets = [0, 32], sizes = [8, 32], strides = [1, 1]} : vector<8x96xf32> to vector<8x32xf32>
    %378 = arith.mulf %377, %366 : vector<8x32xf32>
    %379 = vector.extract_strided_slice %374 {offsets = [0, 0], sizes = [8, 32], strides = [1, 1]} : vector<8x96xf32> to vector<8x32xf32>
    %380 = arith.mulf %379, %376 : vector<8x32xf32>
    %381 = arith.addf %378, %380 : vector<8x32xf32>
    %382 = vector.extract_strided_slice %374 {offsets = [0, 64], sizes = [8, 32], strides = [1, 1]} : vector<8x96xf32> to vector<8x32xf32>
    %383 = math.tanh %381 : vector<8x32xf32>
    %384 = arith.mulf %382, %383 : vector<8x32xf32>
    %385 = vector.extract_strided_slice %332 {offsets = [0, 0], sizes = [8, 32], strides = [1, 1]} : vector<8x64xf32> to vector<8x32xf32>
    %386 = vector.shape_cast %326 : vector<8x1xi1> to vector<8x1xi1>
    %387 = vector.broadcast %386 : vector<8x1xi1> to vector<8x32xi1>
    %388 = arith.select %387, %365, %385 : vector<8x32xi1>, vector<8x32xf32>
    %389 = vector.extract_strided_slice %332 {offsets = [0, 32], sizes = [8, 32], strides = [1, 1]} : vector<8x64xf32> to vector<8x32xf32>
    %390 = vector.shape_cast %331 : vector<8x1xi1> to vector<8x1xi1>
    %391 = vector.broadcast %390 : vector<8x1xi1> to vector<8x32xi1>
    %392 = arith.select %391, %384, %389 : vector<8x32xi1>, vector<8x32xf32>
    %393 = tpu.concatenate %388, %392 in 1 : vector<8x32xf32>, vector<8x32xf32> -> vector<8x64xf32>
    %c0_143 = arith.constant 0 : index
    %c0_144 = arith.constant 0 : index
    %394 = vector.load %arg18[%c0_143, %c0_144] : memref<8x64xf32, #tpu.memory_space<vmem>>, vector<8x64xf32>
    tpu.vector_store %arg18[%c0_143, %c0_144], %393 {strides = array<i32>} : memref<8x64xf32, #tpu.memory_space<vmem>>, vector<8x64xf32>,
    %395 = vector.extract_strided_slice %333 {offsets = [0, 0], sizes = [8, 32], strides = [1, 1]} : vector<8x64xf32> to vector<8x32xf32>
    %396 = vector.shape_cast %326 : vector<8x1xi1> to vector<8x1xi1>
    %397 = vector.broadcast %396 : vector<8x1xi1> to vector<8x32xi1>
    %398 = arith.select %397, %362, %395 : vector<8x32xi1>, vector<8x32xf32>
    %399 = vector.extract_strided_slice %333 {offsets = [0, 32], sizes = [8, 32], strides = [1, 1]} : vector<8x64xf32> to vector<8x32xf32>
    %400 = vector.shape_cast %331 : vector<8x1xi1> to vector<8x1xi1>
    %401 = vector.broadcast %400 : vector<8x1xi1> to vector<8x32xi1>
    %402 = arith.select %401, %381, %399 : vector<8x32xi1>, vector<8x32xf32>
    %403 = tpu.concatenate %398, %402 in 1 : vector<8x32xf32>, vector<8x32xf32> -> vector<8x64xf32>
    %c0_145 = arith.constant 0 : index
    %c0_146 = arith.constant 0 : index
    %404 = vector.load %arg19[%c0_145, %c0_146] : memref<8x64xf32, #tpu.memory_space<vmem>>, vector<8x64xf32>
    tpu.vector_store %arg19[%c0_145, %c0_146], %403 {strides = array<i32>} : memref<8x64xf32, #tpu.memory_space<vmem>>, vector<8x64xf32>,
    %cst_147 = arith.constant 0.000000e+00 : f32
    %405 = vector.shape_cast %326 : vector<8x1xi1> to vector<8x1xi1>
    %406 = vector.broadcast %405 : vector<8x1xi1> to vector<8x32xi1>
    %407 = vector.broadcast %cst_147 : f32 to vector<8x32xf32>
    %408 = arith.select %406, %365, %407 : vector<8x32xi1>, vector<8x32xf32>
    %409 = arith.index_cast %c3_i32 : i32 to index
    %c0_148 = arith.constant 0 : index
    %c0_149 = arith.constant 0 : index
    %410 = vector.load %arg16[%409, %c0_148, %c0_149] : memref<8x8x32xf32, #tpu.memory_space<vmem>>, vector<1x8x32xf32>
    %411 = vector.shape_cast %410 : vector<1x8x32xf32> to vector<8x32xf32>
    %412 = vector.shape_cast %408 : vector<8x32xf32> to vector<1x8x32xf32>
    tpu.vector_store %arg16[%409, %c0_148, %c0_149], %412 {strides = array<i32>} : memref<8x8x32xf32, #tpu.memory_space<vmem>>, vector<1x8x32xf32>,
    %cst_150 = arith.constant 0.000000e+00 : f32
    %413 = vector.shape_cast %331 : vector<8x1xi1> to vector<8x1xi1>
    %414 = vector.broadcast %413 : vector<8x1xi1> to vector<8x32xi1>
    %415 = vector.broadcast %cst_150 : f32 to vector<8x32xf32>
    %416 = arith.select %414, %384, %415 : vector<8x32xi1>, vector<8x32xf32>
    %417 = arith.index_cast %321 : i32 to index
    %c0_151 = arith.constant 0 : index
    %c0_152 = arith.constant 0 : index
    %418 = vector.load %arg17[%417, %c0_151, %c0_152] : memref<8x8x32xf32, #tpu.memory_space<vmem>>, vector<1x8x32xf32>
    %419 = vector.shape_cast %418 : vector<1x8x32xf32> to vector<8x32xf32>
    %420 = vector.shape_cast %416 : vector<8x32xf32> to vector<1x8x32xf32>
    tpu.vector_store %arg17[%417, %c0_151, %c0_152], %420 {strides = array<i32>} : memref<8x8x32xf32, #tpu.memory_space<vmem>>, vector<1x8x32xf32>,
    %c4_i32 = arith.constant 4 : i32
    %c7_i32_153 = arith.constant 7 : i32
    %421 = arith.subi %c7_i32_153, %c4_i32 : i32
    %422 = arith.index_cast %c4_i32 : i32 to index
    %c0_154 = arith.constant 0 : index
    %c0_155 = arith.constant 0 : index
    %423 = vector.load %arg2[%422, %c0_154, %c0_155] : memref<8x8x1xf32, #tpu.memory_space<vmem>>, vector<1x8x1xf32>
    %424 = vector.shape_cast %423 : vector<1x8x1xf32> to vector<8x1xf32>
    %cst_156 = arith.constant 5.000000e-01 : f32
    %425 = vector.broadcast %cst_156 : f32 to vector<8x1xf32>
    %426 = arith.cmpf ogt, %424, %425 : vector<8x1xf32>
    %427 = arith.index_cast %421 : i32 to index
    %c0_157 = arith.constant 0 : index
    %c0_158 = arith.constant 0 : index
    %428 = vector.load %arg2[%427, %c0_157, %c0_158] : memref<8x8x1xf32, #tpu.memory_space<vmem>>, vector<1x8x1xf32>
    %429 = vector.shape_cast %428 : vector<1x8x1xf32> to vector<8x1xf32>
    %cst_159 = arith.constant 5.000000e-01 : f32
    %430 = vector.broadcast %cst_159 : f32 to vector<8x1xf32>
    %431 = arith.cmpf ogt, %429, %430 : vector<8x1xf32>
    %c0_160 = arith.constant 0 : index
    %c0_161 = arith.constant 0 : index
    %432 = vector.load %arg18[%c0_160, %c0_161] : memref<8x64xf32, #tpu.memory_space<vmem>>, vector<8x64xf32>
    %c0_162 = arith.constant 0 : index
    %c0_163 = arith.constant 0 : index
    %433 = vector.load %arg19[%c0_162, %c0_163] : memref<8x64xf32, #tpu.memory_space<vmem>>, vector<8x64xf32>
    %cst_164 = arith.constant dense<0.000000e+00> : vector<8x256xf32>
    %434 = tpu.matmul %432, %1, %cst_164 {dimension_numbers = #tpu.dot_dimension_numbers<[1], [0], [0], [1], [0, 0, 1, 1], [], []>} : vector<8x64xf32>, vector<64x256xf32>, vector<8x256xf32> -> vector<8x256xf32>
    %435 = arith.index_cast %c4_i32 : i32 to index
    %c0_165 = arith.constant 0 : index
    %c0_166 = arith.constant 0 : index
    %436 = vector.load %arg15[%435, %c0_165, %c0_166] : memref<8x8x256xf32, #tpu.memory_space<vmem>>, vector<1x8x256xf32>
    %437 = vector.shape_cast %436 : vector<1x8x256xf32> to vector<8x256xf32>
    %438 = vector.extract_strided_slice %437 {offsets = [0, 0], sizes = [8, 128], strides = [1, 1]} : vector<8x256xf32> to vector<8x128xf32>
    %439 = vector.extract_strided_slice %434 {offsets = [0, 0], sizes = [8, 128], strides = [1, 1]} : vector<8x256xf32> to vector<8x128xf32>
    %440 = arith.addf %438, %439 : vector<8x128xf32>
    %441 = arith.index_cast %421 : i32 to index
    %c0_167 = arith.constant 0 : index
    %c0_168 = arith.constant 0 : index
    %442 = vector.load %arg15[%441, %c0_167, %c0_168] : memref<8x8x256xf32, #tpu.memory_space<vmem>>, vector<1x8x256xf32>
    %443 = vector.shape_cast %442 : vector<1x8x256xf32> to vector<8x256xf32>
    %444 = vector.extract_strided_slice %443 {offsets = [0, 128], sizes = [8, 128], strides = [1, 1]} : vector<8x256xf32> to vector<8x128xf32>
    %445 = vector.extract_strided_slice %434 {offsets = [0, 128], sizes = [8, 128], strides = [1, 1]} : vector<8x256xf32> to vector<8x128xf32>
    %446 = arith.addf %444, %445 : vector<8x128xf32>
    %447 = vector.extract_strided_slice %433 {offsets = [0, 0], sizes = [8, 32], strides = [1, 1]} : vector<8x64xf32> to vector<8x32xf32>
    %448 = vector.extract_strided_slice %440 {offsets = [0, 0], sizes = [8, 96], strides = [1, 1]} : vector<8x128xf32> to vector<8x96xf32>
    %cst_169 = arith.constant 5.000000e-01 : f32
    %449 = vector.broadcast %cst_169 : f32 to vector<8x96xf32>
    %450 = arith.mulf %449, %448 : vector<8x96xf32>
    %451 = math.tanh %450 : vector<8x96xf32>
    %cst_170 = arith.constant 5.000000e-01 : f32
    %452 = vector.broadcast %cst_170 : f32 to vector<8x96xf32>
    %453 = arith.mulf %452, %451 : vector<8x96xf32>
    %cst_171 = arith.constant 5.000000e-01 : f32
    %454 = vector.broadcast %cst_171 : f32 to vector<8x96xf32>
    %455 = arith.addf %453, %454 : vector<8x96xf32>
    %456 = vector.extract_strided_slice %440 {offsets = [0, 96], sizes = [8, 32], strides = [1, 1]} : vector<8x128xf32> to vector<8x32xf32>
    %457 = math.tanh %456 : vector<8x32xf32>
    %458 = vector.extract_strided_slice %455 {offsets = [0, 32], sizes = [8, 32], strides = [1, 1]} : vector<8x96xf32> to vector<8x32xf32>
    %459 = arith.mulf %458, %447 : vector<8x32xf32>
    %460 = vector.extract_strided_slice %455 {offsets = [0, 0], sizes = [8, 32], strides = [1, 1]} : vector<8x96xf32> to vector<8x32xf32>
    %461 = arith.mulf %460, %457 : vector<8x32xf32>
    %462 = arith.addf %459, %461 : vector<8x32xf32>
    %463 = vector.extract_strided_slice %455 {offsets = [0, 64], sizes = [8, 32], strides = [1, 1]} : vector<8x96xf32> to vector<8x32xf32>
    %464 = math.tanh %462 : vector<8x32xf32>
    %465 = arith.mulf %463, %464 : vector<8x32xf32>
    %466 = vector.extract_strided_slice %433 {offsets = [0, 32], sizes = [8, 32], strides = [1, 1]} : vector<8x64xf32> to vector<8x32xf32>
    %467 = vector.extract_strided_slice %446 {offsets = [0, 0], sizes = [8, 96], strides = [1, 1]} : vector<8x128xf32> to vector<8x96xf32>
    %cst_172 = arith.constant 5.000000e-01 : f32
    %468 = vector.broadcast %cst_172 : f32 to vector<8x96xf32>
    %469 = arith.mulf %468, %467 : vector<8x96xf32>
    %470 = math.tanh %469 : vector<8x96xf32>
    %cst_173 = arith.constant 5.000000e-01 : f32
    %471 = vector.broadcast %cst_173 : f32 to vector<8x96xf32>
    %472 = arith.mulf %471, %470 : vector<8x96xf32>
    %cst_174 = arith.constant 5.000000e-01 : f32
    %473 = vector.broadcast %cst_174 : f32 to vector<8x96xf32>
    %474 = arith.addf %472, %473 : vector<8x96xf32>
    %475 = vector.extract_strided_slice %446 {offsets = [0, 96], sizes = [8, 32], strides = [1, 1]} : vector<8x128xf32> to vector<8x32xf32>
    %476 = math.tanh %475 : vector<8x32xf32>
    %477 = vector.extract_strided_slice %474 {offsets = [0, 32], sizes = [8, 32], strides = [1, 1]} : vector<8x96xf32> to vector<8x32xf32>
    %478 = arith.mulf %477, %466 : vector<8x32xf32>
    %479 = vector.extract_strided_slice %474 {offsets = [0, 0], sizes = [8, 32], strides = [1, 1]} : vector<8x96xf32> to vector<8x32xf32>
    %480 = arith.mulf %479, %476 : vector<8x32xf32>
    %481 = arith.addf %478, %480 : vector<8x32xf32>
    %482 = vector.extract_strided_slice %474 {offsets = [0, 64], sizes = [8, 32], strides = [1, 1]} : vector<8x96xf32> to vector<8x32xf32>
    %483 = math.tanh %481 : vector<8x32xf32>
    %484 = arith.mulf %482, %483 : vector<8x32xf32>
    %485 = vector.extract_strided_slice %432 {offsets = [0, 0], sizes = [8, 32], strides = [1, 1]} : vector<8x64xf32> to vector<8x32xf32>
    %486 = vector.shape_cast %426 : vector<8x1xi1> to vector<8x1xi1>
    %487 = vector.broadcast %486 : vector<8x1xi1> to vector<8x32xi1>
    %488 = arith.select %487, %465, %485 : vector<8x32xi1>, vector<8x32xf32>
    %489 = vector.extract_strided_slice %432 {offsets = [0, 32], sizes = [8, 32], strides = [1, 1]} : vector<8x64xf32> to vector<8x32xf32>
    %490 = vector.shape_cast %431 : vector<8x1xi1> to vector<8x1xi1>
    %491 = vector.broadcast %490 : vector<8x1xi1> to vector<8x32xi1>
    %492 = arith.select %491, %484, %489 : vector<8x32xi1>, vector<8x32xf32>
    %493 = tpu.concatenate %488, %492 in 1 : vector<8x32xf32>, vector<8x32xf32> -> vector<8x64xf32>
    %c0_175 = arith.constant 0 : index
    %c0_176 = arith.constant 0 : index
    %494 = vector.load %arg18[%c0_175, %c0_176] : memref<8x64xf32, #tpu.memory_space<vmem>>, vector<8x64xf32>
    tpu.vector_store %arg18[%c0_175, %c0_176], %493 {strides = array<i32>} : memref<8x64xf32, #tpu.memory_space<vmem>>, vector<8x64xf32>,
    %495 = vector.extract_strided_slice %433 {offsets = [0, 0], sizes = [8, 32], strides = [1, 1]} : vector<8x64xf32> to vector<8x32xf32>
    %496 = vector.shape_cast %426 : vector<8x1xi1> to vector<8x1xi1>
    %497 = vector.broadcast %496 : vector<8x1xi1> to vector<8x32xi1>
    %498 = arith.select %497, %462, %495 : vector<8x32xi1>, vector<8x32xf32>
    %499 = vector.extract_strided_slice %433 {offsets = [0, 32], sizes = [8, 32], strides = [1, 1]} : vector<8x64xf32> to vector<8x32xf32>
    %500 = vector.shape_cast %431 : vector<8x1xi1> to vector<8x1xi1>
    %501 = vector.broadcast %500 : vector<8x1xi1> to vector<8x32xi1>
    %502 = arith.select %501, %481, %499 : vector<8x32xi1>, vector<8x32xf32>
    %503 = tpu.concatenate %498, %502 in 1 : vector<8x32xf32>, vector<8x32xf32> -> vector<8x64xf32>
    %c0_177 = arith.constant 0 : index
    %c0_178 = arith.constant 0 : index
    %504 = vector.load %arg19[%c0_177, %c0_178] : memref<8x64xf32, #tpu.memory_space<vmem>>, vector<8x64xf32>
    tpu.vector_store %arg19[%c0_177, %c0_178], %503 {strides = array<i32>} : memref<8x64xf32, #tpu.memory_space<vmem>>, vector<8x64xf32>,
    %cst_179 = arith.constant 0.000000e+00 : f32
    %505 = vector.shape_cast %426 : vector<8x1xi1> to vector<8x1xi1>
    %506 = vector.broadcast %505 : vector<8x1xi1> to vector<8x32xi1>
    %507 = vector.broadcast %cst_179 : f32 to vector<8x32xf32>
    %508 = arith.select %506, %465, %507 : vector<8x32xi1>, vector<8x32xf32>
    %509 = arith.index_cast %c4_i32 : i32 to index
    %c0_180 = arith.constant 0 : index
    %c0_181 = arith.constant 0 : index
    %510 = vector.load %arg16[%509, %c0_180, %c0_181] : memref<8x8x32xf32, #tpu.memory_space<vmem>>, vector<1x8x32xf32>
    %511 = vector.shape_cast %510 : vector<1x8x32xf32> to vector<8x32xf32>
    %512 = vector.shape_cast %508 : vector<8x32xf32> to vector<1x8x32xf32>
    tpu.vector_store %arg16[%509, %c0_180, %c0_181], %512 {strides = array<i32>} : memref<8x8x32xf32, #tpu.memory_space<vmem>>, vector<1x8x32xf32>,
    %cst_182 = arith.constant 0.000000e+00 : f32
    %513 = vector.shape_cast %431 : vector<8x1xi1> to vector<8x1xi1>
    %514 = vector.broadcast %513 : vector<8x1xi1> to vector<8x32xi1>
    %515 = vector.broadcast %cst_182 : f32 to vector<8x32xf32>
    %516 = arith.select %514, %484, %515 : vector<8x32xi1>, vector<8x32xf32>
    %517 = arith.index_cast %421 : i32 to index
    %c0_183 = arith.constant 0 : index
    %c0_184 = arith.constant 0 : index
    %518 = vector.load %arg17[%517, %c0_183, %c0_184] : memref<8x8x32xf32, #tpu.memory_space<vmem>>, vector<1x8x32xf32>
    %519 = vector.shape_cast %518 : vector<1x8x32xf32> to vector<8x32xf32>
    %520 = vector.shape_cast %516 : vector<8x32xf32> to vector<1x8x32xf32>
    tpu.vector_store %arg17[%517, %c0_183, %c0_184], %520 {strides = array<i32>} : memref<8x8x32xf32, #tpu.memory_space<vmem>>, vector<1x8x32xf32>,
    %c5_i32 = arith.constant 5 : i32
    %c7_i32_185 = arith.constant 7 : i32
    %521 = arith.subi %c7_i32_185, %c5_i32 : i32
    %522 = arith.index_cast %c5_i32 : i32 to index
    %c0_186 = arith.constant 0 : index
    %c0_187 = arith.constant 0 : index
    %523 = vector.load %arg2[%522, %c0_186, %c0_187] : memref<8x8x1xf32, #tpu.memory_space<vmem>>, vector<1x8x1xf32>
    %524 = vector.shape_cast %523 : vector<1x8x1xf32> to vector<8x1xf32>
    %cst_188 = arith.constant 5.000000e-01 : f32
    %525 = vector.broadcast %cst_188 : f32 to vector<8x1xf32>
    %526 = arith.cmpf ogt, %524, %525 : vector<8x1xf32>
    %527 = arith.index_cast %521 : i32 to index
    %c0_189 = arith.constant 0 : index
    %c0_190 = arith.constant 0 : index
    %528 = vector.load %arg2[%527, %c0_189, %c0_190] : memref<8x8x1xf32, #tpu.memory_space<vmem>>, vector<1x8x1xf32>
    %529 = vector.shape_cast %528 : vector<1x8x1xf32> to vector<8x1xf32>
    %cst_191 = arith.constant 5.000000e-01 : f32
    %530 = vector.broadcast %cst_191 : f32 to vector<8x1xf32>
    %531 = arith.cmpf ogt, %529, %530 : vector<8x1xf32>
    %c0_192 = arith.constant 0 : index
    %c0_193 = arith.constant 0 : index
    %532 = vector.load %arg18[%c0_192, %c0_193] : memref<8x64xf32, #tpu.memory_space<vmem>>, vector<8x64xf32>
    %c0_194 = arith.constant 0 : index
    %c0_195 = arith.constant 0 : index
    %533 = vector.load %arg19[%c0_194, %c0_195] : memref<8x64xf32, #tpu.memory_space<vmem>>, vector<8x64xf32>
    %cst_196 = arith.constant dense<0.000000e+00> : vector<8x256xf32>
    %534 = tpu.matmul %532, %1, %cst_196 {dimension_numbers = #tpu.dot_dimension_numbers<[1], [0], [0], [1], [0, 0, 1, 1], [], []>} : vector<8x64xf32>, vector<64x256xf32>, vector<8x256xf32> -> vector<8x256xf32>
    %535 = arith.index_cast %c5_i32 : i32 to index
    %c0_197 = arith.constant 0 : index
    %c0_198 = arith.constant 0 : index
    %536 = vector.load %arg15[%535, %c0_197, %c0_198] : memref<8x8x256xf32, #tpu.memory_space<vmem>>, vector<1x8x256xf32>
    %537 = vector.shape_cast %536 : vector<1x8x256xf32> to vector<8x256xf32>
    %538 = vector.extract_strided_slice %537 {offsets = [0, 0], sizes = [8, 128], strides = [1, 1]} : vector<8x256xf32> to vector<8x128xf32>
    %539 = vector.extract_strided_slice %534 {offsets = [0, 0], sizes = [8, 128], strides = [1, 1]} : vector<8x256xf32> to vector<8x128xf32>
    %540 = arith.addf %538, %539 : vector<8x128xf32>
    %541 = arith.index_cast %521 : i32 to index
    %c0_199 = arith.constant 0 : index
    %c0_200 = arith.constant 0 : index
    %542 = vector.load %arg15[%541, %c0_199, %c0_200] : memref<8x8x256xf32, #tpu.memory_space<vmem>>, vector<1x8x256xf32>
    %543 = vector.shape_cast %542 : vector<1x8x256xf32> to vector<8x256xf32>
    %544 = vector.extract_strided_slice %543 {offsets = [0, 128], sizes = [8, 128], strides = [1, 1]} : vector<8x256xf32> to vector<8x128xf32>
    %545 = vector.extract_strided_slice %534 {offsets = [0, 128], sizes = [8, 128], strides = [1, 1]} : vector<8x256xf32> to vector<8x128xf32>
    %546 = arith.addf %544, %545 : vector<8x128xf32>
    %547 = vector.extract_strided_slice %533 {offsets = [0, 0], sizes = [8, 32], strides = [1, 1]} : vector<8x64xf32> to vector<8x32xf32>
    %548 = vector.extract_strided_slice %540 {offsets = [0, 0], sizes = [8, 96], strides = [1, 1]} : vector<8x128xf32> to vector<8x96xf32>
    %cst_201 = arith.constant 5.000000e-01 : f32
    %549 = vector.broadcast %cst_201 : f32 to vector<8x96xf32>
    %550 = arith.mulf %549, %548 : vector<8x96xf32>
    %551 = math.tanh %550 : vector<8x96xf32>
    %cst_202 = arith.constant 5.000000e-01 : f32
    %552 = vector.broadcast %cst_202 : f32 to vector<8x96xf32>
    %553 = arith.mulf %552, %551 : vector<8x96xf32>
    %cst_203 = arith.constant 5.000000e-01 : f32
    %554 = vector.broadcast %cst_203 : f32 to vector<8x96xf32>
    %555 = arith.addf %553, %554 : vector<8x96xf32>
    %556 = vector.extract_strided_slice %540 {offsets = [0, 96], sizes = [8, 32], strides = [1, 1]} : vector<8x128xf32> to vector<8x32xf32>
    %557 = math.tanh %556 : vector<8x32xf32>
    %558 = vector.extract_strided_slice %555 {offsets = [0, 32], sizes = [8, 32], strides = [1, 1]} : vector<8x96xf32> to vector<8x32xf32>
    %559 = arith.mulf %558, %547 : vector<8x32xf32>
    %560 = vector.extract_strided_slice %555 {offsets = [0, 0], sizes = [8, 32], strides = [1, 1]} : vector<8x96xf32> to vector<8x32xf32>
    %561 = arith.mulf %560, %557 : vector<8x32xf32>
    %562 = arith.addf %559, %561 : vector<8x32xf32>
    %563 = vector.extract_strided_slice %555 {offsets = [0, 64], sizes = [8, 32], strides = [1, 1]} : vector<8x96xf32> to vector<8x32xf32>
    %564 = math.tanh %562 : vector<8x32xf32>
    %565 = arith.mulf %563, %564 : vector<8x32xf32>
    %566 = vector.extract_strided_slice %533 {offsets = [0, 32], sizes = [8, 32], strides = [1, 1]} : vector<8x64xf32> to vector<8x32xf32>
    %567 = vector.extract_strided_slice %546 {offsets = [0, 0], sizes = [8, 96], strides = [1, 1]} : vector<8x128xf32> to vector<8x96xf32>
    %cst_204 = arith.constant 5.000000e-01 : f32
    %568 = vector.broadcast %cst_204 : f32 to vector<8x96xf32>
    %569 = arith.mulf %568, %567 : vector<8x96xf32>
    %570 = math.tanh %569 : vector<8x96xf32>
    %cst_205 = arith.constant 5.000000e-01 : f32
    %571 = vector.broadcast %cst_205 : f32 to vector<8x96xf32>
    %572 = arith.mulf %571, %570 : vector<8x96xf32>
    %cst_206 = arith.constant 5.000000e-01 : f32
    %573 = vector.broadcast %cst_206 : f32 to vector<8x96xf32>
    %574 = arith.addf %572, %573 : vector<8x96xf32>
    %575 = vector.extract_strided_slice %546 {offsets = [0, 96], sizes = [8, 32], strides = [1, 1]} : vector<8x128xf32> to vector<8x32xf32>
    %576 = math.tanh %575 : vector<8x32xf32>
    %577 = vector.extract_strided_slice %574 {offsets = [0, 32], sizes = [8, 32], strides = [1, 1]} : vector<8x96xf32> to vector<8x32xf32>
    %578 = arith.mulf %577, %566 : vector<8x32xf32>
    %579 = vector.extract_strided_slice %574 {offsets = [0, 0], sizes = [8, 32], strides = [1, 1]} : vector<8x96xf32> to vector<8x32xf32>
    %580 = arith.mulf %579, %576 : vector<8x32xf32>
    %581 = arith.addf %578, %580 : vector<8x32xf32>
    %582 = vector.extract_strided_slice %574 {offsets = [0, 64], sizes = [8, 32], strides = [1, 1]} : vector<8x96xf32> to vector<8x32xf32>
    %583 = math.tanh %581 : vector<8x32xf32>
    %584 = arith.mulf %582, %583 : vector<8x32xf32>
    %585 = vector.extract_strided_slice %532 {offsets = [0, 0], sizes = [8, 32], strides = [1, 1]} : vector<8x64xf32> to vector<8x32xf32>
    %586 = vector.shape_cast %526 : vector<8x1xi1> to vector<8x1xi1>
    %587 = vector.broadcast %586 : vector<8x1xi1> to vector<8x32xi1>
    %588 = arith.select %587, %565, %585 : vector<8x32xi1>, vector<8x32xf32>
    %589 = vector.extract_strided_slice %532 {offsets = [0, 32], sizes = [8, 32], strides = [1, 1]} : vector<8x64xf32> to vector<8x32xf32>
    %590 = vector.shape_cast %531 : vector<8x1xi1> to vector<8x1xi1>
    %591 = vector.broadcast %590 : vector<8x1xi1> to vector<8x32xi1>
    %592 = arith.select %591, %584, %589 : vector<8x32xi1>, vector<8x32xf32>
    %593 = tpu.concatenate %588, %592 in 1 : vector<8x32xf32>, vector<8x32xf32> -> vector<8x64xf32>
    %c0_207 = arith.constant 0 : index
    %c0_208 = arith.constant 0 : index
    %594 = vector.load %arg18[%c0_207, %c0_208] : memref<8x64xf32, #tpu.memory_space<vmem>>, vector<8x64xf32>
    tpu.vector_store %arg18[%c0_207, %c0_208], %593 {strides = array<i32>} : memref<8x64xf32, #tpu.memory_space<vmem>>, vector<8x64xf32>,
    %595 = vector.extract_strided_slice %533 {offsets = [0, 0], sizes = [8, 32], strides = [1, 1]} : vector<8x64xf32> to vector<8x32xf32>
    %596 = vector.shape_cast %526 : vector<8x1xi1> to vector<8x1xi1>
    %597 = vector.broadcast %596 : vector<8x1xi1> to vector<8x32xi1>
    %598 = arith.select %597, %562, %595 : vector<8x32xi1>, vector<8x32xf32>
    %599 = vector.extract_strided_slice %533 {offsets = [0, 32], sizes = [8, 32], strides = [1, 1]} : vector<8x64xf32> to vector<8x32xf32>
    %600 = vector.shape_cast %531 : vector<8x1xi1> to vector<8x1xi1>
    %601 = vector.broadcast %600 : vector<8x1xi1> to vector<8x32xi1>
    %602 = arith.select %601, %581, %599 : vector<8x32xi1>, vector<8x32xf32>
    %603 = tpu.concatenate %598, %602 in 1 : vector<8x32xf32>, vector<8x32xf32> -> vector<8x64xf32>
    %c0_209 = arith.constant 0 : index
    %c0_210 = arith.constant 0 : index
    %604 = vector.load %arg19[%c0_209, %c0_210] : memref<8x64xf32, #tpu.memory_space<vmem>>, vector<8x64xf32>
    tpu.vector_store %arg19[%c0_209, %c0_210], %603 {strides = array<i32>} : memref<8x64xf32, #tpu.memory_space<vmem>>, vector<8x64xf32>,
    %cst_211 = arith.constant 0.000000e+00 : f32
    %605 = vector.shape_cast %526 : vector<8x1xi1> to vector<8x1xi1>
    %606 = vector.broadcast %605 : vector<8x1xi1> to vector<8x32xi1>
    %607 = vector.broadcast %cst_211 : f32 to vector<8x32xf32>
    %608 = arith.select %606, %565, %607 : vector<8x32xi1>, vector<8x32xf32>
    %609 = arith.index_cast %c5_i32 : i32 to index
    %c0_212 = arith.constant 0 : index
    %c0_213 = arith.constant 0 : index
    %610 = vector.load %arg16[%609, %c0_212, %c0_213] : memref<8x8x32xf32, #tpu.memory_space<vmem>>, vector<1x8x32xf32>
    %611 = vector.shape_cast %610 : vector<1x8x32xf32> to vector<8x32xf32>
    %612 = vector.shape_cast %608 : vector<8x32xf32> to vector<1x8x32xf32>
    tpu.vector_store %arg16[%609, %c0_212, %c0_213], %612 {strides = array<i32>} : memref<8x8x32xf32, #tpu.memory_space<vmem>>, vector<1x8x32xf32>,
    %cst_214 = arith.constant 0.000000e+00 : f32
    %613 = vector.shape_cast %531 : vector<8x1xi1> to vector<8x1xi1>
    %614 = vector.broadcast %613 : vector<8x1xi1> to vector<8x32xi1>
    %615 = vector.broadcast %cst_214 : f32 to vector<8x32xf32>
    %616 = arith.select %614, %584, %615 : vector<8x32xi1>, vector<8x32xf32>
    %617 = arith.index_cast %521 : i32 to index
    %c0_215 = arith.constant 0 : index
    %c0_216 = arith.constant 0 : index
    %618 = vector.load %arg17[%617, %c0_215, %c0_216] : memref<8x8x32xf32, #tpu.memory_space<vmem>>, vector<1x8x32xf32>
    %619 = vector.shape_cast %618 : vector<1x8x32xf32> to vector<8x32xf32>
    %620 = vector.shape_cast %616 : vector<8x32xf32> to vector<1x8x32xf32>
    tpu.vector_store %arg17[%617, %c0_215, %c0_216], %620 {strides = array<i32>} : memref<8x8x32xf32, #tpu.memory_space<vmem>>, vector<1x8x32xf32>,
    %c6_i32 = arith.constant 6 : i32
    %c7_i32_217 = arith.constant 7 : i32
    %621 = arith.subi %c7_i32_217, %c6_i32 : i32
    %622 = arith.index_cast %c6_i32 : i32 to index
    %c0_218 = arith.constant 0 : index
    %c0_219 = arith.constant 0 : index
    %623 = vector.load %arg2[%622, %c0_218, %c0_219] : memref<8x8x1xf32, #tpu.memory_space<vmem>>, vector<1x8x1xf32>
    %624 = vector.shape_cast %623 : vector<1x8x1xf32> to vector<8x1xf32>
    %cst_220 = arith.constant 5.000000e-01 : f32
    %625 = vector.broadcast %cst_220 : f32 to vector<8x1xf32>
    %626 = arith.cmpf ogt, %624, %625 : vector<8x1xf32>
    %627 = arith.index_cast %621 : i32 to index
    %c0_221 = arith.constant 0 : index
    %c0_222 = arith.constant 0 : index
    %628 = vector.load %arg2[%627, %c0_221, %c0_222] : memref<8x8x1xf32, #tpu.memory_space<vmem>>, vector<1x8x1xf32>
    %629 = vector.shape_cast %628 : vector<1x8x1xf32> to vector<8x1xf32>
    %cst_223 = arith.constant 5.000000e-01 : f32
    %630 = vector.broadcast %cst_223 : f32 to vector<8x1xf32>
    %631 = arith.cmpf ogt, %629, %630 : vector<8x1xf32>
    %c0_224 = arith.constant 0 : index
    %c0_225 = arith.constant 0 : index
    %632 = vector.load %arg18[%c0_224, %c0_225] : memref<8x64xf32, #tpu.memory_space<vmem>>, vector<8x64xf32>
    %c0_226 = arith.constant 0 : index
    %c0_227 = arith.constant 0 : index
    %633 = vector.load %arg19[%c0_226, %c0_227] : memref<8x64xf32, #tpu.memory_space<vmem>>, vector<8x64xf32>
    %cst_228 = arith.constant dense<0.000000e+00> : vector<8x256xf32>
    %634 = tpu.matmul %632, %1, %cst_228 {dimension_numbers = #tpu.dot_dimension_numbers<[1], [0], [0], [1], [0, 0, 1, 1], [], []>} : vector<8x64xf32>, vector<64x256xf32>, vector<8x256xf32> -> vector<8x256xf32>
    %635 = arith.index_cast %c6_i32 : i32 to index
    %c0_229 = arith.constant 0 : index
    %c0_230 = arith.constant 0 : index
    %636 = vector.load %arg15[%635, %c0_229, %c0_230] : memref<8x8x256xf32, #tpu.memory_space<vmem>>, vector<1x8x256xf32>
    %637 = vector.shape_cast %636 : vector<1x8x256xf32> to vector<8x256xf32>
    %638 = vector.extract_strided_slice %637 {offsets = [0, 0], sizes = [8, 128], strides = [1, 1]} : vector<8x256xf32> to vector<8x128xf32>
    %639 = vector.extract_strided_slice %634 {offsets = [0, 0], sizes = [8, 128], strides = [1, 1]} : vector<8x256xf32> to vector<8x128xf32>
    %640 = arith.addf %638, %639 : vector<8x128xf32>
    %641 = arith.index_cast %621 : i32 to index
    %c0_231 = arith.constant 0 : index
    %c0_232 = arith.constant 0 : index
    %642 = vector.load %arg15[%641, %c0_231, %c0_232] : memref<8x8x256xf32, #tpu.memory_space<vmem>>, vector<1x8x256xf32>
    %643 = vector.shape_cast %642 : vector<1x8x256xf32> to vector<8x256xf32>
    %644 = vector.extract_strided_slice %643 {offsets = [0, 128], sizes = [8, 128], strides = [1, 1]} : vector<8x256xf32> to vector<8x128xf32>
    %645 = vector.extract_strided_slice %634 {offsets = [0, 128], sizes = [8, 128], strides = [1, 1]} : vector<8x256xf32> to vector<8x128xf32>
    %646 = arith.addf %644, %645 : vector<8x128xf32>
    %647 = vector.extract_strided_slice %633 {offsets = [0, 0], sizes = [8, 32], strides = [1, 1]} : vector<8x64xf32> to vector<8x32xf32>
    %648 = vector.extract_strided_slice %640 {offsets = [0, 0], sizes = [8, 96], strides = [1, 1]} : vector<8x128xf32> to vector<8x96xf32>
    %cst_233 = arith.constant 5.000000e-01 : f32
    %649 = vector.broadcast %cst_233 : f32 to vector<8x96xf32>
    %650 = arith.mulf %649, %648 : vector<8x96xf32>
    %651 = math.tanh %650 : vector<8x96xf32>
    %cst_234 = arith.constant 5.000000e-01 : f32
    %652 = vector.broadcast %cst_234 : f32 to vector<8x96xf32>
    %653 = arith.mulf %652, %651 : vector<8x96xf32>
    %cst_235 = arith.constant 5.000000e-01 : f32
    %654 = vector.broadcast %cst_235 : f32 to vector<8x96xf32>
    %655 = arith.addf %653, %654 : vector<8x96xf32>
    %656 = vector.extract_strided_slice %640 {offsets = [0, 96], sizes = [8, 32], strides = [1, 1]} : vector<8x128xf32> to vector<8x32xf32>
    %657 = math.tanh %656 : vector<8x32xf32>
    %658 = vector.extract_strided_slice %655 {offsets = [0, 32], sizes = [8, 32], strides = [1, 1]} : vector<8x96xf32> to vector<8x32xf32>
    %659 = arith.mulf %658, %647 : vector<8x32xf32>
    %660 = vector.extract_strided_slice %655 {offsets = [0, 0], sizes = [8, 32], strides = [1, 1]} : vector<8x96xf32> to vector<8x32xf32>
    %661 = arith.mulf %660, %657 : vector<8x32xf32>
    %662 = arith.addf %659, %661 : vector<8x32xf32>
    %663 = vector.extract_strided_slice %655 {offsets = [0, 64], sizes = [8, 32], strides = [1, 1]} : vector<8x96xf32> to vector<8x32xf32>
    %664 = math.tanh %662 : vector<8x32xf32>
    %665 = arith.mulf %663, %664 : vector<8x32xf32>
    %666 = vector.extract_strided_slice %633 {offsets = [0, 32], sizes = [8, 32], strides = [1, 1]} : vector<8x64xf32> to vector<8x32xf32>
    %667 = vector.extract_strided_slice %646 {offsets = [0, 0], sizes = [8, 96], strides = [1, 1]} : vector<8x128xf32> to vector<8x96xf32>
    %cst_236 = arith.constant 5.000000e-01 : f32
    %668 = vector.broadcast %cst_236 : f32 to vector<8x96xf32>
    %669 = arith.mulf %668, %667 : vector<8x96xf32>
    %670 = math.tanh %669 : vector<8x96xf32>
    %cst_237 = arith.constant 5.000000e-01 : f32
    %671 = vector.broadcast %cst_237 : f32 to vector<8x96xf32>
    %672 = arith.mulf %671, %670 : vector<8x96xf32>
    %cst_238 = arith.constant 5.000000e-01 : f32
    %673 = vector.broadcast %cst_238 : f32 to vector<8x96xf32>
    %674 = arith.addf %672, %673 : vector<8x96xf32>
    %675 = vector.extract_strided_slice %646 {offsets = [0, 96], sizes = [8, 32], strides = [1, 1]} : vector<8x128xf32> to vector<8x32xf32>
    %676 = math.tanh %675 : vector<8x32xf32>
    %677 = vector.extract_strided_slice %674 {offsets = [0, 32], sizes = [8, 32], strides = [1, 1]} : vector<8x96xf32> to vector<8x32xf32>
    %678 = arith.mulf %677, %666 : vector<8x32xf32>
    %679 = vector.extract_strided_slice %674 {offsets = [0, 0], sizes = [8, 32], strides = [1, 1]} : vector<8x96xf32> to vector<8x32xf32>
    %680 = arith.mulf %679, %676 : vector<8x32xf32>
    %681 = arith.addf %678, %680 : vector<8x32xf32>
    %682 = vector.extract_strided_slice %674 {offsets = [0, 64], sizes = [8, 32], strides = [1, 1]} : vector<8x96xf32> to vector<8x32xf32>
    %683 = math.tanh %681 : vector<8x32xf32>
    %684 = arith.mulf %682, %683 : vector<8x32xf32>
    %685 = vector.extract_strided_slice %632 {offsets = [0, 0], sizes = [8, 32], strides = [1, 1]} : vector<8x64xf32> to vector<8x32xf32>
    %686 = vector.shape_cast %626 : vector<8x1xi1> to vector<8x1xi1>
    %687 = vector.broadcast %686 : vector<8x1xi1> to vector<8x32xi1>
    %688 = arith.select %687, %665, %685 : vector<8x32xi1>, vector<8x32xf32>
    %689 = vector.extract_strided_slice %632 {offsets = [0, 32], sizes = [8, 32], strides = [1, 1]} : vector<8x64xf32> to vector<8x32xf32>
    %690 = vector.shape_cast %631 : vector<8x1xi1> to vector<8x1xi1>
    %691 = vector.broadcast %690 : vector<8x1xi1> to vector<8x32xi1>
    %692 = arith.select %691, %684, %689 : vector<8x32xi1>, vector<8x32xf32>
    %693 = tpu.concatenate %688, %692 in 1 : vector<8x32xf32>, vector<8x32xf32> -> vector<8x64xf32>
    %c0_239 = arith.constant 0 : index
    %c0_240 = arith.constant 0 : index
    %694 = vector.load %arg18[%c0_239, %c0_240] : memref<8x64xf32, #tpu.memory_space<vmem>>, vector<8x64xf32>
    tpu.vector_store %arg18[%c0_239, %c0_240], %693 {strides = array<i32>} : memref<8x64xf32, #tpu.memory_space<vmem>>, vector<8x64xf32>,
    %695 = vector.extract_strided_slice %633 {offsets = [0, 0], sizes = [8, 32], strides = [1, 1]} : vector<8x64xf32> to vector<8x32xf32>
    %696 = vector.shape_cast %626 : vector<8x1xi1> to vector<8x1xi1>
    %697 = vector.broadcast %696 : vector<8x1xi1> to vector<8x32xi1>
    %698 = arith.select %697, %662, %695 : vector<8x32xi1>, vector<8x32xf32>
    %699 = vector.extract_strided_slice %633 {offsets = [0, 32], sizes = [8, 32], strides = [1, 1]} : vector<8x64xf32> to vector<8x32xf32>
    %700 = vector.shape_cast %631 : vector<8x1xi1> to vector<8x1xi1>
    %701 = vector.broadcast %700 : vector<8x1xi1> to vector<8x32xi1>
    %702 = arith.select %701, %681, %699 : vector<8x32xi1>, vector<8x32xf32>
    %703 = tpu.concatenate %698, %702 in 1 : vector<8x32xf32>, vector<8x32xf32> -> vector<8x64xf32>
    %c0_241 = arith.constant 0 : index
    %c0_242 = arith.constant 0 : index
    %704 = vector.load %arg19[%c0_241, %c0_242] : memref<8x64xf32, #tpu.memory_space<vmem>>, vector<8x64xf32>
    tpu.vector_store %arg19[%c0_241, %c0_242], %703 {strides = array<i32>} : memref<8x64xf32, #tpu.memory_space<vmem>>, vector<8x64xf32>,
    %cst_243 = arith.constant 0.000000e+00 : f32
    %705 = vector.shape_cast %626 : vector<8x1xi1> to vector<8x1xi1>
    %706 = vector.broadcast %705 : vector<8x1xi1> to vector<8x32xi1>
    %707 = vector.broadcast %cst_243 : f32 to vector<8x32xf32>
    %708 = arith.select %706, %665, %707 : vector<8x32xi1>, vector<8x32xf32>
    %709 = arith.index_cast %c6_i32 : i32 to index
    %c0_244 = arith.constant 0 : index
    %c0_245 = arith.constant 0 : index
    %710 = vector.load %arg16[%709, %c0_244, %c0_245] : memref<8x8x32xf32, #tpu.memory_space<vmem>>, vector<1x8x32xf32>
    %711 = vector.shape_cast %710 : vector<1x8x32xf32> to vector<8x32xf32>
    %712 = vector.shape_cast %708 : vector<8x32xf32> to vector<1x8x32xf32>
    tpu.vector_store %arg16[%709, %c0_244, %c0_245], %712 {strides = array<i32>} : memref<8x8x32xf32, #tpu.memory_space<vmem>>, vector<1x8x32xf32>,
    %cst_246 = arith.constant 0.000000e+00 : f32
    %713 = vector.shape_cast %631 : vector<8x1xi1> to vector<8x1xi1>
    %714 = vector.broadcast %713 : vector<8x1xi1> to vector<8x32xi1>
    %715 = vector.broadcast %cst_246 : f32 to vector<8x32xf32>
    %716 = arith.select %714, %684, %715 : vector<8x32xi1>, vector<8x32xf32>
    %717 = arith.index_cast %621 : i32 to index
    %c0_247 = arith.constant 0 : index
    %c0_248 = arith.constant 0 : index
    %718 = vector.load %arg17[%717, %c0_247, %c0_248] : memref<8x8x32xf32, #tpu.memory_space<vmem>>, vector<1x8x32xf32>
    %719 = vector.shape_cast %718 : vector<1x8x32xf32> to vector<8x32xf32>
    %720 = vector.shape_cast %716 : vector<8x32xf32> to vector<1x8x32xf32>
    tpu.vector_store %arg17[%717, %c0_247, %c0_248], %720 {strides = array<i32>} : memref<8x8x32xf32, #tpu.memory_space<vmem>>, vector<1x8x32xf32>,
    %c7_i32_249 = arith.constant 7 : i32
    %c7_i32_250 = arith.constant 7 : i32
    %721 = arith.subi %c7_i32_250, %c7_i32_249 : i32
    %722 = arith.index_cast %c7_i32_249 : i32 to index
    %c0_251 = arith.constant 0 : index
    %c0_252 = arith.constant 0 : index
    %723 = vector.load %arg2[%722, %c0_251, %c0_252] : memref<8x8x1xf32, #tpu.memory_space<vmem>>, vector<1x8x1xf32>
    %724 = vector.shape_cast %723 : vector<1x8x1xf32> to vector<8x1xf32>
    %cst_253 = arith.constant 5.000000e-01 : f32
    %725 = vector.broadcast %cst_253 : f32 to vector<8x1xf32>
    %726 = arith.cmpf ogt, %724, %725 : vector<8x1xf32>
    %727 = arith.index_cast %721 : i32 to index
    %c0_254 = arith.constant 0 : index
    %c0_255 = arith.constant 0 : index
    %728 = vector.load %arg2[%727, %c0_254, %c0_255] : memref<8x8x1xf32, #tpu.memory_space<vmem>>, vector<1x8x1xf32>
    %729 = vector.shape_cast %728 : vector<1x8x1xf32> to vector<8x1xf32>
    %cst_256 = arith.constant 5.000000e-01 : f32
    %730 = vector.broadcast %cst_256 : f32 to vector<8x1xf32>
    %731 = arith.cmpf ogt, %729, %730 : vector<8x1xf32>
    %c0_257 = arith.constant 0 : index
    %c0_258 = arith.constant 0 : index
    %732 = vector.load %arg18[%c0_257, %c0_258] : memref<8x64xf32, #tpu.memory_space<vmem>>, vector<8x64xf32>
    %c0_259 = arith.constant 0 : index
    %c0_260 = arith.constant 0 : index
    %733 = vector.load %arg19[%c0_259, %c0_260] : memref<8x64xf32, #tpu.memory_space<vmem>>, vector<8x64xf32>
    %cst_261 = arith.constant dense<0.000000e+00> : vector<8x256xf32>
    %734 = tpu.matmul %732, %1, %cst_261 {dimension_numbers = #tpu.dot_dimension_numbers<[1], [0], [0], [1], [0, 0, 1, 1], [], []>} : vector<8x64xf32>, vector<64x256xf32>, vector<8x256xf32> -> vector<8x256xf32>
    %735 = arith.index_cast %c7_i32_249 : i32 to index
    %c0_262 = arith.constant 0 : index
    %c0_263 = arith.constant 0 : index
    %736 = vector.load %arg15[%735, %c0_262, %c0_263] : memref<8x8x256xf32, #tpu.memory_space<vmem>>, vector<1x8x256xf32>
    %737 = vector.shape_cast %736 : vector<1x8x256xf32> to vector<8x256xf32>
    %738 = vector.extract_strided_slice %737 {offsets = [0, 0], sizes = [8, 128], strides = [1, 1]} : vector<8x256xf32> to vector<8x128xf32>
    %739 = vector.extract_strided_slice %734 {offsets = [0, 0], sizes = [8, 128], strides = [1, 1]} : vector<8x256xf32> to vector<8x128xf32>
    %740 = arith.addf %738, %739 : vector<8x128xf32>
    %741 = arith.index_cast %721 : i32 to index
    %c0_264 = arith.constant 0 : index
    %c0_265 = arith.constant 0 : index
    %742 = vector.load %arg15[%741, %c0_264, %c0_265] : memref<8x8x256xf32, #tpu.memory_space<vmem>>, vector<1x8x256xf32>
    %743 = vector.shape_cast %742 : vector<1x8x256xf32> to vector<8x256xf32>
    %744 = vector.extract_strided_slice %743 {offsets = [0, 128], sizes = [8, 128], strides = [1, 1]} : vector<8x256xf32> to vector<8x128xf32>
    %745 = vector.extract_strided_slice %734 {offsets = [0, 128], sizes = [8, 128], strides = [1, 1]} : vector<8x256xf32> to vector<8x128xf32>
    %746 = arith.addf %744, %745 : vector<8x128xf32>
    %747 = vector.extract_strided_slice %733 {offsets = [0, 0], sizes = [8, 32], strides = [1, 1]} : vector<8x64xf32> to vector<8x32xf32>
    %748 = vector.extract_strided_slice %740 {offsets = [0, 0], sizes = [8, 96], strides = [1, 1]} : vector<8x128xf32> to vector<8x96xf32>
    %cst_266 = arith.constant 5.000000e-01 : f32
    %749 = vector.broadcast %cst_266 : f32 to vector<8x96xf32>
    %750 = arith.mulf %749, %748 : vector<8x96xf32>
    %751 = math.tanh %750 : vector<8x96xf32>
    %cst_267 = arith.constant 5.000000e-01 : f32
    %752 = vector.broadcast %cst_267 : f32 to vector<8x96xf32>
    %753 = arith.mulf %752, %751 : vector<8x96xf32>
    %cst_268 = arith.constant 5.000000e-01 : f32
    %754 = vector.broadcast %cst_268 : f32 to vector<8x96xf32>
    %755 = arith.addf %753, %754 : vector<8x96xf32>
    %756 = vector.extract_strided_slice %740 {offsets = [0, 96], sizes = [8, 32], strides = [1, 1]} : vector<8x128xf32> to vector<8x32xf32>
    %757 = math.tanh %756 : vector<8x32xf32>
    %758 = vector.extract_strided_slice %755 {offsets = [0, 32], sizes = [8, 32], strides = [1, 1]} : vector<8x96xf32> to vector<8x32xf32>
    %759 = arith.mulf %758, %747 : vector<8x32xf32>
    %760 = vector.extract_strided_slice %755 {offsets = [0, 0], sizes = [8, 32], strides = [1, 1]} : vector<8x96xf32> to vector<8x32xf32>
    %761 = arith.mulf %760, %757 : vector<8x32xf32>
    %762 = arith.addf %759, %761 : vector<8x32xf32>
    %763 = vector.extract_strided_slice %755 {offsets = [0, 64], sizes = [8, 32], strides = [1, 1]} : vector<8x96xf32> to vector<8x32xf32>
    %764 = math.tanh %762 : vector<8x32xf32>
    %765 = arith.mulf %763, %764 : vector<8x32xf32>
    %766 = vector.extract_strided_slice %733 {offsets = [0, 32], sizes = [8, 32], strides = [1, 1]} : vector<8x64xf32> to vector<8x32xf32>
    %767 = vector.extract_strided_slice %746 {offsets = [0, 0], sizes = [8, 96], strides = [1, 1]} : vector<8x128xf32> to vector<8x96xf32>
    %cst_269 = arith.constant 5.000000e-01 : f32
    %768 = vector.broadcast %cst_269 : f32 to vector<8x96xf32>
    %769 = arith.mulf %768, %767 : vector<8x96xf32>
    %770 = math.tanh %769 : vector<8x96xf32>
    %cst_270 = arith.constant 5.000000e-01 : f32
    %771 = vector.broadcast %cst_270 : f32 to vector<8x96xf32>
    %772 = arith.mulf %771, %770 : vector<8x96xf32>
    %cst_271 = arith.constant 5.000000e-01 : f32
    %773 = vector.broadcast %cst_271 : f32 to vector<8x96xf32>
    %774 = arith.addf %772, %773 : vector<8x96xf32>
    %775 = vector.extract_strided_slice %746 {offsets = [0, 96], sizes = [8, 32], strides = [1, 1]} : vector<8x128xf32> to vector<8x32xf32>
    %776 = math.tanh %775 : vector<8x32xf32>
    %777 = vector.extract_strided_slice %774 {offsets = [0, 32], sizes = [8, 32], strides = [1, 1]} : vector<8x96xf32> to vector<8x32xf32>
    %778 = arith.mulf %777, %766 : vector<8x32xf32>
    %779 = vector.extract_strided_slice %774 {offsets = [0, 0], sizes = [8, 32], strides = [1, 1]} : vector<8x96xf32> to vector<8x32xf32>
    %780 = arith.mulf %779, %776 : vector<8x32xf32>
    %781 = arith.addf %778, %780 : vector<8x32xf32>
    %782 = vector.extract_strided_slice %774 {offsets = [0, 64], sizes = [8, 32], strides = [1, 1]} : vector<8x96xf32> to vector<8x32xf32>
    %783 = math.tanh %781 : vector<8x32xf32>
    %784 = arith.mulf %782, %783 : vector<8x32xf32>
    %785 = vector.extract_strided_slice %732 {offsets = [0, 0], sizes = [8, 32], strides = [1, 1]} : vector<8x64xf32> to vector<8x32xf32>
    %786 = vector.shape_cast %726 : vector<8x1xi1> to vector<8x1xi1>
    %787 = vector.broadcast %786 : vector<8x1xi1> to vector<8x32xi1>
    %788 = arith.select %787, %765, %785 : vector<8x32xi1>, vector<8x32xf32>
    %789 = vector.extract_strided_slice %732 {offsets = [0, 32], sizes = [8, 32], strides = [1, 1]} : vector<8x64xf32> to vector<8x32xf32>
    %790 = vector.shape_cast %731 : vector<8x1xi1> to vector<8x1xi1>
    %791 = vector.broadcast %790 : vector<8x1xi1> to vector<8x32xi1>
    %792 = arith.select %791, %784, %789 : vector<8x32xi1>, vector<8x32xf32>
    %793 = tpu.concatenate %788, %792 in 1 : vector<8x32xf32>, vector<8x32xf32> -> vector<8x64xf32>
    %c0_272 = arith.constant 0 : index
    %c0_273 = arith.constant 0 : index
    %794 = vector.load %arg18[%c0_272, %c0_273] : memref<8x64xf32, #tpu.memory_space<vmem>>, vector<8x64xf32>
    tpu.vector_store %arg18[%c0_272, %c0_273], %793 {strides = array<i32>} : memref<8x64xf32, #tpu.memory_space<vmem>>, vector<8x64xf32>,
    %795 = vector.extract_strided_slice %733 {offsets = [0, 0], sizes = [8, 32], strides = [1, 1]} : vector<8x64xf32> to vector<8x32xf32>
    %796 = vector.shape_cast %726 : vector<8x1xi1> to vector<8x1xi1>
    %797 = vector.broadcast %796 : vector<8x1xi1> to vector<8x32xi1>
    %798 = arith.select %797, %762, %795 : vector<8x32xi1>, vector<8x32xf32>
    %799 = vector.extract_strided_slice %733 {offsets = [0, 32], sizes = [8, 32], strides = [1, 1]} : vector<8x64xf32> to vector<8x32xf32>
    %800 = vector.shape_cast %731 : vector<8x1xi1> to vector<8x1xi1>
    %801 = vector.broadcast %800 : vector<8x1xi1> to vector<8x32xi1>
    %802 = arith.select %801, %781, %799 : vector<8x32xi1>, vector<8x32xf32>
    %803 = tpu.concatenate %798, %802 in 1 : vector<8x32xf32>, vector<8x32xf32> -> vector<8x64xf32>
    %c0_274 = arith.constant 0 : index
    %c0_275 = arith.constant 0 : index
    %804 = vector.load %arg19[%c0_274, %c0_275] : memref<8x64xf32, #tpu.memory_space<vmem>>, vector<8x64xf32>
    tpu.vector_store %arg19[%c0_274, %c0_275], %803 {strides = array<i32>} : memref<8x64xf32, #tpu.memory_space<vmem>>, vector<8x64xf32>,
    %cst_276 = arith.constant 0.000000e+00 : f32
    %805 = vector.shape_cast %726 : vector<8x1xi1> to vector<8x1xi1>
    %806 = vector.broadcast %805 : vector<8x1xi1> to vector<8x32xi1>
    %807 = vector.broadcast %cst_276 : f32 to vector<8x32xf32>
    %808 = arith.select %806, %765, %807 : vector<8x32xi1>, vector<8x32xf32>
    %809 = arith.index_cast %c7_i32_249 : i32 to index
    %c0_277 = arith.constant 0 : index
    %c0_278 = arith.constant 0 : index
    %810 = vector.load %arg16[%809, %c0_277, %c0_278] : memref<8x8x32xf32, #tpu.memory_space<vmem>>, vector<1x8x32xf32>
    %811 = vector.shape_cast %810 : vector<1x8x32xf32> to vector<8x32xf32>
    %812 = vector.shape_cast %808 : vector<8x32xf32> to vector<1x8x32xf32>
    tpu.vector_store %arg16[%809, %c0_277, %c0_278], %812 {strides = array<i32>} : memref<8x8x32xf32, #tpu.memory_space<vmem>>, vector<1x8x32xf32>,
    %cst_279 = arith.constant 0.000000e+00 : f32
    %813 = vector.shape_cast %731 : vector<8x1xi1> to vector<8x1xi1>
    %814 = vector.broadcast %813 : vector<8x1xi1> to vector<8x32xi1>
    %815 = vector.broadcast %cst_279 : f32 to vector<8x32xf32>
    %816 = arith.select %814, %784, %815 : vector<8x32xi1>, vector<8x32xf32>
    %817 = arith.index_cast %721 : i32 to index
    %c0_280 = arith.constant 0 : index
    %c0_281 = arith.constant 0 : index
    %818 = vector.load %arg17[%817, %c0_280, %c0_281] : memref<8x8x32xf32, #tpu.memory_space<vmem>>, vector<1x8x32xf32>
    %819 = vector.shape_cast %818 : vector<1x8x32xf32> to vector<8x32xf32>
    %820 = vector.shape_cast %816 : vector<8x32xf32> to vector<1x8x32xf32>
    tpu.vector_store %arg17[%817, %c0_280, %c0_281], %820 {strides = array<i32>} : memref<8x8x32xf32, #tpu.memory_space<vmem>>, vector<1x8x32xf32>,
    %c8_i32 = arith.constant 8 : i32
    %c0_282 = arith.constant 0 : index
    %c0_283 = arith.constant 0 : index
    %c0_284 = arith.constant 0 : index
    %821 = vector.load %arg16[%c0_282, %c0_283, %c0_284] : memref<8x8x32xf32, #tpu.memory_space<vmem>>, vector<8x8x32xf32>
    %c0_285 = arith.constant 0 : index
    %c0_286 = arith.constant 0 : index
    %c0_287 = arith.constant 0 : index
    %822 = vector.load %arg17[%c0_285, %c0_286, %c0_287] : memref<8x8x32xf32, #tpu.memory_space<vmem>>, vector<8x8x32xf32>
    %823 = tpu.concatenate %821, %822 in 2 : vector<8x8x32xf32>, vector<8x8x32xf32> -> vector<8x8x64xf32>
    %824 = vector.shape_cast %823 : vector<8x8x64xf32> to vector<64x64xf32>
    %cst_288 = arith.constant dense<0.000000e+00> : vector<64x64xf32>
    %825 = tpu.matmul %824, %5, %cst_288 {dimension_numbers = #tpu.dot_dimension_numbers<[1], [0], [0], [1], [0, 0, 1, 1], [], []>} : vector<64x64xf32>, vector<64x64xf32>, vector<64x64xf32> -> vector<64x64xf32>
    %826 = vector.broadcast %6 : vector<1x64xf32> to vector<64x64xf32>
    %827 = arith.addf %825, %826 : vector<64x64xf32>
    %828 = math.tanh %827 : vector<64x64xf32>
    %829 = vector.shape_cast %828 : vector<64x64xf32> to vector<8x8x64xf32>
    %830 = vector.broadcast %7 : vector<1x1x64xf32> to vector<8x8x64xf32>
    %831 = arith.mulf %829, %830 : vector<8x8x64xf32>
    %cst_289 = arith.constant dense<0.000000e+00> : vector<8x8xf32>
    %832 = vector.multi_reduction <add>, %831, %cst_289 [2] : vector<8x8x64xf32> to vector<8x8xf32>
    %833 = vector.shape_cast %832 : vector<8x8xf32> to vector<8x8x1xf32>
    %c0_290 = arith.constant 0 : index
    %c0_291 = arith.constant 0 : index
    %c0_292 = arith.constant 0 : index
    %834 = vector.load %arg2[%c0_290, %c0_291, %c0_292] : memref<8x8x1xf32, #tpu.memory_space<vmem>>, vector<1x8x1xf32>
    %835 = vector.shape_cast %834 : vector<1x8x1xf32> to vector<8x1xf32>
    %cst_293 = arith.constant dense<0xFF800000> : vector<8x1xf32>
    %836 = vector.multi_reduction <maximumf>, %833, %cst_293 [1] : vector<8x8x1xf32> to vector<8x1xf32>
    %837 = vector.shape_cast %836 : vector<8x1xf32> to vector<8x1x1xf32>
    %838 = vector.broadcast %837 : vector<8x1x1xf32> to vector<8x8x1xf32>
    %839 = arith.subf %833, %838 : vector<8x8x1xf32>
    %840 = math.exp %839 : vector<8x8x1xf32>
    %841 = vector.shape_cast %835 : vector<8x1xf32> to vector<1x8x1xf32>
    %842 = vector.broadcast %841 : vector<1x8x1xf32> to vector<8x8x1xf32>
    %843 = arith.mulf %840, %842 : vector<8x8x1xf32>
    %cst_294 = arith.constant dense<0.000000e+00> : vector<8x1xf32>
    %844 = vector.multi_reduction <add>, %843, %cst_294 [1] : vector<8x8x1xf32> to vector<8x1xf32>
    %845 = vector.shape_cast %844 : vector<8x1xf32> to vector<8x1x1xf32>
    %846 = vector.broadcast %845 : vector<8x1x1xf32> to vector<8x8x1xf32>
    %847 = arith.divf %843, %846 : vector<8x8x1xf32>
    %cst_295 = arith.constant 9.99999993E-9 : f32
    %848 = vector.broadcast %cst_295 : f32 to vector<8x8x1xf32>
    %849 = arith.addf %847, %848 : vector<8x8x1xf32>
    %850 = vector.broadcast %849 : vector<8x8x1xf32> to vector<8x8x64xf32>
    %851 = arith.mulf %850, %823 : vector<8x8x64xf32>
    %cst_296 = arith.constant dense<0.000000e+00> : vector<8x64xf32>
    %852 = vector.multi_reduction <add>, %851, %cst_296 [0] : vector<8x8x64xf32> to vector<8x64xf32>
    %c0_297 = arith.constant 0 : index
    %c0_298 = arith.constant 0 : index
    %853 = vector.load %arg13[%c0_297, %c0_298] : memref<64x16xf32, #tpu.memory_space<vmem>>, vector<64x16xf32>
    %cst_299 = arith.constant dense<0.000000e+00> : vector<8x16xf32>
    %854 = tpu.matmul %852, %853, %cst_299 {dimension_numbers = #tpu.dot_dimension_numbers<[1], [0], [0], [1], [0, 0, 1, 1], [], []>} : vector<8x64xf32>, vector<64x16xf32>, vector<8x16xf32> -> vector<8x16xf32>
    %c0_300 = arith.constant 0 : index
    %c0_301 = arith.constant 0 : index
    %855 = vector.load %arg3[%c0_300, %c0_301] : memref<24x8xf32, #tpu.memory_space<vmem>>, vector<24x8xf32>
    %cst_302 = arith.constant dense<0.000000e+00> : vector<24x16xf32>
    %856 = tpu.matmul %855, %854, %cst_302 {dimension_numbers = #tpu.dot_dimension_numbers<[1], [0], [0], [1], [0, 0, 1, 1], [], []>} : vector<24x8xf32>, vector<8x16xf32>, vector<24x16xf32> -> vector<24x16xf32>
    %cst_303 = arith.constant dense<0.000000e+00> : vector<24x256xf32>
    %857 = tpu.matmul %856, %0, %cst_303 {dimension_numbers = #tpu.dot_dimension_numbers<[1], [0], [0], [1], [0, 0, 1, 1], [], []>} : vector<24x16xf32>, vector<16x256xf32>, vector<24x256xf32> -> vector<24x256xf32>
    %858 = vector.broadcast %2 : vector<1x256xf32> to vector<24x256xf32>
    %859 = arith.addf %857, %858 : vector<24x256xf32>
    %860 = vector.shape_cast %859 : vector<24x256xf32> to vector<3x8x256xf32>
    %c0_304 = arith.constant 0 : index
    %c0_305 = arith.constant 0 : index
    %c0_306 = arith.constant 0 : index
    %861 = vector.load %arg20[%c0_304, %c0_305, %c0_306] : memref<3x8x256xf32, #tpu.memory_space<vmem>>, vector<3x8x256xf32>
    tpu.vector_store %arg20[%c0_304, %c0_305, %c0_306], %860 {strides = array<i32>} : memref<3x8x256xf32, #tpu.memory_space<vmem>>, vector<3x8x256xf32>,
    %862 = vector.shape_cast %3 : vector<1x64xf32> to vector<1x64xf32>
    %863 = vector.broadcast %862 : vector<1x64xf32> to vector<8x64xf32>
    %c0_307 = arith.constant 0 : index
    %c0_308 = arith.constant 0 : index
    %864 = vector.load %arg23[%c0_307, %c0_308] : memref<8x64xf32, #tpu.memory_space<vmem>>, vector<8x64xf32>
    tpu.vector_store %arg23[%c0_307, %c0_308], %863 {strides = array<i32>} : memref<8x64xf32, #tpu.memory_space<vmem>>, vector<8x64xf32>,
    %865 = vector.shape_cast %4 : vector<1x64xf32> to vector<1x64xf32>
    %866 = vector.broadcast %865 : vector<1x64xf32> to vector<8x64xf32>
    %c0_309 = arith.constant 0 : index
    %c0_310 = arith.constant 0 : index
    %867 = vector.load %arg24[%c0_309, %c0_310] : memref<8x64xf32, #tpu.memory_space<vmem>>, vector<8x64xf32>
    tpu.vector_store %arg24[%c0_309, %c0_310], %866 {strides = array<i32>} : memref<8x64xf32, #tpu.memory_space<vmem>>, vector<8x64xf32>,
    %c0_i32_311 = arith.constant 0 : i32
    %c2_i32_312 = arith.constant 2 : i32
    %868 = arith.subi %c2_i32_312, %c0_i32_311 : i32
    %869 = arith.index_cast %c0_i32_311 : i32 to index
    %c0_313 = arith.constant 0 : index
    %c0_314 = arith.constant 0 : index
    %870 = vector.load %arg4[%869, %c0_313, %c0_314] : memref<3x8x1xf32, #tpu.memory_space<vmem>>, vector<1x8x1xf32>
    %871 = vector.shape_cast %870 : vector<1x8x1xf32> to vector<8x1xf32>
    %cst_315 = arith.constant 5.000000e-01 : f32
    %872 = vector.broadcast %cst_315 : f32 to vector<8x1xf32>
    %873 = arith.cmpf ogt, %871, %872 : vector<8x1xf32>
    %874 = arith.index_cast %868 : i32 to index
    %c0_316 = arith.constant 0 : index
    %c0_317 = arith.constant 0 : index
    %875 = vector.load %arg4[%874, %c0_316, %c0_317] : memref<3x8x1xf32, #tpu.memory_space<vmem>>, vector<1x8x1xf32>
    %876 = vector.shape_cast %875 : vector<1x8x1xf32> to vector<8x1xf32>
    %cst_318 = arith.constant 5.000000e-01 : f32
    %877 = vector.broadcast %cst_318 : f32 to vector<8x1xf32>
    %878 = arith.cmpf ogt, %876, %877 : vector<8x1xf32>
    %c0_319 = arith.constant 0 : index
    %c0_320 = arith.constant 0 : index
    %879 = vector.load %arg23[%c0_319, %c0_320] : memref<8x64xf32, #tpu.memory_space<vmem>>, vector<8x64xf32>
    %c0_321 = arith.constant 0 : index
    %c0_322 = arith.constant 0 : index
    %880 = vector.load %arg24[%c0_321, %c0_322] : memref<8x64xf32, #tpu.memory_space<vmem>>, vector<8x64xf32>
    %cst_323 = arith.constant dense<0.000000e+00> : vector<8x256xf32>
    %881 = tpu.matmul %879, %1, %cst_323 {dimension_numbers = #tpu.dot_dimension_numbers<[1], [0], [0], [1], [0, 0, 1, 1], [], []>} : vector<8x64xf32>, vector<64x256xf32>, vector<8x256xf32> -> vector<8x256xf32>
    %882 = arith.index_cast %c0_i32_311 : i32 to index
    %c0_324 = arith.constant 0 : index
    %c0_325 = arith.constant 0 : index
    %883 = vector.load %arg20[%882, %c0_324, %c0_325] : memref<3x8x256xf32, #tpu.memory_space<vmem>>, vector<1x8x256xf32>
    %884 = vector.shape_cast %883 : vector<1x8x256xf32> to vector<8x256xf32>
    %885 = vector.extract_strided_slice %884 {offsets = [0, 0], sizes = [8, 128], strides = [1, 1]} : vector<8x256xf32> to vector<8x128xf32>
    %886 = vector.extract_strided_slice %881 {offsets = [0, 0], sizes = [8, 128], strides = [1, 1]} : vector<8x256xf32> to vector<8x128xf32>
    %887 = arith.addf %885, %886 : vector<8x128xf32>
    %888 = arith.index_cast %868 : i32 to index
    %c0_326 = arith.constant 0 : index
    %c0_327 = arith.constant 0 : index
    %889 = vector.load %arg20[%888, %c0_326, %c0_327] : memref<3x8x256xf32, #tpu.memory_space<vmem>>, vector<1x8x256xf32>
    %890 = vector.shape_cast %889 : vector<1x8x256xf32> to vector<8x256xf32>
    %891 = vector.extract_strided_slice %890 {offsets = [0, 128], sizes = [8, 128], strides = [1, 1]} : vector<8x256xf32> to vector<8x128xf32>
    %892 = vector.extract_strided_slice %881 {offsets = [0, 128], sizes = [8, 128], strides = [1, 1]} : vector<8x256xf32> to vector<8x128xf32>
    %893 = arith.addf %891, %892 : vector<8x128xf32>
    %894 = vector.extract_strided_slice %880 {offsets = [0, 0], sizes = [8, 32], strides = [1, 1]} : vector<8x64xf32> to vector<8x32xf32>
    %895 = vector.extract_strided_slice %887 {offsets = [0, 0], sizes = [8, 96], strides = [1, 1]} : vector<8x128xf32> to vector<8x96xf32>
    %cst_328 = arith.constant 5.000000e-01 : f32
    %896 = vector.broadcast %cst_328 : f32 to vector<8x96xf32>
    %897 = arith.mulf %896, %895 : vector<8x96xf32>
    %898 = math.tanh %897 : vector<8x96xf32>
    %cst_329 = arith.constant 5.000000e-01 : f32
    %899 = vector.broadcast %cst_329 : f32 to vector<8x96xf32>
    %900 = arith.mulf %899, %898 : vector<8x96xf32>
    %cst_330 = arith.constant 5.000000e-01 : f32
    %901 = vector.broadcast %cst_330 : f32 to vector<8x96xf32>
    %902 = arith.addf %900, %901 : vector<8x96xf32>
    %903 = vector.extract_strided_slice %887 {offsets = [0, 96], sizes = [8, 32], strides = [1, 1]} : vector<8x128xf32> to vector<8x32xf32>
    %904 = math.tanh %903 : vector<8x32xf32>
    %905 = vector.extract_strided_slice %902 {offsets = [0, 32], sizes = [8, 32], strides = [1, 1]} : vector<8x96xf32> to vector<8x32xf32>
    %906 = arith.mulf %905, %894 : vector<8x32xf32>
    %907 = vector.extract_strided_slice %902 {offsets = [0, 0], sizes = [8, 32], strides = [1, 1]} : vector<8x96xf32> to vector<8x32xf32>
    %908 = arith.mulf %907, %904 : vector<8x32xf32>
    %909 = arith.addf %906, %908 : vector<8x32xf32>
    %910 = vector.extract_strided_slice %902 {offsets = [0, 64], sizes = [8, 32], strides = [1, 1]} : vector<8x96xf32> to vector<8x32xf32>
    %911 = math.tanh %909 : vector<8x32xf32>
    %912 = arith.mulf %910, %911 : vector<8x32xf32>
    %913 = vector.extract_strided_slice %880 {offsets = [0, 32], sizes = [8, 32], strides = [1, 1]} : vector<8x64xf32> to vector<8x32xf32>
    %914 = vector.extract_strided_slice %893 {offsets = [0, 0], sizes = [8, 96], strides = [1, 1]} : vector<8x128xf32> to vector<8x96xf32>
    %cst_331 = arith.constant 5.000000e-01 : f32
    %915 = vector.broadcast %cst_331 : f32 to vector<8x96xf32>
    %916 = arith.mulf %915, %914 : vector<8x96xf32>
    %917 = math.tanh %916 : vector<8x96xf32>
    %cst_332 = arith.constant 5.000000e-01 : f32
    %918 = vector.broadcast %cst_332 : f32 to vector<8x96xf32>
    %919 = arith.mulf %918, %917 : vector<8x96xf32>
    %cst_333 = arith.constant 5.000000e-01 : f32
    %920 = vector.broadcast %cst_333 : f32 to vector<8x96xf32>
    %921 = arith.addf %919, %920 : vector<8x96xf32>
    %922 = vector.extract_strided_slice %893 {offsets = [0, 96], sizes = [8, 32], strides = [1, 1]} : vector<8x128xf32> to vector<8x32xf32>
    %923 = math.tanh %922 : vector<8x32xf32>
    %924 = vector.extract_strided_slice %921 {offsets = [0, 32], sizes = [8, 32], strides = [1, 1]} : vector<8x96xf32> to vector<8x32xf32>
    %925 = arith.mulf %924, %913 : vector<8x32xf32>
    %926 = vector.extract_strided_slice %921 {offsets = [0, 0], sizes = [8, 32], strides = [1, 1]} : vector<8x96xf32> to vector<8x32xf32>
    %927 = arith.mulf %926, %923 : vector<8x32xf32>
    %928 = arith.addf %925, %927 : vector<8x32xf32>
    %929 = vector.extract_strided_slice %921 {offsets = [0, 64], sizes = [8, 32], strides = [1, 1]} : vector<8x96xf32> to vector<8x32xf32>
    %930 = math.tanh %928 : vector<8x32xf32>
    %931 = arith.mulf %929, %930 : vector<8x32xf32>
    %932 = vector.extract_strided_slice %879 {offsets = [0, 0], sizes = [8, 32], strides = [1, 1]} : vector<8x64xf32> to vector<8x32xf32>
    %933 = vector.shape_cast %873 : vector<8x1xi1> to vector<8x1xi1>
    %934 = vector.broadcast %933 : vector<8x1xi1> to vector<8x32xi1>
    %935 = arith.select %934, %912, %932 : vector<8x32xi1>, vector<8x32xf32>
    %936 = vector.extract_strided_slice %879 {offsets = [0, 32], sizes = [8, 32], strides = [1, 1]} : vector<8x64xf32> to vector<8x32xf32>
    %937 = vector.shape_cast %878 : vector<8x1xi1> to vector<8x1xi1>
    %938 = vector.broadcast %937 : vector<8x1xi1> to vector<8x32xi1>
    %939 = arith.select %938, %931, %936 : vector<8x32xi1>, vector<8x32xf32>
    %940 = tpu.concatenate %935, %939 in 1 : vector<8x32xf32>, vector<8x32xf32> -> vector<8x64xf32>
    %c0_334 = arith.constant 0 : index
    %c0_335 = arith.constant 0 : index
    %941 = vector.load %arg23[%c0_334, %c0_335] : memref<8x64xf32, #tpu.memory_space<vmem>>, vector<8x64xf32>
    tpu.vector_store %arg23[%c0_334, %c0_335], %940 {strides = array<i32>} : memref<8x64xf32, #tpu.memory_space<vmem>>, vector<8x64xf32>,
    %942 = vector.extract_strided_slice %880 {offsets = [0, 0], sizes = [8, 32], strides = [1, 1]} : vector<8x64xf32> to vector<8x32xf32>
    %943 = vector.shape_cast %873 : vector<8x1xi1> to vector<8x1xi1>
    %944 = vector.broadcast %943 : vector<8x1xi1> to vector<8x32xi1>
    %945 = arith.select %944, %909, %942 : vector<8x32xi1>, vector<8x32xf32>
    %946 = vector.extract_strided_slice %880 {offsets = [0, 32], sizes = [8, 32], strides = [1, 1]} : vector<8x64xf32> to vector<8x32xf32>
    %947 = vector.shape_cast %878 : vector<8x1xi1> to vector<8x1xi1>
    %948 = vector.broadcast %947 : vector<8x1xi1> to vector<8x32xi1>
    %949 = arith.select %948, %928, %946 : vector<8x32xi1>, vector<8x32xf32>
    %950 = tpu.concatenate %945, %949 in 1 : vector<8x32xf32>, vector<8x32xf32> -> vector<8x64xf32>
    %c0_336 = arith.constant 0 : index
    %c0_337 = arith.constant 0 : index
    %951 = vector.load %arg24[%c0_336, %c0_337] : memref<8x64xf32, #tpu.memory_space<vmem>>, vector<8x64xf32>
    tpu.vector_store %arg24[%c0_336, %c0_337], %950 {strides = array<i32>} : memref<8x64xf32, #tpu.memory_space<vmem>>, vector<8x64xf32>,
    %cst_338 = arith.constant 0.000000e+00 : f32
    %952 = vector.shape_cast %873 : vector<8x1xi1> to vector<8x1xi1>
    %953 = vector.broadcast %952 : vector<8x1xi1> to vector<8x32xi1>
    %954 = vector.broadcast %cst_338 : f32 to vector<8x32xf32>
    %955 = arith.select %953, %912, %954 : vector<8x32xi1>, vector<8x32xf32>
    %956 = arith.index_cast %c0_i32_311 : i32 to index
    %c0_339 = arith.constant 0 : index
    %c0_340 = arith.constant 0 : index
    %957 = vector.load %arg21[%956, %c0_339, %c0_340] : memref<3x8x32xf32, #tpu.memory_space<vmem>>, vector<1x8x32xf32>
    %958 = vector.shape_cast %957 : vector<1x8x32xf32> to vector<8x32xf32>
    %959 = vector.shape_cast %955 : vector<8x32xf32> to vector<1x8x32xf32>
    tpu.vector_store %arg21[%956, %c0_339, %c0_340], %959 {strides = array<i32>} : memref<3x8x32xf32, #tpu.memory_space<vmem>>, vector<1x8x32xf32>,
    %cst_341 = arith.constant 0.000000e+00 : f32
    %960 = vector.shape_cast %878 : vector<8x1xi1> to vector<8x1xi1>
    %961 = vector.broadcast %960 : vector<8x1xi1> to vector<8x32xi1>
    %962 = vector.broadcast %cst_341 : f32 to vector<8x32xf32>
    %963 = arith.select %961, %931, %962 : vector<8x32xi1>, vector<8x32xf32>
    %964 = arith.index_cast %868 : i32 to index
    %c0_342 = arith.constant 0 : index
    %c0_343 = arith.constant 0 : index
    %965 = vector.load %arg22[%964, %c0_342, %c0_343] : memref<3x8x32xf32, #tpu.memory_space<vmem>>, vector<1x8x32xf32>
    %966 = vector.shape_cast %965 : vector<1x8x32xf32> to vector<8x32xf32>
    %967 = vector.shape_cast %963 : vector<8x32xf32> to vector<1x8x32xf32>
    tpu.vector_store %arg22[%964, %c0_342, %c0_343], %967 {strides = array<i32>} : memref<3x8x32xf32, #tpu.memory_space<vmem>>, vector<1x8x32xf32>,
    %c1_i32_344 = arith.constant 1 : i32
    %c2_i32_345 = arith.constant 2 : i32
    %968 = arith.subi %c2_i32_345, %c1_i32_344 : i32
    %969 = arith.index_cast %c1_i32_344 : i32 to index
    %c0_346 = arith.constant 0 : index
    %c0_347 = arith.constant 0 : index
    %970 = vector.load %arg4[%969, %c0_346, %c0_347] : memref<3x8x1xf32, #tpu.memory_space<vmem>>, vector<1x8x1xf32>
    %971 = vector.shape_cast %970 : vector<1x8x1xf32> to vector<8x1xf32>
    %cst_348 = arith.constant 5.000000e-01 : f32
    %972 = vector.broadcast %cst_348 : f32 to vector<8x1xf32>
    %973 = arith.cmpf ogt, %971, %972 : vector<8x1xf32>
    %974 = arith.index_cast %968 : i32 to index
    %c0_349 = arith.constant 0 : index
    %c0_350 = arith.constant 0 : index
    %975 = vector.load %arg4[%974, %c0_349, %c0_350] : memref<3x8x1xf32, #tpu.memory_space<vmem>>, vector<1x8x1xf32>
    %976 = vector.shape_cast %975 : vector<1x8x1xf32> to vector<8x1xf32>
    %cst_351 = arith.constant 5.000000e-01 : f32
    %977 = vector.broadcast %cst_351 : f32 to vector<8x1xf32>
    %978 = arith.cmpf ogt, %976, %977 : vector<8x1xf32>
    %c0_352 = arith.constant 0 : index
    %c0_353 = arith.constant 0 : index
    %979 = vector.load %arg23[%c0_352, %c0_353] : memref<8x64xf32, #tpu.memory_space<vmem>>, vector<8x64xf32>
    %c0_354 = arith.constant 0 : index
    %c0_355 = arith.constant 0 : index
    %980 = vector.load %arg24[%c0_354, %c0_355] : memref<8x64xf32, #tpu.memory_space<vmem>>, vector<8x64xf32>
    %cst_356 = arith.constant dense<0.000000e+00> : vector<8x256xf32>
    %981 = tpu.matmul %979, %1, %cst_356 {dimension_numbers = #tpu.dot_dimension_numbers<[1], [0], [0], [1], [0, 0, 1, 1], [], []>} : vector<8x64xf32>, vector<64x256xf32>, vector<8x256xf32> -> vector<8x256xf32>
    %982 = arith.index_cast %c1_i32_344 : i32 to index
    %c0_357 = arith.constant 0 : index
    %c0_358 = arith.constant 0 : index
    %983 = vector.load %arg20[%982, %c0_357, %c0_358] : memref<3x8x256xf32, #tpu.memory_space<vmem>>, vector<1x8x256xf32>
    %984 = vector.shape_cast %983 : vector<1x8x256xf32> to vector<8x256xf32>
    %985 = vector.extract_strided_slice %984 {offsets = [0, 0], sizes = [8, 128], strides = [1, 1]} : vector<8x256xf32> to vector<8x128xf32>
    %986 = vector.extract_strided_slice %981 {offsets = [0, 0], sizes = [8, 128], strides = [1, 1]} : vector<8x256xf32> to vector<8x128xf32>
    %987 = arith.addf %985, %986 : vector<8x128xf32>
    %988 = arith.index_cast %968 : i32 to index
    %c0_359 = arith.constant 0 : index
    %c0_360 = arith.constant 0 : index
    %989 = vector.load %arg20[%988, %c0_359, %c0_360] : memref<3x8x256xf32, #tpu.memory_space<vmem>>, vector<1x8x256xf32>
    %990 = vector.shape_cast %989 : vector<1x8x256xf32> to vector<8x256xf32>
    %991 = vector.extract_strided_slice %990 {offsets = [0, 128], sizes = [8, 128], strides = [1, 1]} : vector<8x256xf32> to vector<8x128xf32>
    %992 = vector.extract_strided_slice %981 {offsets = [0, 128], sizes = [8, 128], strides = [1, 1]} : vector<8x256xf32> to vector<8x128xf32>
    %993 = arith.addf %991, %992 : vector<8x128xf32>
    %994 = vector.extract_strided_slice %980 {offsets = [0, 0], sizes = [8, 32], strides = [1, 1]} : vector<8x64xf32> to vector<8x32xf32>
    %995 = vector.extract_strided_slice %987 {offsets = [0, 0], sizes = [8, 96], strides = [1, 1]} : vector<8x128xf32> to vector<8x96xf32>
    %cst_361 = arith.constant 5.000000e-01 : f32
    %996 = vector.broadcast %cst_361 : f32 to vector<8x96xf32>
    %997 = arith.mulf %996, %995 : vector<8x96xf32>
    %998 = math.tanh %997 : vector<8x96xf32>
    %cst_362 = arith.constant 5.000000e-01 : f32
    %999 = vector.broadcast %cst_362 : f32 to vector<8x96xf32>
    %1000 = arith.mulf %999, %998 : vector<8x96xf32>
    %cst_363 = arith.constant 5.000000e-01 : f32
    %1001 = vector.broadcast %cst_363 : f32 to vector<8x96xf32>
    %1002 = arith.addf %1000, %1001 : vector<8x96xf32>
    %1003 = vector.extract_strided_slice %987 {offsets = [0, 96], sizes = [8, 32], strides = [1, 1]} : vector<8x128xf32> to vector<8x32xf32>
    %1004 = math.tanh %1003 : vector<8x32xf32>
    %1005 = vector.extract_strided_slice %1002 {offsets = [0, 32], sizes = [8, 32], strides = [1, 1]} : vector<8x96xf32> to vector<8x32xf32>
    %1006 = arith.mulf %1005, %994 : vector<8x32xf32>
    %1007 = vector.extract_strided_slice %1002 {offsets = [0, 0], sizes = [8, 32], strides = [1, 1]} : vector<8x96xf32> to vector<8x32xf32>
    %1008 = arith.mulf %1007, %1004 : vector<8x32xf32>
    %1009 = arith.addf %1006, %1008 : vector<8x32xf32>
    %1010 = vector.extract_strided_slice %1002 {offsets = [0, 64], sizes = [8, 32], strides = [1, 1]} : vector<8x96xf32> to vector<8x32xf32>
    %1011 = math.tanh %1009 : vector<8x32xf32>
    %1012 = arith.mulf %1010, %1011 : vector<8x32xf32>
    %1013 = vector.extract_strided_slice %980 {offsets = [0, 32], sizes = [8, 32], strides = [1, 1]} : vector<8x64xf32> to vector<8x32xf32>
    %1014 = vector.extract_strided_slice %993 {offsets = [0, 0], sizes = [8, 96], strides = [1, 1]} : vector<8x128xf32> to vector<8x96xf32>
    %cst_364 = arith.constant 5.000000e-01 : f32
    %1015 = vector.broadcast %cst_364 : f32 to vector<8x96xf32>
    %1016 = arith.mulf %1015, %1014 : vector<8x96xf32>
    %1017 = math.tanh %1016 : vector<8x96xf32>
    %cst_365 = arith.constant 5.000000e-01 : f32
    %1018 = vector.broadcast %cst_365 : f32 to vector<8x96xf32>
    %1019 = arith.mulf %1018, %1017 : vector<8x96xf32>
    %cst_366 = arith.constant 5.000000e-01 : f32
    %1020 = vector.broadcast %cst_366 : f32 to vector<8x96xf32>
    %1021 = arith.addf %1019, %1020 : vector<8x96xf32>
    %1022 = vector.extract_strided_slice %993 {offsets = [0, 96], sizes = [8, 32], strides = [1, 1]} : vector<8x128xf32> to vector<8x32xf32>
    %1023 = math.tanh %1022 : vector<8x32xf32>
    %1024 = vector.extract_strided_slice %1021 {offsets = [0, 32], sizes = [8, 32], strides = [1, 1]} : vector<8x96xf32> to vector<8x32xf32>
    %1025 = arith.mulf %1024, %1013 : vector<8x32xf32>
    %1026 = vector.extract_strided_slice %1021 {offsets = [0, 0], sizes = [8, 32], strides = [1, 1]} : vector<8x96xf32> to vector<8x32xf32>
    %1027 = arith.mulf %1026, %1023 : vector<8x32xf32>
    %1028 = arith.addf %1025, %1027 : vector<8x32xf32>
    %1029 = vector.extract_strided_slice %1021 {offsets = [0, 64], sizes = [8, 32], strides = [1, 1]} : vector<8x96xf32> to vector<8x32xf32>
    %1030 = math.tanh %1028 : vector<8x32xf32>
    %1031 = arith.mulf %1029, %1030 : vector<8x32xf32>
    %1032 = vector.extract_strided_slice %979 {offsets = [0, 0], sizes = [8, 32], strides = [1, 1]} : vector<8x64xf32> to vector<8x32xf32>
    %1033 = vector.shape_cast %973 : vector<8x1xi1> to vector<8x1xi1>
    %1034 = vector.broadcast %1033 : vector<8x1xi1> to vector<8x32xi1>
    %1035 = arith.select %1034, %1012, %1032 : vector<8x32xi1>, vector<8x32xf32>
    %1036 = vector.extract_strided_slice %979 {offsets = [0, 32], sizes = [8, 32], strides = [1, 1]} : vector<8x64xf32> to vector<8x32xf32>
    %1037 = vector.shape_cast %978 : vector<8x1xi1> to vector<8x1xi1>
    %1038 = vector.broadcast %1037 : vector<8x1xi1> to vector<8x32xi1>
    %1039 = arith.select %1038, %1031, %1036 : vector<8x32xi1>, vector<8x32xf32>
    %1040 = tpu.concatenate %1035, %1039 in 1 : vector<8x32xf32>, vector<8x32xf32> -> vector<8x64xf32>
    %c0_367 = arith.constant 0 : index
    %c0_368 = arith.constant 0 : index
    %1041 = vector.load %arg23[%c0_367, %c0_368] : memref<8x64xf32, #tpu.memory_space<vmem>>, vector<8x64xf32>
    tpu.vector_store %arg23[%c0_367, %c0_368], %1040 {strides = array<i32>} : memref<8x64xf32, #tpu.memory_space<vmem>>, vector<8x64xf32>,
    %1042 = vector.extract_strided_slice %980 {offsets = [0, 0], sizes = [8, 32], strides = [1, 1]} : vector<8x64xf32> to vector<8x32xf32>
    %1043 = vector.shape_cast %973 : vector<8x1xi1> to vector<8x1xi1>
    %1044 = vector.broadcast %1043 : vector<8x1xi1> to vector<8x32xi1>
    %1045 = arith.select %1044, %1009, %1042 : vector<8x32xi1>, vector<8x32xf32>
    %1046 = vector.extract_strided_slice %980 {offsets = [0, 32], sizes = [8, 32], strides = [1, 1]} : vector<8x64xf32> to vector<8x32xf32>
    %1047 = vector.shape_cast %978 : vector<8x1xi1> to vector<8x1xi1>
    %1048 = vector.broadcast %1047 : vector<8x1xi1> to vector<8x32xi1>
    %1049 = arith.select %1048, %1028, %1046 : vector<8x32xi1>, vector<8x32xf32>
    %1050 = tpu.concatenate %1045, %1049 in 1 : vector<8x32xf32>, vector<8x32xf32> -> vector<8x64xf32>
    %c0_369 = arith.constant 0 : index
    %c0_370 = arith.constant 0 : index
    %1051 = vector.load %arg24[%c0_369, %c0_370] : memref<8x64xf32, #tpu.memory_space<vmem>>, vector<8x64xf32>
    tpu.vector_store %arg24[%c0_369, %c0_370], %1050 {strides = array<i32>} : memref<8x64xf32, #tpu.memory_space<vmem>>, vector<8x64xf32>,
    %cst_371 = arith.constant 0.000000e+00 : f32
    %1052 = vector.shape_cast %973 : vector<8x1xi1> to vector<8x1xi1>
    %1053 = vector.broadcast %1052 : vector<8x1xi1> to vector<8x32xi1>
    %1054 = vector.broadcast %cst_371 : f32 to vector<8x32xf32>
    %1055 = arith.select %1053, %1012, %1054 : vector<8x32xi1>, vector<8x32xf32>
    %1056 = arith.index_cast %c1_i32_344 : i32 to index
    %c0_372 = arith.constant 0 : index
    %c0_373 = arith.constant 0 : index
    %1057 = vector.load %arg21[%1056, %c0_372, %c0_373] : memref<3x8x32xf32, #tpu.memory_space<vmem>>, vector<1x8x32xf32>
    %1058 = vector.shape_cast %1057 : vector<1x8x32xf32> to vector<8x32xf32>
    %1059 = vector.shape_cast %1055 : vector<8x32xf32> to vector<1x8x32xf32>
    tpu.vector_store %arg21[%1056, %c0_372, %c0_373], %1059 {strides = array<i32>} : memref<3x8x32xf32, #tpu.memory_space<vmem>>, vector<1x8x32xf32>,
    %cst_374 = arith.constant 0.000000e+00 : f32
    %1060 = vector.shape_cast %978 : vector<8x1xi1> to vector<8x1xi1>
    %1061 = vector.broadcast %1060 : vector<8x1xi1> to vector<8x32xi1>
    %1062 = vector.broadcast %cst_374 : f32 to vector<8x32xf32>
    %1063 = arith.select %1061, %1031, %1062 : vector<8x32xi1>, vector<8x32xf32>
    %1064 = arith.index_cast %968 : i32 to index
    %c0_375 = arith.constant 0 : index
    %c0_376 = arith.constant 0 : index
    %1065 = vector.load %arg22[%1064, %c0_375, %c0_376] : memref<3x8x32xf32, #tpu.memory_space<vmem>>, vector<1x8x32xf32>
    %1066 = vector.shape_cast %1065 : vector<1x8x32xf32> to vector<8x32xf32>
    %1067 = vector.shape_cast %1063 : vector<8x32xf32> to vector<1x8x32xf32>
    tpu.vector_store %arg22[%1064, %c0_375, %c0_376], %1067 {strides = array<i32>} : memref<3x8x32xf32, #tpu.memory_space<vmem>>, vector<1x8x32xf32>,
    %c2_i32_377 = arith.constant 2 : i32
    %c2_i32_378 = arith.constant 2 : i32
    %1068 = arith.subi %c2_i32_378, %c2_i32_377 : i32
    %1069 = arith.index_cast %c2_i32_377 : i32 to index
    %c0_379 = arith.constant 0 : index
    %c0_380 = arith.constant 0 : index
    %1070 = vector.load %arg4[%1069, %c0_379, %c0_380] : memref<3x8x1xf32, #tpu.memory_space<vmem>>, vector<1x8x1xf32>
    %1071 = vector.shape_cast %1070 : vector<1x8x1xf32> to vector<8x1xf32>
    %cst_381 = arith.constant 5.000000e-01 : f32
    %1072 = vector.broadcast %cst_381 : f32 to vector<8x1xf32>
    %1073 = arith.cmpf ogt, %1071, %1072 : vector<8x1xf32>
    %1074 = arith.index_cast %1068 : i32 to index
    %c0_382 = arith.constant 0 : index
    %c0_383 = arith.constant 0 : index
    %1075 = vector.load %arg4[%1074, %c0_382, %c0_383] : memref<3x8x1xf32, #tpu.memory_space<vmem>>, vector<1x8x1xf32>
    %1076 = vector.shape_cast %1075 : vector<1x8x1xf32> to vector<8x1xf32>
    %cst_384 = arith.constant 5.000000e-01 : f32
    %1077 = vector.broadcast %cst_384 : f32 to vector<8x1xf32>
    %1078 = arith.cmpf ogt, %1076, %1077 : vector<8x1xf32>
    %c0_385 = arith.constant 0 : index
    %c0_386 = arith.constant 0 : index
    %1079 = vector.load %arg23[%c0_385, %c0_386] : memref<8x64xf32, #tpu.memory_space<vmem>>, vector<8x64xf32>
    %c0_387 = arith.constant 0 : index
    %c0_388 = arith.constant 0 : index
    %1080 = vector.load %arg24[%c0_387, %c0_388] : memref<8x64xf32, #tpu.memory_space<vmem>>, vector<8x64xf32>
    %cst_389 = arith.constant dense<0.000000e+00> : vector<8x256xf32>
    %1081 = tpu.matmul %1079, %1, %cst_389 {dimension_numbers = #tpu.dot_dimension_numbers<[1], [0], [0], [1], [0, 0, 1, 1], [], []>} : vector<8x64xf32>, vector<64x256xf32>, vector<8x256xf32> -> vector<8x256xf32>
    %1082 = arith.index_cast %c2_i32_377 : i32 to index
    %c0_390 = arith.constant 0 : index
    %c0_391 = arith.constant 0 : index
    %1083 = vector.load %arg20[%1082, %c0_390, %c0_391] : memref<3x8x256xf32, #tpu.memory_space<vmem>>, vector<1x8x256xf32>
    %1084 = vector.shape_cast %1083 : vector<1x8x256xf32> to vector<8x256xf32>
    %1085 = vector.extract_strided_slice %1084 {offsets = [0, 0], sizes = [8, 128], strides = [1, 1]} : vector<8x256xf32> to vector<8x128xf32>
    %1086 = vector.extract_strided_slice %1081 {offsets = [0, 0], sizes = [8, 128], strides = [1, 1]} : vector<8x256xf32> to vector<8x128xf32>
    %1087 = arith.addf %1085, %1086 : vector<8x128xf32>
    %1088 = arith.index_cast %1068 : i32 to index
    %c0_392 = arith.constant 0 : index
    %c0_393 = arith.constant 0 : index
    %1089 = vector.load %arg20[%1088, %c0_392, %c0_393] : memref<3x8x256xf32, #tpu.memory_space<vmem>>, vector<1x8x256xf32>
    %1090 = vector.shape_cast %1089 : vector<1x8x256xf32> to vector<8x256xf32>
    %1091 = vector.extract_strided_slice %1090 {offsets = [0, 128], sizes = [8, 128], strides = [1, 1]} : vector<8x256xf32> to vector<8x128xf32>
    %1092 = vector.extract_strided_slice %1081 {offsets = [0, 128], sizes = [8, 128], strides = [1, 1]} : vector<8x256xf32> to vector<8x128xf32>
    %1093 = arith.addf %1091, %1092 : vector<8x128xf32>
    %1094 = vector.extract_strided_slice %1080 {offsets = [0, 0], sizes = [8, 32], strides = [1, 1]} : vector<8x64xf32> to vector<8x32xf32>
    %1095 = vector.extract_strided_slice %1087 {offsets = [0, 0], sizes = [8, 96], strides = [1, 1]} : vector<8x128xf32> to vector<8x96xf32>
    %cst_394 = arith.constant 5.000000e-01 : f32
    %1096 = vector.broadcast %cst_394 : f32 to vector<8x96xf32>
    %1097 = arith.mulf %1096, %1095 : vector<8x96xf32>
    %1098 = math.tanh %1097 : vector<8x96xf32>
    %cst_395 = arith.constant 5.000000e-01 : f32
    %1099 = vector.broadcast %cst_395 : f32 to vector<8x96xf32>
    %1100 = arith.mulf %1099, %1098 : vector<8x96xf32>
    %cst_396 = arith.constant 5.000000e-01 : f32
    %1101 = vector.broadcast %cst_396 : f32 to vector<8x96xf32>
    %1102 = arith.addf %1100, %1101 : vector<8x96xf32>
    %1103 = vector.extract_strided_slice %1087 {offsets = [0, 96], sizes = [8, 32], strides = [1, 1]} : vector<8x128xf32> to vector<8x32xf32>
    %1104 = math.tanh %1103 : vector<8x32xf32>
    %1105 = vector.extract_strided_slice %1102 {offsets = [0, 32], sizes = [8, 32], strides = [1, 1]} : vector<8x96xf32> to vector<8x32xf32>
    %1106 = arith.mulf %1105, %1094 : vector<8x32xf32>
    %1107 = vector.extract_strided_slice %1102 {offsets = [0, 0], sizes = [8, 32], strides = [1, 1]} : vector<8x96xf32> to vector<8x32xf32>
    %1108 = arith.mulf %1107, %1104 : vector<8x32xf32>
    %1109 = arith.addf %1106, %1108 : vector<8x32xf32>
    %1110 = vector.extract_strided_slice %1102 {offsets = [0, 64], sizes = [8, 32], strides = [1, 1]} : vector<8x96xf32> to vector<8x32xf32>
    %1111 = math.tanh %1109 : vector<8x32xf32>
    %1112 = arith.mulf %1110, %1111 : vector<8x32xf32>
    %1113 = vector.extract_strided_slice %1080 {offsets = [0, 32], sizes = [8, 32], strides = [1, 1]} : vector<8x64xf32> to vector<8x32xf32>
    %1114 = vector.extract_strided_slice %1093 {offsets = [0, 0], sizes = [8, 96], strides = [1, 1]} : vector<8x128xf32> to vector<8x96xf32>
    %cst_397 = arith.constant 5.000000e-01 : f32
    %1115 = vector.broadcast %cst_397 : f32 to vector<8x96xf32>
    %1116 = arith.mulf %1115, %1114 : vector<8x96xf32>
    %1117 = math.tanh %1116 : vector<8x96xf32>
    %cst_398 = arith.constant 5.000000e-01 : f32
    %1118 = vector.broadcast %cst_398 : f32 to vector<8x96xf32>
    %1119 = arith.mulf %1118, %1117 : vector<8x96xf32>
    %cst_399 = arith.constant 5.000000e-01 : f32
    %1120 = vector.broadcast %cst_399 : f32 to vector<8x96xf32>
    %1121 = arith.addf %1119, %1120 : vector<8x96xf32>
    %1122 = vector.extract_strided_slice %1093 {offsets = [0, 96], sizes = [8, 32], strides = [1, 1]} : vector<8x128xf32> to vector<8x32xf32>
    %1123 = math.tanh %1122 : vector<8x32xf32>
    %1124 = vector.extract_strided_slice %1121 {offsets = [0, 32], sizes = [8, 32], strides = [1, 1]} : vector<8x96xf32> to vector<8x32xf32>
    %1125 = arith.mulf %1124, %1113 : vector<8x32xf32>
    %1126 = vector.extract_strided_slice %1121 {offsets = [0, 0], sizes = [8, 32], strides = [1, 1]} : vector<8x96xf32> to vector<8x32xf32>
    %1127 = arith.mulf %1126, %1123 : vector<8x32xf32>
    %1128 = arith.addf %1125, %1127 : vector<8x32xf32>
    %1129 = vector.extract_strided_slice %1121 {offsets = [0, 64], sizes = [8, 32], strides = [1, 1]} : vector<8x96xf32> to vector<8x32xf32>
    %1130 = math.tanh %1128 : vector<8x32xf32>
    %1131 = arith.mulf %1129, %1130 : vector<8x32xf32>
    %1132 = vector.extract_strided_slice %1079 {offsets = [0, 0], sizes = [8, 32], strides = [1, 1]} : vector<8x64xf32> to vector<8x32xf32>
    %1133 = vector.shape_cast %1073 : vector<8x1xi1> to vector<8x1xi1>
    %1134 = vector.broadcast %1133 : vector<8x1xi1> to vector<8x32xi1>
    %1135 = arith.select %1134, %1112, %1132 : vector<8x32xi1>, vector<8x32xf32>
    %1136 = vector.extract_strided_slice %1079 {offsets = [0, 32], sizes = [8, 32], strides = [1, 1]} : vector<8x64xf32> to vector<8x32xf32>
    %1137 = vector.shape_cast %1078 : vector<8x1xi1> to vector<8x1xi1>
    %1138 = vector.broadcast %1137 : vector<8x1xi1> to vector<8x32xi1>
    %1139 = arith.select %1138, %1131, %1136 : vector<8x32xi1>, vector<8x32xf32>
    %1140 = tpu.concatenate %1135, %1139 in 1 : vector<8x32xf32>, vector<8x32xf32> -> vector<8x64xf32>
    %c0_400 = arith.constant 0 : index
    %c0_401 = arith.constant 0 : index
    %1141 = vector.load %arg23[%c0_400, %c0_401] : memref<8x64xf32, #tpu.memory_space<vmem>>, vector<8x64xf32>
    tpu.vector_store %arg23[%c0_400, %c0_401], %1140 {strides = array<i32>} : memref<8x64xf32, #tpu.memory_space<vmem>>, vector<8x64xf32>,
    %1142 = vector.extract_strided_slice %1080 {offsets = [0, 0], sizes = [8, 32], strides = [1, 1]} : vector<8x64xf32> to vector<8x32xf32>
    %1143 = vector.shape_cast %1073 : vector<8x1xi1> to vector<8x1xi1>
    %1144 = vector.broadcast %1143 : vector<8x1xi1> to vector<8x32xi1>
    %1145 = arith.select %1144, %1109, %1142 : vector<8x32xi1>, vector<8x32xf32>
    %1146 = vector.extract_strided_slice %1080 {offsets = [0, 32], sizes = [8, 32], strides = [1, 1]} : vector<8x64xf32> to vector<8x32xf32>
    %1147 = vector.shape_cast %1078 : vector<8x1xi1> to vector<8x1xi1>
    %1148 = vector.broadcast %1147 : vector<8x1xi1> to vector<8x32xi1>
    %1149 = arith.select %1148, %1128, %1146 : vector<8x32xi1>, vector<8x32xf32>
    %1150 = tpu.concatenate %1145, %1149 in 1 : vector<8x32xf32>, vector<8x32xf32> -> vector<8x64xf32>
    %c0_402 = arith.constant 0 : index
    %c0_403 = arith.constant 0 : index
    %1151 = vector.load %arg24[%c0_402, %c0_403] : memref<8x64xf32, #tpu.memory_space<vmem>>, vector<8x64xf32>
    tpu.vector_store %arg24[%c0_402, %c0_403], %1150 {strides = array<i32>} : memref<8x64xf32, #tpu.memory_space<vmem>>, vector<8x64xf32>,
    %cst_404 = arith.constant 0.000000e+00 : f32
    %1152 = vector.shape_cast %1073 : vector<8x1xi1> to vector<8x1xi1>
    %1153 = vector.broadcast %1152 : vector<8x1xi1> to vector<8x32xi1>
    %1154 = vector.broadcast %cst_404 : f32 to vector<8x32xf32>
    %1155 = arith.select %1153, %1112, %1154 : vector<8x32xi1>, vector<8x32xf32>
    %1156 = arith.index_cast %c2_i32_377 : i32 to index
    %c0_405 = arith.constant 0 : index
    %c0_406 = arith.constant 0 : index
    %1157 = vector.load %arg21[%1156, %c0_405, %c0_406] : memref<3x8x32xf32, #tpu.memory_space<vmem>>, vector<1x8x32xf32>
    %1158 = vector.shape_cast %1157 : vector<1x8x32xf32> to vector<8x32xf32>
    %1159 = vector.shape_cast %1155 : vector<8x32xf32> to vector<1x8x32xf32>
    tpu.vector_store %arg21[%1156, %c0_405, %c0_406], %1159 {strides = array<i32>} : memref<3x8x32xf32, #tpu.memory_space<vmem>>, vector<1x8x32xf32>,
    %cst_407 = arith.constant 0.000000e+00 : f32
    %1160 = vector.shape_cast %1078 : vector<8x1xi1> to vector<8x1xi1>
    %1161 = vector.broadcast %1160 : vector<8x1xi1> to vector<8x32xi1>
    %1162 = vector.broadcast %cst_407 : f32 to vector<8x32xf32>
    %1163 = arith.select %1161, %1131, %1162 : vector<8x32xi1>, vector<8x32xf32>
    %1164 = arith.index_cast %1068 : i32 to index
    %c0_408 = arith.constant 0 : index
    %c0_409 = arith.constant 0 : index
    %1165 = vector.load %arg22[%1164, %c0_408, %c0_409] : memref<3x8x32xf32, #tpu.memory_space<vmem>>, vector<1x8x32xf32>
    %1166 = vector.shape_cast %1165 : vector<1x8x32xf32> to vector<8x32xf32>
    %1167 = vector.shape_cast %1163 : vector<8x32xf32> to vector<1x8x32xf32>
    tpu.vector_store %arg22[%1164, %c0_408, %c0_409], %1167 {strides = array<i32>} : memref<3x8x32xf32, #tpu.memory_space<vmem>>, vector<1x8x32xf32>,
    %c3_i32_410 = arith.constant 3 : i32
    %c0_411 = arith.constant 0 : index
    %c0_412 = arith.constant 0 : index
    %c0_413 = arith.constant 0 : index
    %1168 = vector.load %arg21[%c0_411, %c0_412, %c0_413] : memref<3x8x32xf32, #tpu.memory_space<vmem>>, vector<3x8x32xf32>
    %c0_414 = arith.constant 0 : index
    %c0_415 = arith.constant 0 : index
    %c0_416 = arith.constant 0 : index
    %1169 = vector.load %arg22[%c0_414, %c0_415, %c0_416] : memref<3x8x32xf32, #tpu.memory_space<vmem>>, vector<3x8x32xf32>
    %1170 = tpu.concatenate %1168, %1169 in 2 : vector<3x8x32xf32>, vector<3x8x32xf32> -> vector<3x8x64xf32>
    %1171 = vector.shape_cast %1170 : vector<3x8x64xf32> to vector<24x64xf32>
    %cst_417 = arith.constant dense<0.000000e+00> : vector<24x64xf32>
    %1172 = tpu.matmul %1171, %5, %cst_417 {dimension_numbers = #tpu.dot_dimension_numbers<[1], [0], [0], [1], [0, 0, 1, 1], [], []>} : vector<24x64xf32>, vector<64x64xf32>, vector<24x64xf32> -> vector<24x64xf32>
    %1173 = vector.broadcast %6 : vector<1x64xf32> to vector<24x64xf32>
    %1174 = arith.addf %1172, %1173 : vector<24x64xf32>
    %1175 = math.tanh %1174 : vector<24x64xf32>
    %1176 = vector.shape_cast %1175 : vector<24x64xf32> to vector<3x8x64xf32>
    %1177 = vector.broadcast %7 : vector<1x1x64xf32> to vector<3x8x64xf32>
    %1178 = arith.mulf %1176, %1177 : vector<3x8x64xf32>
    %cst_418 = arith.constant dense<0.000000e+00> : vector<3x8xf32>
    %1179 = vector.multi_reduction <add>, %1178, %cst_418 [2] : vector<3x8x64xf32> to vector<3x8xf32>
    %1180 = vector.shape_cast %1179 : vector<3x8xf32> to vector<3x8x1xf32>
    %c0_419 = arith.constant 0 : index
    %c0_420 = arith.constant 0 : index
    %c0_421 = arith.constant 0 : index
    %1181 = vector.load %arg4[%c0_419, %c0_420, %c0_421] : memref<3x8x1xf32, #tpu.memory_space<vmem>>, vector<1x8x1xf32>
    %1182 = vector.shape_cast %1181 : vector<1x8x1xf32> to vector<8x1xf32>
    %cst_422 = arith.constant dense<0xFF800000> : vector<3x1xf32>
    %1183 = vector.multi_reduction <maximumf>, %1180, %cst_422 [1] : vector<3x8x1xf32> to vector<3x1xf32>
    %1184 = vector.shape_cast %1183 : vector<3x1xf32> to vector<3x1x1xf32>
    %1185 = vector.broadcast %1184 : vector<3x1x1xf32> to vector<3x8x1xf32>
    %1186 = arith.subf %1180, %1185 : vector<3x8x1xf32>
    %1187 = math.exp %1186 : vector<3x8x1xf32>
    %1188 = vector.shape_cast %1182 : vector<8x1xf32> to vector<1x8x1xf32>
    %1189 = vector.broadcast %1188 : vector<1x8x1xf32> to vector<3x8x1xf32>
    %1190 = arith.mulf %1187, %1189 : vector<3x8x1xf32>
    %cst_423 = arith.constant dense<0.000000e+00> : vector<3x1xf32>
    %1191 = vector.multi_reduction <add>, %1190, %cst_423 [1] : vector<3x8x1xf32> to vector<3x1xf32>
    %1192 = vector.shape_cast %1191 : vector<3x1xf32> to vector<3x1x1xf32>
    %1193 = vector.broadcast %1192 : vector<3x1x1xf32> to vector<3x8x1xf32>
    %1194 = arith.divf %1190, %1193 : vector<3x8x1xf32>
    %cst_424 = arith.constant 9.99999993E-9 : f32
    %1195 = vector.broadcast %cst_424 : f32 to vector<3x8x1xf32>
    %1196 = arith.addf %1194, %1195 : vector<3x8x1xf32>
    %1197 = vector.broadcast %1196 : vector<3x8x1xf32> to vector<3x8x64xf32>
    %1198 = arith.mulf %1197, %1170 : vector<3x8x64xf32>
    %cst_425 = arith.constant dense<0.000000e+00> : vector<8x64xf32>
    %1199 = vector.multi_reduction <add>, %1198, %cst_425 [0] : vector<3x8x64xf32> to vector<8x64xf32>
    %cst_426 = arith.constant 0.000000e+00 : f32
    %1200 = vector.broadcast %cst_426 : f32 to vector<8x64xf32>
    %1201 = tpu.concatenate %1199, %1200 in 1 : vector<8x64xf32>, vector<8x64xf32> -> vector<8x128xf32>
    %c0_427 = arith.constant 0 : index
    %c0_428 = arith.constant 0 : index
    %1202 = vector.load %arg14[%c0_427, %c0_428] : memref<8x128xf32, #tpu.memory_space<vmem>>, vector<8x128xf32>
    tpu.vector_store %arg14[%c0_427, %c0_428], %1201 {strides = array<i32>} : memref<8x128xf32, #tpu.memory_space<vmem>>, vector<8x128xf32>,
    return
  }
  func.func @transform_0(%arg0: i32) -> (i32, i32, i32) {
    %c0_i32 = arith.constant 0 : i32
    %c0_i32_0 = arith.constant 0 : i32
    %c0_i32_1 = arith.constant 0 : i32
    %c0_i32_2 = arith.constant 0 : i32
    return %c0_i32, %c0_i32_0, %c0_i32_1 : i32, i32, i32
  }
  func.func @transform_1(%arg0: i32) -> (i32, i32, i32) {
    %c0_i32 = arith.constant 0 : i32
    %c0_i32_0 = arith.constant 0 : i32
    %c0_i32_1 = arith.constant 0 : i32
    %c0_i32_2 = arith.constant 0 : i32
    return %c0_i32, %c0_i32_0, %c0_i32_1 : i32, i32, i32
  }
  func.func @transform_2(%arg0: i32) -> (i32, i32) {
    %c0_i32 = arith.constant 0 : i32
    %c0_i32_0 = arith.constant 0 : i32
    %c0_i32_1 = arith.constant 0 : i32
    return %c0_i32, %c0_i32_0 : i32, i32
  }
  func.func @transform_3(%arg0: i32) -> (i32, i32, i32) {
    %c0_i32 = arith.constant 0 : i32
    %c0_i32_0 = arith.constant 0 : i32
    %c0_i32_1 = arith.constant 0 : i32
    %c0_i32_2 = arith.constant 0 : i32
    return %c0_i32, %c0_i32_0, %c0_i32_1 : i32, i32, i32
  }
  func.func @transform_4(%arg0: i32) -> (i32, i32) {
    %c0_i32 = arith.constant 0 : i32
    %c0_i32_0 = arith.constant 0 : i32
    %c0_i32_1 = arith.constant 0 : i32
    return %c0_i32, %c0_i32_0 : i32, i32
  }
  func.func @transform_5(%arg0: i32) -> (i32, i32) {
    %c0_i32 = arith.constant 0 : i32
    %c0_i32_0 = arith.constant 0 : i32
    %c0_i32_1 = arith.constant 0 : i32
    return %c0_i32, %c0_i32_0 : i32, i32
  }
  func.func @transform_6(%arg0: i32) -> (i32, i32) {
    %c0_i32 = arith.constant 0 : i32
    %c0_i32_0 = arith.constant 0 : i32
    %c0_i32_1 = arith.constant 0 : i32
    return %c0_i32, %c0_i32_0 : i32, i32
  }
  func.func @transform_7(%arg0: i32) -> (i32, i32) {
    %c0_i32 = arith.constant 0 : i32
    %c0_i32_0 = arith.constant 0 : i32
    %c0_i32_1 = arith.constant 0 : i32
    return %c0_i32, %c0_i32_0 : i32, i32
  }
  func.func @transform_8(%arg0: i32) -> (i32, i32) {
    %c0_i32 = arith.constant 0 : i32
    %c0_i32_0 = arith.constant 0 : i32
    %c0_i32_1 = arith.constant 0 : i32
    return %c0_i32, %c0_i32_0 : i32, i32
  }
  func.func @transform_9(%arg0: i32) -> (i32, i32) {
    %c0_i32 = arith.constant 0 : i32
    %c0_i32_0 = arith.constant 0 : i32
    %c0_i32_1 = arith.constant 0 : i32
    return %c0_i32, %c0_i32_0 : i32, i32
  }
  func.func @transform_10(%arg0: i32) -> (i32, i32) {
    %c0_i32 = arith.constant 0 : i32
    %c0_i32_0 = arith.constant 0 : i32
    %c0_i32_1 = arith.constant 0 : i32
    return %c0_i32, %c0_i32_0 : i32, i32
  }
  func.func @transform_11(%arg0: i32) -> (i32, i32, i32) {
    %c0_i32 = arith.constant 0 : i32
    %c0_i32_0 = arith.constant 0 : i32
    %c0_i32_1 = arith.constant 0 : i32
    %c0_i32_2 = arith.constant 0 : i32
    return %c0_i32, %c0_i32_0, %c0_i32_1 : i32, i32, i32
  }
  func.func @transform_12(%arg0: i32) -> (i32, i32) {
    %c0_i32 = arith.constant 0 : i32
    %c0_i32_0 = arith.constant 0 : i32
    %c0_i32_1 = arith.constant 0 : i32
    return %c0_i32, %c0_i32_0 : i32, i32
  }
  func.func @transform_13(%arg0: i32) -> (i32, i32) {
    %c0_i32 = arith.constant 0 : i32
    %c0_i32_0 = arith.constant 0 : i32
    %c0_i32_1 = arith.constant 0 : i32
    return %c0_i32, %c0_i32_0 : i32, i32
  }
}

</mosaic_0001>

<bundles_post_ra>
// kernel: tpu_custom_call.1
= control target key start
LH: loop header
LB: loop body
LE: loop exit
PB: predicated region body
PF: predicated region fallthrough
CT: control target
= control target key end

     0   :  { %18 = vsyncpa [#allocation13], 0  ;;  %s5341_s0 = inlined_call_operand.vmem [shape: f32[8,8,16], index: 0, kind: input, shape index: {}]   ;;  %s5342_s1 = inlined_call_operand.vmem [shape: f32[8,8,1], index: 1, kind: input, shape index: {}]   ;;  %s5343_s2 = inlined_call_operand.vmem [shape: f32[24,8], index: 2, kind: input, shape index: {}]   ;;  %s5344_s3 = inlined_call_operand.vmem [shape: f32[3,8,1], index: 3, kind: input, shape index: {}]   ;;  %s5345_s4 = inlined_call_operand.vmem [shape: f32[16,256], index: 4, kind: input, shape index: {}]   ;;  %s5346_s5 = inlined_call_operand.vmem [shape: f32[64,256], index: 5, kind: input, shape index: {}]   ;;  %s5347_s6 = inlined_call_operand.hbm [shape: f32[1,256], index: 6, kind: input, shape index: {}]   ;;  %s5348_s7 = inlined_call_operand.vmem [shape: f32[1,64], index: 7, kind: input, shape index: {}]   ;;  %s5349_s8 = inlined_call_operand.hbm [shape: f32[1,64], index: 8, kind: input, shape index: {}]   ;;  %s5350_s9 = inlined_call_operand.hbm [shape: f32[64,64], index: 9, kind: input, shape index: {}]   ;;  %s5351_s10 = inlined_call_operand.vmem [shape: f32[1,64], index: 10, kind: input, shape index: {}]   ;;  %s5352_s11 = inlined_call_operand.vmem [shape: f32[1,1,64], index: 11, kind: input, shape index: {}]   ;;  %s5353_s12 = inlined_call_operand.vmem [shape: f32[64,16], index: 12, kind: input, shape index: {}]   ;;  %s5354_s13 = inlined_call_operand.hbm [shape: f32[8,128], index: 13, kind: output, shape index: {}]  }
   0x1   :  { %19 = vsyncpa [#allocation16], 0 }
   0x2   :  { %20 = vsyncpa [#allocation14], 0  ;;  %s3998_s25 = smov [#allocation15]   ;;  %s3999_s27 = smov [#allocation12]  }
   0x3   :  { %s51_s26 = sshll.u32 %s3998_s25, 4  ;;  %s39_s28 = sshll.u32 %s3999_s27, 4  ;;  %s52_s26 = int_to_ptr.vmem [resolvable:$true] %s51_s26  ;;  %s40_s28 = int_to_ptr.vmem [resolvable:$true] %s39_s28 }
   0x4   :  { %s3904_s14 = scalar_lea.hbm %s5349_s8, 16 }
   0x5   :  { %p3905_p0 = scmp.ne.s32.totalorder %s5349_s8, %s3904_s14  ;;  %p3908_p1 = scmp.lt.u32.totalorder %s3904_s14, %s5349_s8 }
   0x7   :  { %p3910_p2 = pnand %p3908_p1, %p3905_p0 }
   0x9   :  { %3913 = shalt.err (!%p3910_p2)
}
   0xa   :  { %s3914_s19 = scalar_lea.vmem %s52_s26, 16  ;;  %s3918_s20 = scalar_lea.vmem %s52_s26, 32 }
   0xb   :  { %p3915_p3 = scmp.ne.s32.totalorder %s52_s26, %s3914_s19  ;;  %p3919_p4 = scmp.lt.s32.totalorder %s52_s26, %s52_s26 }
   0xc   :  { %p3920_p5 = scmp.lt.s32.totalorder %s3918_s20, %s3914_s19 }
   0xe   :  { %p3921_p6 = por %p3920_p5, %p3919_p4 }
  0x10   :  { %p3922_p7 = pnand %p3921_p6, %p3915_p3 }
  0x12   :  { %3925 = shalt.err (!%p3922_p7)
}
  0x13   :  { %54 = dma.hbm_to_vmem [thread:$0]  %s5349_s8, 16, %s52_s26, [#allocation16]  }
  0x14   :  { %s3926_s25 = scalar_lea.hbm %s5347_s6, 32 }
  0x15   :  { %p3927_p8 = scmp.ne.s32.totalorder %s5347_s6, %s3926_s25  ;;  %p3930_p9 = scmp.lt.u32.totalorder %s3926_s25, %s5347_s6 }
  0x17   :  { %p3932_p10 = pnand %p3930_p9, %p3927_p8 }
  0x19   :  { %3935 = shalt.err (!%p3932_p10)
}
  0x1a   :  { %s3936_s15 = scalar_lea.vmem %s40_s28, 32  ;;  %p3941_p12 = scmp.lt.s32.totalorder %s40_s28, %s40_s28 }
  0x1b   :  { %p3937_p11 = scmp.ne.s32.totalorder %s40_s28, %s3936_s15  ;;  %p3942_p13 = scmp.lt.s32.totalorder %s3936_s15, %s3936_s15 }
  0x1d   :  { %p3943_p0 = por %p3942_p13, %p3941_p12 }
  0x1f   :  { %p3944_p1 = pnand %p3943_p0, %p3937_p11 }
  0x21   :  { %3947 = shalt.err (!%p3944_p1)
}
  0x22   :  { %42 = dma.hbm_to_vmem [thread:$0]  %s5347_s6, 32, %s40_s28, [#allocation13]  }
  0x23   :  { %s4000_s16 = smov [#allocation17]   ;;  %s3948_s20 = scalar_lea.hbm %s5350_s9, 1024 }
  0x24   :  { %s60_s17 = sshll.u32 %s4000_s16, 4  ;;  %p3949_p2 = scmp.ne.s32.totalorder %s5350_s9, %s3948_s20  ;;  %s61_s17 = int_to_ptr.vmem [resolvable:$true] %s60_s17 }
  0x25   :  { %p3952_p3 = scmp.lt.u32.totalorder %s3948_s20, %s5350_s9 }
  0x27   :  { %p3954_p4 = pnand %p3952_p3, %p3949_p2 }
  0x29   :  { %3957 = shalt.err (!%p3954_p4)
}
  0x2a   :  { %s3958_s25 = scalar_lea.vmem %s61_s17, 1024  ;;  %p3963_p6 = scmp.lt.s32.totalorder %s61_s17, %s61_s17 }
  0x2b   :  { %p3959_p5 = scmp.ne.s32.totalorder %s61_s17, %s3958_s25  ;;  %p3964_p7 = scmp.lt.s32.totalorder %s3958_s25, %s3958_s25 }
  0x2d   :  { %p3965_p8 = por %p3964_p7, %p3963_p6 }
  0x2f   :  { %p3966_p9 = pnand %p3965_p8, %p3959_p5 }
  0x31   :  { %3969 = shalt.err (!%p3966_p9)
}
  0x32   :  { %s4001_s6 = smov 128   ;;  %s4002_s28 = smov 8  }
  0x33   :  { %66 = dma.hbm_to_vmem [thread:$0]  %s5350_s9, 1024, %s61_s17, [#allocation16], %s4001_s6, %s4001_s6, %s4002_s28  }
  0x34   :  { %3992 = dma.done.wait [#allocation13], 32  }
  0x35   :  { %3993 = vsyncadd [#allocation13], 4294967264 }
  0x36   :  { %3994 = dma.done.wait [#allocation16], 1040  }
  0x37   :  { %3995 = vsyncadd [#allocation16], 4294966256  ;;  %v4003_v0 = vmov 0.0   ;;  %v83_v1 = vld [vmem:[%s5345_s4 + $0x8] sm:$0xff]  ;;  %v85_v2 = vld [vmem:[%s5345_s4 + $0x18] sm:$0xff]  ;;  %vm5355_vm0 = vcmask 130048   ;;  %v124_v40 = vlaneseq }
  0x38   :  { %247 = vmatprep.mubr.f32.mxu1 %v4003_v0  ;;  %223 = vmatprep.mubr.f32.mxu0 %v4003_v0  ;;  %v82_v3 = vld [vmem:[%s5345_s4] sm:$0xff]  ;;  %v4128_v4 = vpack.c.bf16 %v85_v2, %v83_v1  ;;  %v84_v5 = vld [vmem:[%s5345_s4 + $0x10] sm:$0xff]  ;;  %v87_v6 = vld [vmem:[%s5346_s5 + $0x8] sm:$0xff]  ;;  %vm5356_vm1 = vcmask 523264   ;;  %v5357_v63 = vmov 0   ;;  %s4006_s23 = smov 64  }
  0x39   :  { %v4136_v7 = vpack.c.bf16 %v84_v5, %v82_v3  ;;  %v89_v8 = vld [vmem:[%s5346_s5 + $0x18] sm:$0xff]  ;;  %v86_v9 = vld [vmem:[%s5346_s5] sm:$0xff]  ;;  %v88_v10 = vld [vmem:[%s5346_s5 + $0x10] sm:$0xff]  ;;  %v125_v44 = vshrl.u32 %v124_v40, 7  ;;  %3700 = vset.pattern.permute.xlu1 %v5357_v63  ;;  %3701 = vset.pattern.permute.xlu0 %v5357_v63  ;;  %s4007_s4 = smov 96   ;;  %vm463_vm6 = vcmask 261120  }
  0x3a   :  { %3681 = vmatprep.subr.bf16.mxu1 %v4128_v4  ;;  %v4148_v11 = vpack.c.bf16 %v89_v8, %v87_v6  ;;  %v91_v12 = vld [vmem:[%s5346_s5 + $0x28] sm:$0xff]  ;;  %v93_v13 = vld [vmem:[%s5346_s5 + $0x38] sm:$0xff]  ;;  %3458 = vmatprep.subr.bf16.mxu0 %v4128_v4  ;;  %v119_v14 = vld [vmem:[%s5341_s0 + $0x20] sm:$0xff]  ;;  %v4161_v15 = vpack.c.bf16 %v88_v10, %v86_v9 }
  0x3b   :  { %3682 = vmatpush1.bf16.msra.mxu1 %v4136_v7  ;;  %3460 = vmatpush1.bf16.msra.mxu0 %v4136_v7  ;;  %v4165_v16 = vpack.c.bf16 %v93_v13, %v91_v12  ;;  %v90_v17 = vld [vmem:[%s5346_s5 + $0x20] sm:$0xff]  ;;  %v92_v18 = vld [vmem:[%s5346_s5 + $0x30] sm:$0xff]  ;;  %v95_v19 = vld [vmem:[%s5346_s5 + $0x48] sm:$0xff]  ;;  %v126_v48 = vsub.s32 0, %v125_v44  ;;  %v130_v52 = vsub.s32 1, %v125_v44 }
  0x3c   :  { %3462 = vmatprep.subr.bf16.mxu1 %v4148_v11  ;;  %3494 = vmatprep.subr.bf16.mxu0 %v4148_v11  ;;  %v97_v20 = vld [vmem:[%s5346_s5 + $0x58] sm:$0xff]  ;;  %v115_v21 = vld [vmem:[%s5341_s0] sm:$0xff]  ;;  %v120_v22 = vld [vmem:[%s5341_s0 + $0x28] sm:$0xff]  ;;  %v4189_v23 = vpack.c.bf16 %v92_v18, %v90_v17 }
  0x3d   :  { %v3284_v24 = vld [vmem:[%s5348_s7] ss:$0 sm:$0xff]  ;;  %v3285_v25 = vld [vmem:[#allocation15] ss:$0 sm:$0xff]  ;;  %v4195_v26 = vpack.c.bf16 %v97_v20, %v95_v19  ;;  %v99_v29 = vld [vmem:[%s5346_s5 + $0x68] sm:$0xff] }
  0x3e   :  { %3280 = vmatmul.mubr.msk.f32.vlgmr.msra.gmra.mrb[0].mxu1 %vm5355_vm0, %v119_v14  ;;  %v94_v27 = vld [vmem:[%s5346_s5 + $0x40] sm:$0xff]  ;;  %v96_v28 = vld [vmem:[%s5346_s5 + $0x50] sm:$0xff]  ;;  %3276 = vmatmul.mubr.msk.f32.vlgmr.msra.gmra.mrb[0].mxu0 %vm5355_vm0, %v115_v21  ;;  %295 = vst.msk [vmem:[#allocation5] sm:$0xff] %vm5356_vm1, %v3284_v24  ;;  %2506 = vst.msk [vmem:[#allocation10] sm:$0xff] %vm5356_vm1, %v3284_v24 }
  0x3f   :  { %3464 = vmatpush1.bf16.msra.mxu1 %v4161_v15  ;;  %253 = vmatprep.mubr.f32.mxu1 %v4003_v0  ;;  %302 = vst.msk [vmem:[#allocation6] sm:$0xff] %vm5356_vm1, %v3285_v25  ;;  %2507 = vst.msk [vmem:[#allocation11] sm:$0xff] %vm5356_vm1, %v3285_v25  ;;  %v101_v30 = vld [vmem:[%s5346_s5 + $0x78] sm:$0xff]  ;;  %v121_v31 = vld [vmem:[%s5341_s0 + $0x30] sm:$0xff]  ;;  %v4223_v32 = vpack.c.bf16 %v96_v28, %v94_v27 }
  0x40   :  { %3466 = vmatprep.subr.bf16.mxu1 %v4165_v16  ;;  %229 = vmatprep.mubr.f32.mxu0 %v4003_v0  ;;  %v4226_v33 = vpack.c.bf16 %v101_v30, %v99_v29  ;;  %v98_v34 = vld [vmem:[%s5346_s5 + $0x60] sm:$0xff]  ;;  %v100_v35 = vld [vmem:[%s5346_s5 + $0x70] sm:$0xff]  ;;  %v122_v36 = vld [vmem:[%s5341_s0 + $0x38] sm:$0xff]  ;;  %s4004_s5 = smov 32  }
  0x41   :  { %3496 = vmatpush1.bf16.msra.mxu0 %v4161_v15  ;;  %v4242_v37 = vpack.c.bf16 %v100_v35, %v98_v34  ;;  %v102_v49 = vld [vmem:[#allocation12] sm:$0x3]  ;;  %v303_v10 = vld [vmem:[%s5342_s1] sm:$0xff]  ;;  %v3286_v18 = vld [vmem:[%s5342_s1 + $0x38] sm:$0xff] }
  0x42   :  { %3281 = vmatmul.mubr.msk.f32.gmra.mrb[2].mxu1 %vm5355_vm0, %v120_v22  ;;  %3498 = vmatprep.subr.bf16.mxu0 %v4165_v16  ;;  %v4284_v53 = vrot.slane %v102_v49, %v126_v48  ;;  %v4289_v57 = vrot.slane %v102_v49, %v130_v52  ;;  %vm304_vm2 = vcmp.gt.f32.partialorder %v303_v10, 0.5  ;;  %vm307_vm3 = vcmp.gt.f32.partialorder %v3286_v18, 0.5  ;;  %v116_v44 = vld [vmem:[%s5341_s0 + $0x8] sm:$0xff] }
  0x43   :  { %3468 = vmatpush1.bf16.msra.mxu1 %v4189_v23  ;;  %259 = vmatprep.mubr.f32.mxu1 %v4003_v0  ;;  %v437_v21 = vsel %vm304_vm2, 1, %v5357_v63  ;;  %v446_v24 = vsel %vm307_vm3, 1, %v5357_v63 }
  0x44   :  { %3470 = vmatprep.subr.bf16.mxu1 %v4195_v26  ;;  %3277 = vmatmul.mubr.msk.f32.gmra.mrb[2].mxu0 %vm5355_vm0, %v116_v44 }
  0x45   :  { %3500 = vmatpush1.bf16.msra.mxu0 %v4189_v23  ;;  %v4254_v39 = vld [vmem:[#allocation5] sm:$0xff]  ;;  %235 = vmatprep.mubr.f32.mxu0 %v4003_v0 }
  0x46   :  { %3282 = vmatmul.mubr.msk.f32.gmra.mrb[4].mxu1 %vm5355_vm0, %v121_v31  ;;  %3502 = vmatprep.subr.bf16.mxu0 %v4195_v26  ;;  %v4244_v38 = vld [vmem:[#allocation6] sm:$0xff] }
  0x47   :  { %3472 = vmatpush1.bf16.msra.mxu1 %v4223_v32  ;;  %265 = vmatprep.mubr.f32.mxu1 %v4003_v0 }
  0x48   :  { %3474 = vmatprep.subr.bf16.mxu1 %v4226_v33  ;;  %395 = vrot.lane.b32.xlu1 %v4244_v38, %s4004_s5 }
  0x49   :  { %3504 = vmatpush1.bf16.msra.mxu0 %v4223_v32 }
  0x4a   :  { %3283 = vmatmul.mubr.msk.f32.gmra.mrb[6].mxu1 %vm5355_vm0, %v122_v36  ;;  %3506 = vmatprep.subr.bf16.mxu0 %v4226_v33 }
  0x4b   :  { %3476 = vmatpush1.bf16.msra.mxu1 %v4242_v37  ;;  %377 = vmatprep.mubr.f32.mxu1 %v4003_v0 }
  0x4c   :  { %3478 = vmatprep.subr.bf16.mxu1 %v4148_v11 }
  0x4d   :  { %3508 = vmatpush1.bf16.msra.mxu0 %v4242_v37 }
  0x4e   :  { %3287 = vmatmul.mubr.msk.f32.vlgmr.msra.gmra.mrb[8].mxu1 %vm5356_vm1, %v4254_v39  ;;  %3526 = vmatprep.subr.bf16.mxu0 %v4148_v11 }
  0x4f   :  { %3480 = vmatpush1.bf16.msra.mxu1 %v4161_v15  ;;  %562 = vmatprep.mubr.f32.mxu1 %v4003_v0 }
  0x50   :  { %3482 = vmatprep.subr.bf16.mxu1 %v4165_v16 }
  0x53   :  { %3484 = vmatpush1.bf16.msra.mxu1 %v4189_v23 }
  0x54   :  { %3486 = vmatprep.subr.bf16.mxu1 %v4195_v26 }
  0x57   :  { %3488 = vmatpush1.bf16.msra.mxu1 %v4223_v32 }
  0x58   :  { %3490 = vmatprep.subr.bf16.mxu1 %v4226_v33 }
  0x5b   :  { %3492 = vmatpush1.bf16.msra.mxu1 %v4242_v37 }
  0x5c   :  { %3510 = vmatprep.subr.bf16.mxu1 %v4148_v11 }
  0xba   :  { %v396_v25 = vpop.permute.xlu1 %395 }
 0x111   :  { %v4270_v41 = vpop.f32.mrb[0].mxu1  ;;  %v225_v43 = vpop.f32.mrb[0].mxu0 }
 0x112   :  { %v4272_v42 = vpop.f32.mrb[1].mxu1  ;;  %v4274_v45 = vpop.f32.mrb[1].mxu0  ;;  %v226_v55 = vadd.f32 %v225_v43, %v4284_v53 }
 0x115   :  { %v4276_v46 = vpop.f32.mrb[2].mxu1 }
 0x116   :  { %v4278_v47 = vpop.f32.mrb[3].mxu1 }
 0x119   :  { %v4280_v50 = vpop.f32.mrb[4].mxu1 }
 0x11a   :  { %v4282_v51 = vpop.f32.mrb[5].mxu1 }
 0x11b   :  { %v264_v10 = vadd.f32 %v4282_v51, %v4289_v57 }
 0x11d   :  { %v4286_v54 = vpop.f32.mrb[6].mxu1 }
 0x11e   :  { %v269_v56 = vpop.f32.mrb[7].mxu1 }
 0x11f   :  { %v270_v58 = vadd.f32 %v269_v56, %v4289_v57 }
 0x121   :  { %v379_v59 = vpop.f32.mrb[8].mxu1 }
 0x122   :  { %v385_v60 = vadd.f32 %v379_v59, %v226_v55  ;;  %v381_v61 = vpop.f32.mrb[9].mxu1 }
 0x123   :  { %v388_v62 = vadd.f32 %v381_v61, %v270_v58 }
 0x124   :  { %3702 = vtanh.f32 %v385_v60  ;;  %v389_v3 = vmul.f32 0.5, %v385_v60 }
 0x125   :  { %3704 = vtanh.f32 %v388_v62  ;;  %v415_v5 = vmul.f32 0.5, %v388_v62 }
 0x126   :  { %3706 = vtanh.f32 %v389_v3 }
 0x127   :  { %3708 = vtanh.f32 %v415_v5 }
 0x12e   :  { %v3703_v1 = vpop.eup %3702 }
 0x12f   :  { %400 = vrot.lane.b32.xlu0 %v3703_v1, %s4004_s5  ;;  %v3705_v2 = vpop.eup %3704 }
 0x130   :  { %v3707_v6 = vpop.eup %3706 }
 0x131   :  { %v391_v8 = vmul.f32 0.5, %v3707_v6  ;;  %v3709_v9 = vpop.eup %3708 }
 0x132   :  { %v417_v13 = vmul.f32 0.5, %v3709_v9 }
 0x133   :  { %422 = vrot.lane.b32.xlu0 %v3705_v2, %s4004_s5  ;;  %v392_v12 = vadd.f32 0.5, %v391_v8 }
 0x134   :  { %v418_v19 = vadd.f32 0.5, %v417_v13 }
 0x135   :  { %v398_v27 = vmul.f32 %v396_v25, %v392_v12 }
 0x136   :  { %v420_v30 = vmul.f32 %v418_v19, %v4244_v38 }
 0x1a1   :  { %v401_v14 = vpop.permute.xlu0 %400 }
 0x1a2   :  { %v403_v17 = vmul.f32 %v401_v14, %v392_v12 }
 0x1a4   :  { %405 = vrot.lane.b32.xlu1 %v403_v17, %s4004_s5 }
 0x1a5   :  { %v423_v20 = vpop.permute.xlu0 %422 }
 0x1a6   :  { %v425_v22 = vmul.f32 %v423_v20, %v418_v19 }
 0x1a8   :  { %427 = vrot.lane.b32.xlu0 %v425_v22, %s4004_s5  ;;  %439 = vperm.xlu1 %3700, %v437_v21  }
 0x1ac   :  { %448 = vperm.xlu0 %3701, %v446_v24  }
 0x1b0   :  { %442 = vrot.lane.b32.xlu0 %v4254_v39, %s4006_s23 }
 0x216   :  { %v406_v28 = vpop.permute.xlu1 %405 }
 0x217   :  { %v408_v29 = vadd.f32 %v406_v28, %v398_v27  ;;  %v3288_v28 = vld [vmem:[%s5342_s1 + $0x8] sm:$0xff] }
 0x218   :  { %vm489_vm7 = vcmp.gt.f32.partialorder %v3288_v28, 0.5 }
 0x219   :  { %3710 = vtanh.f32 %v408_v29 }
 0x21a   :  { %v428_v31 = vpop.permute.xlu0 %427 }
 0x21b   :  { %v430_v34 = vadd.f32 %v428_v31, %v420_v30  ;;  %v3289_v30 = vld [vmem:[%s5342_s1 + $0x30] sm:$0xff] }
 0x21c   :  { %vm492_vm8 = vcmp.gt.f32.partialorder %v3289_v30, 0.5 }
 0x21d   :  { %3712 = vtanh.f32 %v430_v34 }
 0x223   :  { %v3711_v35 = vpop.eup %3710 }
 0x224   :  { %411 = vrot.lane.b32.xlu1 %v3711_v35, %s4004_s5 }
 0x227   :  { %v3713_v36 = vpop.eup %3712  ;;  %v4313_v40 = vpop.permute.xlu1 %439 }
 0x228   :  { %433 = vrot.lane.b32.xlu1 %v3713_v36, %s4004_s5  ;;  %vm441_vm4 = vcmp.eq.s32.totalorder %v4313_v40, 1 }
 0x229   :  { %v466_v58 = vsel %vm441_vm4, %v408_v29, %v396_v25 }
 0x22b   :  { %v4315_v43 = vpop.permute.xlu0 %448 }
 0x22c   :  { %451 = vrot.lane.b32.xlu1 %v4254_v39, %s4004_s5  ;;  %vm450_vm5 = vcmp.eq.s32.totalorder %v4315_v43, 1 }
 0x22d   :  { %v467_v62 = vsel %vm450_vm5, %v430_v34, %v4244_v38  ;;  %v231_v38 = vpop.f32.mrb[2].mxu0 }
 0x22e   :  { %v4359_v8 = vpop.f32.mrb[3].mxu0  ;;  %v232_v9 = vadd.f32 %v231_v38, %v4284_v53 }
 0x22f   :  { %v443_v49 = vpop.permute.xlu0 %442 }
 0x296   :  { %v412_v48 = vpop.permute.xlu1 %411 }
 0x297   :  { %v4322_v52 = vmul.f32 %v412_v48, %v392_v12  ;;  %v4379_v48 = vsel %vm489_vm7, 1, %v5357_v63 }
 0x299   :  { %v445_v39 = vsel %vm441_vm4, %v4322_v52, %v443_v49  ;;  %v4382_v49 = vsel %vm492_vm8, 1, %v5357_v63 }
 0x29a   :  { %456 = vrot.lane.b32.xlu0 %v445_v39, %s4006_s23  ;;  %v434_v55 = vpop.permute.xlu1 %433 }
 0x29b   :  { %v4329_v56 = vmul.f32 %v434_v55, %v418_v19 }
 0x29e   :  { %469 = vrot.lane.b32.xlu0 %v466_v58, %s4007_s4  ;;  %v452_v59 = vpop.permute.xlu1 %451 }
 0x29f   :  { %v454_v60 = vsel %vm450_vm5, %v4329_v56, %v452_v59 }
 0x2a0   :  { %460 = vrot.lane.b32.xlu1 %v454_v60, %s4007_s4 }
 0x30c   :  { %v457_v61 = vpop.permute.xlu0 %456 }
 0x310   :  { %v470_v1 = vpop.permute.xlu0 %469 }
 0x311   :  { %v472_v2 = vsel %vm463_vm6, %v470_v1, %v467_v62 }
 0x312   :  { %473 = vst.msk [vmem:[#allocation6] sm:$0xff] %vm5356_vm1, %v472_v2  ;;  %v461_v3 = vpop.permute.xlu1 %460 }
 0x313   :  { %v464_v5 = vsel %vm463_vm6, %v457_v61, %v461_v3  ;;  %v117_v3 = vld [vmem:[%s5341_s0 + $0x10] sm:$0xff] }
 0x314   :  { %465 = vst.msk [vmem:[#allocation5] sm:$0xff] %vm5356_vm1, %v464_v5  ;;  %3278 = vmatmul.mubr.msk.f32.gmra.mrb[4].mxu0 %vm5355_vm0, %v117_v3 }
 0x315   :  { %241 = vmatprep.mubr.f32.mxu0 %v4003_v0 }
 0x319   :  { %v4366_v20 = vld [vmem:[#allocation6] sm:$0xff] }
 0x31b   :  { %v4346_v6 = vld [vmem:[#allocation5] sm:$0xff] }
 0x31c   :  { %3290 = vmatmul.mubr.msk.f32.vlgmr.msra.gmra.mrb[10].mxu1 %vm5356_vm1, %v4346_v6 }
 0x31d   :  { %3512 = vmatpush1.bf16.msra.mxu1 %v4161_v15  ;;  %934 = vmatprep.mubr.f32.mxu1 %v4003_v0 }
 0x31e   :  { %3514 = vmatprep.subr.bf16.mxu1 %v4165_v16 }
 0x321   :  { %3516 = vmatpush1.bf16.msra.mxu1 %v4189_v23 }
 0x322   :  { %3518 = vmatprep.subr.bf16.mxu1 %v4195_v26 }
 0x325   :  { %3520 = vmatpush1.bf16.msra.mxu1 %v4223_v32 }
 0x326   :  { %3522 = vmatprep.subr.bf16.mxu1 %v4226_v33 }
 0x329   :  { %3524 = vmatpush1.bf16.msra.mxu1 %v4242_v37 }
 0x32a   :  { %3542 = vmatprep.subr.bf16.mxu1 %v4148_v11 }
 0x3ef   :  { %v564_v12 = vpop.f32.mrb[10].mxu1 }
 0x3f0   :  { %v571_v13 = vadd.f32 %v564_v12, %v232_v9  ;;  %v566_v14 = vpop.f32.mrb[11].mxu1  ;;  %v118_v9 = vld [vmem:[%s5341_s0 + $0x18] sm:$0xff] }
 0x3f1   :  { %v574_v17 = vadd.f32 %v566_v14, %v264_v10  ;;  %3279 = vmatmul.mubr.msk.f32.gmra.mrb[6].mxu0 %vm5355_vm0, %v118_v9 }
 0x3f2   :  { %3714 = vtanh.f32 %v571_v13  ;;  %v575_v21 = vmul.f32 0.5, %v571_v13  ;;  %748 = vmatprep.mubr.f32.mxu0 %v4003_v0 }
 0x3f3   :  { %3716 = vtanh.f32 %v574_v17  ;;  %v601_v22 = vmul.f32 0.5, %v574_v17 }
 0x3f4   :  { %3718 = vtanh.f32 %v575_v21 }
 0x3f5   :  { %3720 = vtanh.f32 %v601_v22 }
 0x3fc   :  { %v3715_v18 = vpop.eup %3714 }
 0x3fd   :  { %v3717_v19 = vpop.eup %3716  ;;  %586 = vrot.lane.b32.xlu1 %v3715_v18, %s4004_s5 }
 0x3fe   :  { %608 = vrot.lane.b32.xlu0 %v3717_v19, %s4004_s5  ;;  %v3719_v51 = vpop.eup %3718 }
 0x3ff   :  { %v3721_v24 = vpop.eup %3720  ;;  %v577_v25 = vmul.f32 0.5, %v3719_v51 }
 0x400   :  { %v603_v27 = vmul.f32 0.5, %v3721_v24 }
 0x401   :  { %581 = vrot.lane.b32.xlu1 %v4366_v20, %s4004_s5  ;;  %v578_v29 = vadd.f32 0.5, %v577_v25 }
 0x402   :  { %v604_v34 = vadd.f32 0.5, %v603_v27 }
 0x404   :  { %v606_v59 = vmul.f32 %v604_v34, %v4366_v20 }
 0x46f   :  { %v587_v31 = vpop.permute.xlu1 %586 }
 0x470   :  { %v589_v35 = vmul.f32 %v587_v31, %v578_v29  ;;  %v609_v36 = vpop.permute.xlu0 %608 }
 0x471   :  { %v611_v44 = vmul.f32 %v609_v36, %v604_v34  ;;  %v258_v36 = vadd.f32 %v4278_v47, %v4289_v57 }
 0x472   :  { %591 = vrot.lane.b32.xlu0 %v589_v35, %s4004_s5 }
 0x473   :  { %613 = vrot.lane.b32.xlu1 %v611_v44, %s4004_s5  ;;  %v582_v39 = vpop.permute.xlu1 %581 }
 0x474   :  { %v584_v55 = vmul.f32 %v582_v39, %v578_v29 }
 0x476   :  { %625 = vperm.xlu0 %3701, %v4379_v48  }
 0x477   :  { %634 = vperm.xlu1 %3700, %v4382_v49  }
 0x4e4   :  { %v592_v58 = vpop.permute.xlu0 %591 }
 0x4e5   :  { %v594_v60 = vadd.f32 %v592_v58, %v584_v55  ;;  %v614_v61 = vpop.permute.xlu1 %613 }
 0x4e6   :  { %v616_v62 = vadd.f32 %v614_v61, %v606_v59 }
 0x4e7   :  { %3722 = vtanh.f32 %v594_v60 }
 0x4e8   :  { %3724 = vtanh.f32 %v616_v62 }
 0x4f1   :  { %v3723_v1 = vpop.eup %3722 }
 0x4f2   :  { %v3725_v2 = vpop.eup %3724  ;;  %597 = vrot.lane.b32.xlu0 %v3723_v1, %s4004_s5 }
 0x4f3   :  { %619 = vrot.lane.b32.xlu1 %v3725_v2, %s4004_s5 }
 0x4f5   :  { %v4398_v5 = vpop.permute.xlu0 %625 }
 0x4f6   :  { %628 = vrot.lane.b32.xlu0 %v4346_v6, %s4006_s23  ;;  %v4400_v38 = vpop.permute.xlu1 %634  ;;  %vm627_vm9 = vcmp.eq.s32.totalorder %v4398_v5, 1 }
 0x4f7   :  { %637 = vrot.lane.b32.xlu1 %v4346_v6, %s4004_s5  ;;  %vm636_vm10 = vcmp.eq.s32.totalorder %v4400_v38, 1  ;;  %v651_v21 = vsel %vm627_vm9, %v594_v60, %v582_v39 }
 0x4f8   :  { %v652_v27 = vsel %vm636_vm10, %v616_v62, %v4366_v20  ;;  %v237_v20 = vpop.f32.mrb[4].mxu0 }
 0x4f9   :  { %v4444_v30 = vpop.f32.mrb[5].mxu0  ;;  %v238_v35 = vadd.f32 %v237_v20, %v4284_v53 }
 0x4fa   :  { %v4446_v31 = vpop.f32.mrb[6].mxu0 }
 0x564   :  { %v598_v6 = vpop.permute.xlu0 %597 }
 0x565   :  { %v620_v10 = vpop.permute.xlu1 %619  ;;  %v4407_v12 = vmul.f32 %v598_v6, %v578_v29  ;;  %v3291_v6 = vld [vmem:[%s5342_s1 + $0x10] sm:$0xff] }
 0x566   :  { %v4410_v13 = vmul.f32 %v620_v10, %v604_v34  ;;  %v4448_v34 = vpop.f32.mrb[7].mxu0  ;;  %vm675_vm11 = vcmp.gt.f32.partialorder %v3291_v6, 0.5 }
 0x568   :  { %v629_v14 = vpop.permute.xlu0 %628 }
 0x569   :  { %v638_v17 = vpop.permute.xlu1 %637  ;;  %v631_v18 = vsel %vm627_vm9, %v4407_v12, %v629_v14  ;;  %v3292_v14 = vld [vmem:[%s5342_s1 + $0x28] sm:$0xff] }
 0x56a   :  { %642 = vrot.lane.b32.xlu0 %v631_v18, %s4006_s23  ;;  %v640_v19 = vsel %vm636_vm10, %v4410_v13, %v638_v17  ;;  %vm678_vm12 = vcmp.gt.f32.partialorder %v3292_v14, 0.5 }
 0x56b   :  { %646 = vrot.lane.b32.xlu1 %v640_v19, %s4007_s4 }
 0x56e   :  { %654 = vrot.lane.b32.xlu0 %v651_v21, %s4007_s4 }
 0x5dc   :  { %v643_v22 = vpop.permute.xlu0 %642 }
 0x5dd   :  { %v647_v51 = vpop.permute.xlu1 %646 }
 0x5de   :  { %v649_v24 = vsel %vm463_vm6, %v643_v22, %v647_v51  ;;  %v4468_v51 = vsel %vm675_vm11, 1, %v5357_v63 }
 0x5df   :  { %650 = vst.msk [vmem:[#allocation5] sm:$0xff] %vm5356_vm1, %v649_v24  ;;  %v4471_v24 = vsel %vm678_vm12, 1, %v5357_v63 }
 0x5e0   :  { %v655_v25 = vpop.permute.xlu0 %654 }
 0x5e1   :  { %v657_v28 = vsel %vm463_vm6, %v655_v25, %v652_v27 }
 0x5e2   :  { %658 = vst.msk [vmem:[#allocation6] sm:$0xff] %vm5356_vm1, %v657_v28 }
 0x5e6   :  { %v4431_v29 = vld [vmem:[#allocation5] sm:$0xff] }
 0x5e7   :  { %3293 = vmatmul.mubr.msk.f32.vlgmr.msra.gmra.mrb[8].mxu0 %vm5356_vm1, %v4431_v29 }
 0x5e8   :  { %3528 = vmatpush1.bf16.msra.mxu0 %v4161_v15  ;;  %1118 = vmatprep.mubr.f32.mxu0 %v4003_v0 }
 0x5e9   :  { %3530 = vmatprep.subr.bf16.mxu0 %v4165_v16  ;;  %v4455_v61 = vld [vmem:[#allocation6] sm:$0xff] }
 0x5ec   :  { %3532 = vmatpush1.bf16.msra.mxu0 %v4189_v23 }
 0x5ed   :  { %3534 = vmatprep.subr.bf16.mxu0 %v4195_v26 }
 0x5f0   :  { %3536 = vmatpush1.bf16.msra.mxu0 %v4223_v32 }
 0x5f1   :  { %3538 = vmatprep.subr.bf16.mxu0 %v4226_v33 }
 0x5f4   :  { %3540 = vmatpush1.bf16.msra.mxu0 %v4242_v37 }
 0x5f5   :  { %3558 = vmatprep.subr.bf16.mxu0 %v4148_v11 }
 0x6ba   :  { %v750_v44 = vpop.f32.mrb[8].mxu0 }
 0x6bb   :  { %v757_v39 = vadd.f32 %v750_v44, %v238_v35  ;;  %v752_v55 = vpop.f32.mrb[9].mxu0 }
 0x6bc   :  { %v760_v58 = vadd.f32 %v752_v55, %v258_v36 }
 0x6bd   :  { %3726 = vtanh.f32 %v757_v39  ;;  %v761_v62 = vmul.f32 0.5, %v757_v39 }
 0x6be   :  { %3728 = vtanh.f32 %v760_v58  ;;  %v787_v1 = vmul.f32 0.5, %v760_v58 }
 0x6bf   :  { %3730 = vtanh.f32 %v761_v62 }
 0x6c0   :  { %3732 = vtanh.f32 %v787_v1 }
 0x6c7   :  { %v3727_v59 = vpop.eup %3726 }
 0x6c8   :  { %v3729_v60 = vpop.eup %3728  ;;  %772 = vrot.lane.b32.xlu1 %v3727_v59, %s4004_s5 }
 0x6c9   :  { %794 = vrot.lane.b32.xlu0 %v3729_v60, %s4004_s5  ;;  %v3731_v47 = vpop.eup %3730 }
 0x6ca   :  { %v3733_v2 = vpop.eup %3732  ;;  %v763_v3 = vmul.f32 0.5, %v3731_v47 }
 0x6cb   :  { %v789_v9 = vmul.f32 0.5, %v3733_v2 }
 0x6cc   :  { %767 = vrot.lane.b32.xlu1 %v4455_v61, %s4004_s5  ;;  %v764_v10 = vadd.f32 0.5, %v763_v3 }
 0x6cd   :  { %v790_v18 = vadd.f32 0.5, %v789_v9 }
 0x6cf   :  { %v792_v20 = vmul.f32 %v790_v18, %v4455_v61 }
 0x73a   :  { %v773_v17 = vpop.permute.xlu1 %772 }
 0x73b   :  { %v775_v19 = vmul.f32 %v773_v17, %v764_v10  ;;  %v795_v21 = vpop.permute.xlu0 %794 }
 0x73c   :  { %v797_v22 = vmul.f32 %v795_v21, %v790_v18 }
 0x73d   :  { %777 = vrot.lane.b32.xlu0 %v775_v19, %s4004_s5 }
 0x73e   :  { %799 = vrot.lane.b32.xlu1 %v797_v22, %s4004_s5  ;;  %v768_v25 = vpop.permute.xlu1 %767 }
 0x73f   :  { %v770_v27 = vmul.f32 %v768_v25, %v764_v10 }
 0x741   :  { %811 = vperm.xlu0 %3701, %v4468_v51  }
 0x742   :  { %820 = vperm.xlu1 %3700, %v4471_v24  }
 0x7af   :  { %v778_v28 = vpop.permute.xlu0 %777 }
 0x7b0   :  { %v780_v35 = vadd.f32 %v778_v28, %v770_v27  ;;  %v800_v36 = vpop.permute.xlu1 %799 }
 0x7b1   :  { %v802_v44 = vadd.f32 %v800_v36, %v792_v20 }
 0x7b2   :  { %3734 = vtanh.f32 %v780_v35 }
 0x7b3   :  { %3736 = vtanh.f32 %v802_v44 }
 0x7bc   :  { %v3735_v39 = vpop.eup %3734 }
 0x7bd   :  { %v3737_v55 = vpop.eup %3736  ;;  %783 = vrot.lane.b32.xlu0 %v3735_v39, %s4004_s5 }
 0x7be   :  { %805 = vrot.lane.b32.xlu1 %v3737_v55, %s4004_s5 }
 0x7c0   :  { %v4482_v58 = vpop.permute.xlu0 %811 }
 0x7c1   :  { %814 = vrot.lane.b32.xlu0 %v4431_v29, %s4006_s23  ;;  %v4484_v59 = vpop.permute.xlu1 %820  ;;  %vm813_vm13 = vcmp.eq.s32.totalorder %v4482_v58, 1  ;;  %v107_v58 = vld [vmem:[#allocation17 + $0x10] sm:$0xff] }
 0x7c2   :  { %823 = vrot.lane.b32.xlu1 %v4431_v29, %s4004_s5  ;;  %vm822_vm14 = vcmp.eq.s32.totalorder %v4484_v59, 1  ;;  %v837_v6 = vsel %vm813_vm13, %v780_v35, %v768_v25  ;;  %v252_v25 = vadd.f32 %v4272_v42, %v4289_v57 }
 0x7c3   :  { %v838_v19 = vsel %vm822_vm14, %v802_v44, %v4455_v61  ;;  %v244_v61 = vadd.f32 %v4446_v31, %v4284_v53 }
 0x82f   :  { %v784_v60 = vpop.permute.xlu0 %783 }
 0x830   :  { %v806_v62 = vpop.permute.xlu1 %805  ;;  %v4486_v1 = vmul.f32 %v784_v60, %v764_v10 }
 0x831   :  { %v4489_v47 = vmul.f32 %v806_v62, %v790_v18 }
 0x832   :  { %v845_v59 = vsel %vm813_vm13, %v4486_v1, 0.0 }
 0x833   :  { %v815_v2 = vpop.permute.xlu0 %814 }
 0x834   :  { %v824_v3 = vpop.permute.xlu1 %823  ;;  %v817_v29 = vsel %vm813_vm13, %v4486_v1, %v815_v2 }
 0x835   :  { %828 = vrot.lane.b32.xlu0 %v817_v29, %s4006_s23  ;;  %v826_v9 = vsel %vm822_vm14, %v4489_v47, %v824_v3  ;;  %v3294_v3 = vld [vmem:[%s5342_s1 + $0x18] sm:$0xff] }
 0x836   :  { %832 = vrot.lane.b32.xlu1 %v826_v9, %s4007_s4  ;;  %v3295_v9 = vld [vmem:[%s5342_s1 + $0x20] sm:$0xff]  ;;  %vm861_vm15 = vcmp.gt.f32.partialorder %v3294_v3, 0.5 }
 0x837   :  { %vm864_vm2 = vcmp.gt.f32.partialorder %v3295_v9, 0.5 }
 0x839   :  { %840 = vrot.lane.b32.xlu0 %v837_v6, %s4007_s4 }
 0x8a7   :  { %v829_v10 = vpop.permute.xlu0 %828 }
 0x8a8   :  { %v833_v14 = vpop.permute.xlu1 %832 }
 0x8a9   :  { %v835_v17 = vsel %vm463_vm6, %v829_v10, %v833_v14 }
 0x8aa   :  { %836 = vst.msk [vmem:[#allocation5] sm:$0xff] %vm5356_vm1, %v835_v17 }
 0x8ab   :  { %v841_v18 = vpop.permute.xlu0 %840 }
 0x8ac   :  { %v843_v21 = vsel %vm463_vm6, %v841_v18, %v838_v19  ;;  %v4539_v19 = vsel %vm861_vm15, 1, %v5357_v63 }
 0x8ad   :  { %844 = vst.msk [vmem:[#allocation6] sm:$0xff] %vm5356_vm1, %v843_v21  ;;  %v4542_v21 = vsel %vm864_vm2, 1, %v5357_v63 }
 0x8b1   :  { %v865_v22 = vld [vmem:[#allocation5] sm:$0xff] }
 0x8b2   :  { %3296 = vmatmul.mubr.msk.f32.vlgmr.msra.gmra.mrb[12].mxu1 %vm5356_vm1, %v865_v22 }
 0x8b3   :  { %3544 = vmatpush1.bf16.msra.mxu1 %v4161_v15  ;;  %1300 = vmatprep.mubr.f32.mxu1 %v4003_v0 }
 0x8b4   :  { %3546 = vmatprep.subr.bf16.mxu1 %v4165_v16  ;;  %v4526_v39 = vld [vmem:[#allocation6] sm:$0xff] }
 0x8b7   :  { %3548 = vmatpush1.bf16.msra.mxu1 %v4189_v23 }
 0x8b8   :  { %3550 = vmatprep.subr.bf16.mxu1 %v4195_v26 }
 0x8bb   :  { %3552 = vmatpush1.bf16.msra.mxu1 %v4223_v32 }
 0x8bc   :  { %3554 = vmatprep.subr.bf16.mxu1 %v4226_v33 }
 0x8bf   :  { %3556 = vmatpush1.bf16.msra.mxu1 %v4242_v37 }
 0x8c0   :  { %3574 = vmatprep.subr.bf16.mxu1 %v4148_v11 }
 0x985   :  { %v936_v27 = vpop.f32.mrb[12].mxu1 }
 0x986   :  { %v943_v28 = vadd.f32 %v936_v27, %v244_v61  ;;  %v938_v20 = vpop.f32.mrb[13].mxu1 }
 0x987   :  { %v946_v35 = vadd.f32 %v938_v20, %v252_v25 }
 0x988   :  { %3738 = vtanh.f32 %v943_v28  ;;  %v947_v31 = vmul.f32 0.5, %v943_v28 }
 0x989   :  { %3740 = vtanh.f32 %v946_v35  ;;  %v973_v55 = vmul.f32 0.5, %v946_v35 }
 0x98a   :  { %3742 = vtanh.f32 %v947_v31 }
 0x98b   :  { %3744 = vtanh.f32 %v973_v55 }
 0x992   :  { %v3739_v36 = vpop.eup %3738 }
 0x993   :  { %v3741_v44 = vpop.eup %3740  ;;  %958 = vrot.lane.b32.xlu1 %v3739_v36, %s4004_s5 }
 0x994   :  { %980 = vrot.lane.b32.xlu0 %v3741_v44, %s4004_s5  ;;  %v3743_v42 = vpop.eup %3742 }
 0x995   :  { %v3745_v60 = vpop.eup %3744  ;;  %v949_v62 = vmul.f32 0.5, %v3743_v42 }
 0x996   :  { %v975_v2 = vmul.f32 0.5, %v3745_v60 }
 0x997   :  { %953 = vrot.lane.b32.xlu1 %v4526_v39, %s4004_s5  ;;  %v950_v29 = vadd.f32 0.5, %v949_v62 }
 0x998   :  { %v976_v10 = vadd.f32 0.5, %v975_v2 }
 0x99a   :  { %v978_v28 = vmul.f32 %v976_v10, %v4526_v39 }
 0xa05   :  { %v959_v6 = vpop.permute.xlu1 %958 }
 0xa06   :  { %v961_v14 = vmul.f32 %v959_v6, %v950_v29  ;;  %v981_v17 = vpop.permute.xlu0 %980 }
 0xa07   :  { %v983_v18 = vmul.f32 %v981_v17, %v976_v10 }
 0xa08   :  { %963 = vrot.lane.b32.xlu0 %v961_v14, %s4004_s5 }
 0xa09   :  { %985 = vrot.lane.b32.xlu1 %v983_v18, %s4004_s5  ;;  %v954_v61 = vpop.permute.xlu1 %953 }
 0xa0a   :  { %v956_v25 = vmul.f32 %v954_v61, %v950_v29 }
 0xa0c   :  { %997 = vperm.xlu0 %3701, %v4539_v19  }
 0xa0d   :  { %1006 = vperm.xlu1 %3700, %v4542_v21  }
 0xa7a   :  { %v964_v27 = vpop.permute.xlu0 %963 }
 0xa7b   :  { %v966_v20 = vadd.f32 %v964_v27, %v956_v25  ;;  %v986_v35 = vpop.permute.xlu1 %985 }
 0xa7c   :  { %v988_v36 = vadd.f32 %v986_v35, %v978_v28 }
 0xa7d   :  { %3746 = vtanh.f32 %v966_v20 }
 0xa7e   :  { %3748 = vtanh.f32 %v988_v36 }
 0xa87   :  { %v3747_v44 = vpop.eup %3746 }
 0xa88   :  { %v3749_v31 = vpop.eup %3748  ;;  %969 = vrot.lane.b32.xlu0 %v3747_v44, %s4004_s5 }
 0xa89   :  { %991 = vrot.lane.b32.xlu1 %v3749_v31, %s4004_s5 }
 0xa8b   :  { %v4551_v55 = vpop.permute.xlu0 %997 }
 0xa8c   :  { %1000 = vrot.lane.b32.xlu0 %v865_v22, %s4006_s23  ;;  %v4553_v42 = vpop.permute.xlu1 %1006  ;;  %vm999_vm3 = vcmp.eq.s32.totalorder %v4551_v55, 1 }
 0xa8d   :  { %1009 = vrot.lane.b32.xlu1 %v865_v22, %s4004_s5  ;;  %vm1008_vm7 = vcmp.eq.s32.totalorder %v4553_v42, 1 }
 0xa8e   :  { %v1024_v27 = vsel %vm1008_vm7, %v988_v36, %v4526_v39  ;;  %v250_v39 = vadd.f32 %v4270_v41, %v4284_v53 }
 0xafa   :  { %v970_v60 = vpop.permute.xlu0 %969 }
 0xafb   :  { %v992_v62 = vpop.permute.xlu1 %991  ;;  %v4555_v2 = vmul.f32 %v970_v60, %v950_v29  ;;  %v1023_v29 = vsel %vm999_vm3, %v966_v20, %v954_v61  ;;  %v246_v61 = vadd.f32 %v4448_v34, %v4289_v57 }
 0xafc   :  { %v4558_v3 = vmul.f32 %v992_v62, %v976_v10 }
 0xafd   :  { %v1031_v42 = vsel %vm999_vm3, %v4555_v2, 0.0 }
 0xafe   :  { %v1001_v9 = vpop.permute.xlu0 %1000 }
 0xaff   :  { %v1010_v6 = vpop.permute.xlu1 %1009  ;;  %v1003_v22 = vsel %vm999_vm3, %v4555_v2, %v1001_v9  ;;  %v666_v2 = vsel %vm636_vm10, %v4410_v13, 0.0  ;;  %v105_v13 = vld [vmem:[#allocation17] sm:$0xff] }
 0xb00   :  { %1014 = vrot.lane.b32.xlu0 %v1003_v22, %s4006_s23  ;;  %v1012_v14 = vsel %vm1008_vm7, %v4558_v3, %v1010_v6 }
 0xb01   :  { %1018 = vrot.lane.b32.xlu1 %v1012_v14, %s4007_s4 }
 0xb04   :  { %1026 = vrot.lane.b32.xlu0 %v1023_v29, %s4007_s4 }
 0xb72   :  { %v1015_v10 = vpop.permute.xlu0 %1014 }
 0xb73   :  { %v1019_v17 = vpop.permute.xlu1 %1018 }
 0xb74   :  { %v1021_v18 = vsel %vm463_vm6, %v1015_v10, %v1019_v17 }
 0xb75   :  { %1022 = vst.msk [vmem:[#allocation5] sm:$0xff] %vm5356_vm1, %v1021_v18 }
 0xb76   :  { %v1027_v25 = vpop.permute.xlu0 %1026 }
 0xb77   :  { %v1029_v28 = vsel %vm463_vm6, %v1027_v25, %v1024_v27 }
 0xb78   :  { %1030 = vst.msk [vmem:[#allocation6] sm:$0xff] %vm5356_vm1, %v1029_v28 }
 0xb7c   :  { %v1049_v35 = vld [vmem:[#allocation5] sm:$0xff] }
 0xb7d   :  { %3299 = vmatmul.mubr.msk.f32.vlgmr.msra.gmra.mrb[10].mxu0 %vm5356_vm1, %v1049_v35 }
 0xb7e   :  { %3560 = vmatpush1.bf16.msra.mxu0 %v4161_v15  ;;  %1482 = vmatprep.mubr.f32.mxu0 %v4003_v0 }
 0xb7f   :  { %3562 = vmatprep.subr.bf16.mxu0 %v4165_v16  ;;  %v1050_v9 = vld [vmem:[#allocation6] sm:$0xff] }
 0xb82   :  { %3564 = vmatpush1.bf16.msra.mxu0 %v4189_v23 }
 0xb83   :  { %3566 = vmatprep.subr.bf16.mxu0 %v4195_v26 }
 0xb86   :  { %3568 = vmatpush1.bf16.msra.mxu0 %v4223_v32 }
 0xb87   :  { %3570 = vmatprep.subr.bf16.mxu0 %v4226_v33 }
 0xb8a   :  { %3572 = vmatpush1.bf16.msra.mxu0 %v4242_v37 }
 0xc50   :  { %v1120_v20 = vpop.f32.mrb[10].mxu0 }
 0xc51   :  { %v1126_v36 = vadd.f32 %v1120_v20, %v250_v39  ;;  %v1122_v44 = vpop.f32.mrb[11].mxu0 }
 0xc52   :  { %v1128_v31 = vadd.f32 %v1122_v44, %v246_v61 }
 0xc53   :  { %3750 = vtanh.f32 %v1126_v36  ;;  %v1129_v6 = vmul.f32 0.5, %v1126_v36 }
 0xc54   :  { %3752 = vtanh.f32 %v1128_v31  ;;  %v1155_v41 = vmul.f32 0.5, %v1128_v31 }
 0xc55   :  { %3754 = vtanh.f32 %v1129_v6 }
 0xc56   :  { %3756 = vtanh.f32 %v1155_v41 }
 0xc5d   :  { %v3751_v60 = vpop.eup %3750 }
 0xc5e   :  { %v3753_v62 = vpop.eup %3752  ;;  %1140 = vrot.lane.b32.xlu1 %v3751_v60, %s4004_s5 }
 0xc5f   :  { %1162 = vrot.lane.b32.xlu0 %v3753_v62, %s4004_s5  ;;  %v3755_v34 = vpop.eup %3754 }
 0xc60   :  { %v3757_v22 = vpop.eup %3756  ;;  %v1131_v14 = vmul.f32 0.5, %v3755_v34 }
 0xc61   :  { %v1157_v29 = vmul.f32 0.5, %v3757_v22 }
 0xc62   :  { %1135 = vrot.lane.b32.xlu1 %v1050_v9, %s4004_s5  ;;  %v1132_v10 = vadd.f32 0.5, %v1131_v14 }
 0xc63   :  { %v1158_v18 = vadd.f32 0.5, %v1157_v29 }
 0xc65   :  { %v1160_v36 = vmul.f32 %v1158_v18, %v1050_v9 }
 0xcd0   :  { %v1141_v17 = vpop.permute.xlu1 %1140 }
 0xcd1   :  { %v1143_v25 = vmul.f32 %v1141_v17, %v1132_v10  ;;  %v1163_v27 = vpop.permute.xlu0 %1162 }
 0xcd2   :  { %v1165_v28 = vmul.f32 %v1163_v27, %v1158_v18 }
 0xcd3   :  { %1145 = vrot.lane.b32.xlu0 %v1143_v25, %s4004_s5 }
 0xcd4   :  { %1167 = vrot.lane.b32.xlu1 %v1165_v28, %s4004_s5  ;;  %v1136_v39 = vpop.permute.xlu1 %1135 }
 0xcd5   :  { %v1138_v61 = vmul.f32 %v1136_v39, %v1132_v10 }
 0xcd7   :  { %1179 = vperm.xlu0 %3701, %v4542_v21  }
 0xcd8   :  { %1188 = vperm.xlu1 %3700, %v4539_v19  }
 0xd45   :  { %v1146_v20 = vpop.permute.xlu0 %1145 }
 0xd46   :  { %v1148_v44 = vadd.f32 %v1146_v20, %v1138_v61  ;;  %v1168_v31 = vpop.permute.xlu1 %1167 }
 0xd47   :  { %v1170_v60 = vadd.f32 %v1168_v31, %v1160_v36 }
 0xd48   :  { %3758 = vtanh.f32 %v1148_v44 }
 0xd49   :  { %3760 = vtanh.f32 %v1170_v60 }
 0xd52   :  { %v3759_v62 = vpop.eup %3758 }
 0xd53   :  { %v3761_v6 = vpop.eup %3760  ;;  %1151 = vrot.lane.b32.xlu0 %v3759_v62, %s4004_s5 }
 0xd54   :  { %1173 = vrot.lane.b32.xlu1 %v3761_v6, %s4004_s5 }
 0xd56   :  { %v4603_v19 = vpop.permute.xlu0 %1179 }
 0xd57   :  { %1182 = vrot.lane.b32.xlu0 %v1049_v35, %s4006_s23  ;;  %v4605_v21 = vpop.permute.xlu1 %1188  ;;  %vm1181_vm8 = vcmp.eq.s32.totalorder %v4603_v19, 1  ;;  %v109_v19 = vld [vmem:[#allocation17 + $0x20] sm:$0xff] }
 0xd58   :  { %1191 = vrot.lane.b32.xlu1 %v1049_v35, %s4004_s5  ;;  %vm1190_vm11 = vcmp.eq.s32.totalorder %v4605_v21, 1  ;;  %v474_v21 = vsel %vm441_vm4, %v4322_v52, 0.0 }
 0xd59   :  { %v1206_v20 = vsel %vm1190_vm11, %v1170_v60, %v1050_v9  ;;  %v256_v9 = vadd.f32 %v4276_v46, %v4284_v53 }
 0xdc5   :  { %v1152_v41 = vpop.permute.xlu0 %1151 }
 0xdc6   :  { %v1174_v34 = vpop.permute.xlu1 %1173  ;;  %v4607_v22 = vmul.f32 %v1152_v41, %v1132_v10  ;;  %v1205_v10 = vsel %vm1181_vm8, %v1148_v44, %v1136_v39  ;;  %v240_v39 = vadd.f32 %v4444_v30, %v4289_v57 }
 0xdc7   :  { %v4610_v14 = vmul.f32 %v1174_v34, %v1158_v18 }
 0xdc8   :  { %v1213_v38 = vsel %vm1181_vm8, %v4607_v22, 0.0 }
 0xdc9   :  { %v1183_v29 = vpop.permute.xlu0 %1182  ;;  %v1220_v5 = vsel %vm1190_vm11, %v4610_v14, 0.0 }
 0xdca   :  { %v1192_v17 = vpop.permute.xlu1 %1191  ;;  %v1185_v35 = vsel %vm1181_vm8, %v4607_v22, %v1183_v29  ;;  %v110_v22 = vld [vmem:[#allocation17 + $0x28] sm:$0xff] }
 0xdcb   :  { %1196 = vrot.lane.b32.xlu0 %v1185_v35, %s4006_s23  ;;  %v1194_v25 = vsel %vm1190_vm11, %v4610_v14, %v1192_v17 }
 0xdcc   :  { %1200 = vrot.lane.b32.xlu1 %v1194_v25, %s4007_s4 }
 0xdcf   :  { %1208 = vrot.lane.b32.xlu0 %v1205_v10, %s4007_s4 }
 0xe3d   :  { %v1197_v18 = vpop.permute.xlu0 %1196 }
 0xe3e   :  { %v1201_v27 = vpop.permute.xlu1 %1200 }
 0xe3f   :  { %v1203_v28 = vsel %vm463_vm6, %v1197_v18, %v1201_v27 }
 0xe40   :  { %1204 = vst.msk [vmem:[#allocation5] sm:$0xff] %vm5356_vm1, %v1203_v28 }
 0xe41   :  { %v1209_v61 = vpop.permute.xlu0 %1208 }
 0xe42   :  { %v1211_v36 = vsel %vm463_vm6, %v1209_v61, %v1206_v20 }
 0xe43   :  { %1212 = vst.msk [vmem:[#allocation6] sm:$0xff] %vm5356_vm1, %v1211_v36 }
 0xe47   :  { %v1231_v31 = vld [vmem:[#allocation5] sm:$0xff] }
 0xe48   :  { %3302 = vmatmul.mubr.msk.f32.vlgmr.msra.gmra.mrb[14].mxu1 %vm5356_vm1, %v1231_v31 }
 0xe49   :  { %3576 = vmatpush1.bf16.msra.mxu1 %v4161_v15  ;;  %1664 = vmatprep.mubr.f32.mxu1 %v4003_v0 }
 0xe4a   :  { %3578 = vmatprep.subr.bf16.mxu1 %v4165_v16  ;;  %v1232_v29 = vld [vmem:[#allocation6] sm:$0xff] }
 0xe4d   :  { %3580 = vmatpush1.bf16.msra.mxu1 %v4189_v23 }
 0xe4e   :  { %3582 = vmatprep.subr.bf16.mxu1 %v4195_v26 }
 0xe51   :  { %3584 = vmatpush1.bf16.msra.mxu1 %v4223_v32 }
 0xe52   :  { %3586 = vmatprep.subr.bf16.mxu1 %v4226_v33 }
 0xe55   :  { %3588 = vmatpush1.bf16.msra.mxu1 %v4242_v37 }
 0xe56   :  { %3618 = vmatprep.subr.bf16.mxu1 %v4128_v4 }
 0xf1b   :  { %v1302_v44 = vpop.f32.mrb[14].mxu1 }
 0xf1c   :  { %v1308_v60 = vadd.f32 %v1302_v44, %v256_v9  ;;  %v1304_v62 = vpop.f32.mrb[15].mxu1 }
 0xf1d   :  { %v1310_v6 = vadd.f32 %v1304_v62, %v240_v39 }
 0xf1e   :  { %3762 = vtanh.f32 %v1308_v60  ;;  %v1311_v4 = vmul.f32 0.5, %v1308_v60 }
 0xf1f   :  { %3764 = vtanh.f32 %v1310_v6  ;;  %v1337_v46 = vmul.f32 0.5, %v1310_v6 }
 0xf20   :  { %3766 = vtanh.f32 %v1311_v4 }
 0xf21   :  { %3768 = vtanh.f32 %v1337_v46 }
 0xf28   :  { %v3763_v41 = vpop.eup %3762 }
 0xf29   :  { %v3765_v34 = vpop.eup %3764  ;;  %1322 = vrot.lane.b32.xlu1 %v3763_v41, %s4004_s5 }
 0xf2a   :  { %1344 = vrot.lane.b32.xlu0 %v3765_v34, %s4004_s5  ;;  %v3767_v30 = vpop.eup %3766 }
 0xf2b   :  { %v3769_v17 = vpop.eup %3768  ;;  %v1313_v35 = vmul.f32 0.5, %v3767_v30 }
 0xf2c   :  { %v1339_v25 = vmul.f32 0.5, %v3769_v17 }
 0xf2d   :  { %1317 = vrot.lane.b32.xlu1 %v1232_v29, %s4004_s5  ;;  %v1314_v10 = vadd.f32 0.5, %v1313_v35 }
 0xf2e   :  { %v1340_v27 = vadd.f32 0.5, %v1339_v25 }
 0xf30   :  { %v1342_v44 = vmul.f32 %v1340_v27, %v1232_v29 }
 0xf9b   :  { %v1323_v18 = vpop.permute.xlu1 %1322 }
 0xf9c   :  { %v1325_v28 = vmul.f32 %v1323_v18, %v1314_v10  ;;  %v1345_v61 = vpop.permute.xlu0 %1344 }
 0xf9d   :  { %v1347_v20 = vmul.f32 %v1345_v61, %v1340_v27 }
 0xf9e   :  { %1327 = vrot.lane.b32.xlu0 %v1325_v28, %s4004_s5 }
 0xf9f   :  { %1349 = vrot.lane.b32.xlu1 %v1347_v20, %s4004_s5  ;;  %v1318_v36 = vpop.permute.xlu1 %1317 }
 0xfa0   :  { %v1320_v9 = vmul.f32 %v1318_v36, %v1314_v10 }
 0xfa2   :  { %1361 = vperm.xlu0 %3701, %v4471_v24  }
 0xfa3   :  { %1370 = vperm.xlu1 %3700, %v4468_v51  }
0x1010   :  { %v1328_v39 = vpop.permute.xlu0 %1327 }
0x1011   :  { %v1330_v60 = vadd.f32 %v1328_v39, %v1320_v9  ;;  %v1350_v62 = vpop.permute.xlu1 %1349 }
0x1012   :  { %v1352_v6 = vadd.f32 %v1350_v62, %v1342_v44 }
0x1013   :  { %3770 = vtanh.f32 %v1330_v60 }
0x1014   :  { %3772 = vtanh.f32 %v1352_v6 }
0x101d   :  { %v3771_v41 = vpop.eup %3770 }
0x101e   :  { %v3773_v34 = vpop.eup %3772  ;;  %1333 = vrot.lane.b32.xlu0 %v3771_v41, %s4004_s5 }
0x101f   :  { %1355 = vrot.lane.b32.xlu1 %v3773_v34, %s4004_s5 }
0x1021   :  { %v4655_v51 = vpop.permute.xlu0 %1361 }
0x1022   :  { %1364 = vrot.lane.b32.xlu0 %v1231_v31, %s4006_s23  ;;  %v4657_v24 = vpop.permute.xlu1 %1370  ;;  %vm1363_vm12 = vcmp.eq.s32.totalorder %v4655_v51, 1 }
0x1023   :  { %1373 = vrot.lane.b32.xlu1 %v1231_v31, %s4004_s5  ;;  %vm1372_vm15 = vcmp.eq.s32.totalorder %v4657_v24, 1 }
0x1024   :  { %v1388_v9 = vsel %vm1372_vm15, %v1352_v6, %v1232_v29 }
0x1090   :  { %v1334_v4 = vpop.permute.xlu0 %1333 }
0x1091   :  { %v1356_v46 = vpop.permute.xlu1 %1355  ;;  %v4659_v30 = vmul.f32 %v1334_v4, %v1314_v10  ;;  %v1387_v10 = vsel %vm1363_vm12, %v1330_v60, %v1318_v36  ;;  %v262_v36 = vadd.f32 %v4280_v50, %v4284_v53  ;;  %v234_v60 = vadd.f32 %v4359_v8, %v4289_v57 }
0x1092   :  { %v4662_v17 = vmul.f32 %v1356_v46, %v1340_v27 }
0x1093   :  { %v1395_v52 = vsel %vm1363_vm12, %v4659_v30, 0.0 }
0x1094   :  { %v1365_v35 = vpop.permute.xlu0 %1364 }
0x1095   :  { %v1374_v25 = vpop.permute.xlu1 %1373  ;;  %v1367_v31 = vsel %vm1363_vm12, %v4659_v30, %v1365_v35 }
0x1096   :  { %1378 = vrot.lane.b32.xlu0 %v1367_v31, %s4006_s23  ;;  %v1376_v18 = vsel %vm1372_vm15, %v4662_v17, %v1374_v25 }
0x1097   :  { %1382 = vrot.lane.b32.xlu1 %v1376_v18, %s4007_s4 }
0x109a   :  { %1390 = vrot.lane.b32.xlu0 %v1387_v10, %s4007_s4 }
0x1108   :  { %v1379_v27 = vpop.permute.xlu0 %1378 }
0x1109   :  { %v1383_v28 = vpop.permute.xlu1 %1382 }
0x110a   :  { %v1385_v61 = vsel %vm463_vm6, %v1379_v27, %v1383_v28 }
0x110b   :  { %1386 = vst.msk [vmem:[#allocation5] sm:$0xff] %vm5356_vm1, %v1385_v61 }
0x110c   :  { %v1391_v20 = vpop.permute.xlu0 %1390 }
0x110d   :  { %v1393_v39 = vsel %vm463_vm6, %v1391_v20, %v1388_v9 }
0x110e   :  { %1394 = vst.msk [vmem:[#allocation6] sm:$0xff] %vm5356_vm1, %v1393_v39 }
0x1112   :  { %v1413_v44 = vld [vmem:[#allocation5] sm:$0xff] }
0x1113   :  { %3305 = vmatmul.mubr.msk.f32.vlgmr.msra.gmra.mrb[12].mxu0 %vm5356_vm1, %v1413_v44 }
0x1115   :  { %v1414_v46 = vld [vmem:[#allocation6] sm:$0xff] }
0x11e6   :  { %v1484_v62 = vpop.f32.mrb[12].mxu0 }
0x11e7   :  { %v1490_v41 = vadd.f32 %v1484_v62, %v262_v36  ;;  %v1486_v34 = vpop.f32.mrb[13].mxu0 }
0x11e8   :  { %v1492_v4 = vadd.f32 %v1486_v34, %v234_v60 }
0x11e9   :  { %3774 = vtanh.f32 %v1490_v41  ;;  %v1493_v35 = vmul.f32 0.5, %v1490_v41 }
0x11ea   :  { %3776 = vtanh.f32 %v1492_v4  ;;  %v1519_v50 = vmul.f32 0.5, %v1492_v4 }
0x11eb   :  { %3778 = vtanh.f32 %v1493_v35 }
0x11ec   :  { %3780 = vtanh.f32 %v1519_v50 }
0x11f3   :  { %v3775_v29 = vpop.eup %3774 }
0x11f4   :  { %v3777_v6 = vpop.eup %3776  ;;  %1504 = vrot.lane.b32.xlu1 %v3775_v29, %s4004_s5 }
0x11f5   :  { %1526 = vrot.lane.b32.xlu0 %v3777_v6, %s4004_s5  ;;  %v3779_v8 = vpop.eup %3778 }
0x11f6   :  { %v3781_v25 = vpop.eup %3780  ;;  %v1495_v31 = vmul.f32 0.5, %v3779_v8 }
0x11f7   :  { %v1521_v18 = vmul.f32 0.5, %v3781_v25 }
0x11f8   :  { %1499 = vrot.lane.b32.xlu1 %v1414_v46, %s4004_s5  ;;  %v1496_v10 = vadd.f32 0.5, %v1495_v31 }
0x11f9   :  { %v1522_v28 = vadd.f32 0.5, %v1521_v18 }
0x11fb   :  { %v1524_v62 = vmul.f32 %v1522_v28, %v1414_v46 }
0x1266   :  { %v1505_v27 = vpop.permute.xlu1 %1504 }
0x1267   :  { %v1507_v61 = vmul.f32 %v1505_v27, %v1496_v10  ;;  %v1527_v20 = vpop.permute.xlu0 %1526 }
0x1268   :  { %v1529_v9 = vmul.f32 %v1527_v20, %v1522_v28 }
0x1269   :  { %1509 = vrot.lane.b32.xlu0 %v1507_v61, %s4004_s5 }
0x126a   :  { %1531 = vrot.lane.b32.xlu1 %v1529_v9, %s4004_s5  ;;  %v1500_v39 = vpop.permute.xlu1 %1499 }
0x126b   :  { %v1502_v36 = vmul.f32 %v1500_v39, %v1496_v10 }
0x126d   :  { %1543 = vperm.xlu0 %3701, %v4382_v49  }
0x126e   :  { %1552 = vperm.xlu1 %3700, %v4379_v48  }
0x12db   :  { %v1510_v60 = vpop.permute.xlu0 %1509 }
0x12dc   :  { %v1512_v41 = vadd.f32 %v1510_v60, %v1502_v36  ;;  %v1532_v34 = vpop.permute.xlu1 %1531 }
0x12dd   :  { %v1534_v4 = vadd.f32 %v1532_v34, %v1524_v62 }
0x12de   :  { %3782 = vtanh.f32 %v1512_v41 }
0x12df   :  { %3784 = vtanh.f32 %v1534_v4 }
0x12e8   :  { %v3783_v29 = vpop.eup %3782 }
0x12e9   :  { %v3785_v6 = vpop.eup %3784  ;;  %1515 = vrot.lane.b32.xlu0 %v3783_v29, %s4004_s5 }
0x12ea   :  { %1537 = vrot.lane.b32.xlu1 %v3785_v6, %s4004_s5 }
0x12ec   :  { %v4698_v48 = vpop.permute.xlu0 %1543 }
0x12ed   :  { %1546 = vrot.lane.b32.xlu0 %v1413_v44, %s4006_s23  ;;  %v4700_v49 = vpop.permute.xlu1 %1552  ;;  %vm1545_vm2 = vcmp.eq.s32.totalorder %v4698_v48, 1 }
0x12ee   :  { %1555 = vrot.lane.b32.xlu1 %v1413_v44, %s4004_s5  ;;  %vm1554_vm0 = vcmp.eq.s32.totalorder %v4700_v49, 1 }
0x12ef   :  { %v1570_v9 = vsel %vm1554_vm0, %v1534_v4, %v1414_v46  ;;  %v228_v46 = vadd.f32 %v4274_v45, %v4289_v57 }
0x135b   :  { %v1516_v35 = vpop.permute.xlu0 %1515 }
0x135c   :  { %v1538_v50 = vpop.permute.xlu1 %1537  ;;  %v4702_v8 = vmul.f32 %v1516_v35, %v1496_v10  ;;  %v1569_v10 = vsel %vm1545_vm2, %v1512_v41, %v1500_v39  ;;  %v268_v39 = vadd.f32 %v4286_v54, %v4284_v53 }
0x135d   :  { %v4705_v25 = vmul.f32 %v1538_v50, %v1522_v28 }
0x135e   :  { %v1577_v30 = vsel %vm1545_vm2, %v4702_v8, 0.0 }
0x135f   :  { %v1547_v31 = vpop.permute.xlu0 %1546 }
0x1360   :  { %v1556_v18 = vpop.permute.xlu1 %1555  ;;  %v1549_v44 = vsel %vm1545_vm2, %v4702_v8, %v1547_v31 }
0x1361   :  { %1560 = vrot.lane.b32.xlu0 %v1549_v44, %s4006_s23  ;;  %v1558_v27 = vsel %vm1554_vm0, %v4705_v25, %v1556_v18  ;;  %v4739_v18 = vld [vmem:[%s5342_s1] sm:$0xff] }
0x1362   :  { %1564 = vrot.lane.b32.xlu1 %v1558_v27, %s4007_s4 }
0x1366   :  { %1572 = vrot.lane.b32.xlu1 %v1569_v10, %s4007_s4 }
0x13d3   :  { %v1561_v28 = vpop.permute.xlu0 %1560 }
0x13d4   :  { %v1565_v61 = vpop.permute.xlu1 %1564 }
0x13d5   :  { %v1567_v20 = vsel %vm463_vm6, %v1561_v28, %v1565_v61 }
0x13d6   :  { %1568 = vst.msk [vmem:[#allocation5] sm:$0xff] %vm5356_vm1, %v1567_v20 }
0x13d8   :  { %v1573_v36 = vpop.permute.xlu1 %1572 }
0x13d9   :  { %v1575_v60 = vsel %vm463_vm6, %v1573_v36, %v1570_v9 }
0x13da   :  { %1576 = vst.msk [vmem:[#allocation6] sm:$0xff] %vm5356_vm1, %v1575_v60 }
0x13dd   :  { %v1595_v62 = vld [vmem:[#allocation5] sm:$0xff] }
0x13de   :  { %3307 = vmatmul.mubr.msk.f32.vlgmr.msra.gmra.mrb[16].mxu1 %vm5356_vm1, %v1595_v62  ;;  %vm1594_vm1 = vcmp.gt.f32.partialorder %v4739_v18, 0.5  ;;  %v1402_v62 = vsel %vm1372_vm15, %v4662_v17, 0.0  ;;  %v1584_v17 = vsel %vm1554_vm0, %v4705_v25, 0.0  ;;  %v480_v25 = vsel %vm450_vm5, %v4329_v56, 0.0 }
0x13df   :  { %3620 = vmatpush1.bf16.msra.mxu1 %v4136_v7  ;;  %2481 = vmatprep.mubr.f32.mxu1 %v4003_v0  ;;  %v1732_v20 = vsel %vm1594_vm1, 1, %v5357_v63  ;;  %vm5359_vm5 = vcmask 523264  }
0x13e0   :  { %3638 = vmatprep.subr.bf16.mxu1 %v4148_v11  ;;  %vm5361_vm10 = vmmov %vm5359_vm5 }
0x13e1   :  { %v1596_v7 = vld [vmem:[#allocation6] sm:$0xff]  ;;  %vm5362_vm13 = vmmov %vm5359_vm5 }
0x13e2   :  { %vm5364_vm3 = vmmov %vm5359_vm5 }
0x13e3   :  { %vm5366_vm8 = vmmov %vm5364_vm3 }
0x13e4   :  { %vm5367_vm11 = vmmov %vm5364_vm3 }
0x13e5   :  { %vm5368_vm12 = vmmov %vm5364_vm3 }
0x13e6   :  { %vm5369_vm15 = vmmov %vm5364_vm3 }
0x13e7   :  { %vm5370_vm2 = vmmov %vm5364_vm3 }
0x14b1   :  { %v1666_v41 = vpop.f32.mrb[16].mxu1 }
0x14b2   :  { %v1672_v34 = vadd.f32 %v1666_v41, %v268_v39  ;;  %v1668_v4 = vpop.f32.mrb[17].mxu1 }
0x14b3   :  { %v1674_v29 = vadd.f32 %v1668_v4, %v228_v46  ;;  %v3306_v4 = vld [vmem:[%s5342_s1 + $0x38] sm:$0xff] }
0x14b4   :  { %3786 = vtanh.f32 %v1672_v34  ;;  %v1675_v54 = vmul.f32 0.5, %v1672_v34  ;;  %vm1592_vm1 = vcmp.gt.f32.partialorder %v3306_v4, 0.5 }
0x14b5   :  { %3788 = vtanh.f32 %v1674_v29  ;;  %v1701_v50 = vmul.f32 0.5, %v1674_v29 }
0x14b7   :  { %3790 = vtanh.f32 %v1701_v50 }
0x14b8   :  { %3792 = vtanh.f32 %v1675_v54 }
0x14be   :  { %v3787_v6 = vpop.eup %3786 }
0x14bf   :  { %v3789_v35 = vpop.eup %3788  ;;  %1686 = vrot.lane.b32.xlu1 %v3787_v6, %s4004_s5  ;;  %v1723_v6 = vsel %vm1592_vm1, 1, %v5357_v63  ;;  %vm5371_vm1 = vmmov %vm5370_vm2 }
0x14c0   :  { %1708 = vrot.lane.b32.xlu0 %v3789_v35, %s4004_s5 }
0x14c1   :  { %v3791_v45 = vpop.eup %3790 }
0x14c2   :  { %v1703_v31 = vmul.f32 0.5, %v3791_v45  ;;  %v3793_v27 = vpop.eup %3792  ;;  %v1038_v45 = vsel %vm1008_vm7, %v4558_v3, 0.0  ;;  %vm5365_vm7 = vmmov %vm5364_vm3 }
0x14c3   :  { %1681 = vrot.lane.b32.xlu1 %v1596_v7, %s4004_s5  ;;  %v1677_v61 = vmul.f32 0.5, %v3793_v27 }
0x14c4   :  { %v1704_v44 = vadd.f32 0.5, %v1703_v31  ;;  %v659_v31 = vsel %vm627_vm9, %v4407_v12, 0.0  ;;  %v852_v12 = vsel %vm822_vm14, %v4489_v47, 0.0  ;;  %vm5360_vm9 = vmmov %vm5359_vm5 }
0x14c5   :  { %v4744_v36 = vadd.f32 0.5, %v1677_v61  ;;  %vm5363_vm14 = vmmov %vm5359_vm5 }
0x14c6   :  { %v1706_v39 = vmul.f32 %v1704_v44, %v1596_v7 }
0x1531   :  { %v1687_v9 = vpop.permute.xlu1 %1686 }
0x1532   :  { %v1709_v10 = vpop.permute.xlu0 %1708  ;;  %v1689_v60 = vmul.f32 %v1687_v9, %v4744_v36 }
0x1533   :  { %v1711_v28 = vmul.f32 %v1709_v10, %v1704_v44  ;;  %v108_v10 = vld [vmem:[#allocation17 + $0x18] sm:$0xff] }
0x1534   :  { %v4833_v61 = vpack.c.bf16 %v108_v10, %v107_v58 }
0x1535   :  { %1713 = vrot.lane.b32.xlu0 %v1711_v28, %s4004_s5  ;;  %v4759_v29 = vpop.permute.xlu1 %1681 }
0x1536   :  { %v1684_v35 = vmul.f32 %v4759_v29, %v4744_v36 }
0x1539   :  { %1734 = vperm.xlu0 %3701, %v1732_v20   ;;  %v4846_v20 = vpack.c.bf16 %v110_v22, %v109_v19 }
0x153d   :  { %1691 = vrot.lane.b32.xlu0 %v1689_v60, %s4004_s5  ;;  %v111_v60 = vld [vmem:[#allocation17 + $0x30] sm:$0xff] }
0x1541   :  { %1404 = vrot.lane.b32.xlu0 %v1402_v62, %s4006_s23  ;;  %v112_v62 = vld [vmem:[#allocation17 + $0x38] sm:$0xff] }
0x1542   :  { %v4856_v8 = vpack.c.bf16 %v112_v62, %v111_v60 }
0x15a7   :  { %v1714_v46 = vpop.permute.xlu0 %1713 }
0x15a8   :  { %v4752_v41 = vadd.f32 %v1714_v46, %v1706_v39 }
0x15aa   :  { %3794 = vtanh.f32 %v4752_v41 }
0x15b4   :  { %v3795_v34 = vpop.eup %3794 }
0x15b5   :  { %1719 = vrot.lane.b32.xlu1 %v3795_v34, %s4004_s5 }
0x15b8   :  { %v4761_v24 = vpop.permute.xlu0 %1734 }
0x15b9   :  { %1586 = vrot.lane.b32.xlu1 %v1584_v17, %s4006_s23  ;;  %vm1736_vm0 = vcmp.eq.s32.totalorder %v4761_v24, 1 }
0x15bc   :  { %v1692_v7 = vpop.permute.xlu0 %1691 }
0x15bd   :  { %v4770_v50 = vadd.f32 %v1692_v7, %v1684_v35  ;;  %1725 = vperm.xlu1 %3700, %v1723_v6  }
0x15bf   :  { %3796 = vtanh.f32 %v4770_v50 }
0x15c0   :  { %v1405_v54 = vpop.permute.xlu0 %1404 }
0x15c1   :  { %1408 = vst.msk [vmem:[#allocation4 + $0x10] sm:$0xff] %vm463_vm6, %v1405_v54  ;;  %1040 = vrot.lane.b32.xlu1 %v1038_v45, %s4006_s23 }
0x15c8   :  { %v1782_v35 = vld [vmem:[#allocation4 + $0x10] sm:$0xff] }
0x15c9   :  { %v3797_v49 = vpop.eup %3796 }
0x15ca   :  { %1697 = vrot.lane.b32.xlu1 %v3797_v49, %s4004_s5 }
0x15ce   :  { %482 = vrot.lane.b32.xlu1 %v480_v25, %s4006_s23 }
0x15d2   :  { %661 = vrot.lane.b32.xlu1 %v659_v31, %s4006_s23 }
0x15d6   :  { %1033 = vrot.lane.b32.xlu1 %v1031_v42, %s4006_s23 }
0x1627   :  { %v1720_v3 = vpop.permute.xlu1 %1719 }
0x1628   :  { %v4791_v27 = vmul.f32 %v1720_v3, %v1704_v44  ;;  %v106_v44 = vld [vmem:[#allocation17 + $0x8] sm:$0xff] }
0x1629   :  { %v4831_v1 = vpack.c.bf16 %v106_v44, %v105_v13 }
0x162a   :  { %v1766_v43 = vsel %vm1736_vm0, %v4791_v27, 0.0 }
0x162b   :  { %1768 = vrot.lane.b32.xlu0 %v1766_v43, %s4006_s23  ;;  %v1587_v56 = vpop.permute.xlu1 %1586  ;;  %3590 = vmatprep.subr.bf16.mxu0 %v4831_v1 }
0x162c   :  { %1590 = vst.msk [vmem:[#allocation4 + $0x8] sm:$0xff] %vm463_vm6, %v1587_v56  ;;  %3592 = vmatpush3.bf16.msra.mxu0 %v4831_v1 }
0x162d   :  { %3594 = vmatprep.subr.bf16.mxu0 %v4833_v61 }
0x162f   :  { %1222 = vrot.lane.b32.xlu0 %v1220_v5, %s4006_s23 }
0x1630   :  { %3596 = vmatpush3.bf16.msra.mxu0 %v4833_v61 }
0x1631   :  { %3598 = vmatprep.subr.bf16.mxu0 %v4846_v20 }
0x1633   :  { %854 = vrot.lane.b32.xlu0 %v852_v12, %s4006_s23  ;;  %v1781_v55 = vld [vmem:[#allocation4 + $0x8] sm:$0xff] }
0x1634   :  { %1798 = vrot.lane.b32.xlu1 %v1781_v55, %s4004_s5  ;;  %3600 = vmatpush3.bf16.msra.mxu0 %v4846_v20 }
0x1635   :  { %3602 = vmatprep.subr.bf16.mxu0 %v4856_v8 }
0x1637   :  { %668 = vrot.lane.b32.xlu0 %v666_v2, %s4006_s23 }
0x1638   :  { %3604 = vmatpush3.bf16.msra.mxu0 %v4856_v8 }
0x163b   :  { %476 = vrot.lane.b32.xlu0 %v474_v21, %s4006_s23 }
0x163c   :  { %v4816_v14 = vpop.permute.xlu1 %1725 }
0x163d   :  { %vm1727_vm4 = vcmp.eq.s32.totalorder %v4816_v14, 1 }
0x163f   :  { %847 = vrot.lane.b32.xlu0 %v845_v59, %s4006_s23 }
0x1640   :  { %v1041_v47 = vpop.permute.xlu1 %1040 }
0x1641   :  { %1044 = vst.msk [vmem:[#allocation4 + $0x20] sm:$0xff] %vm463_vm6, %v1041_v47 }
0x1643   :  { %1215 = vrot.lane.b32.xlu0 %v1213_v38, %s4006_s23 }
0x1644   :  { %v1698_v40 = vpop.permute.xlu1 %1697 }
0x1645   :  { %v4838_v51 = vmul.f32 %v1698_v40, %v4744_v36 }
0x1647   :  { %1397 = vrot.lane.b32.xlu0 %v1395_v52, %s4006_s23  ;;  %v1759_v48 = vsel %vm1727_vm4, %v4838_v51, 0.0 }
0x1648   :  { %v483_v28 = vpop.permute.xlu1 %482  ;;  %v1784_v39 = vld [vmem:[#allocation4 + $0x20] sm:$0xff] }
0x1649   :  { %486 = vst.msk [vmem:[#allocation4 + $0x38] sm:$0xff] %vm463_vm6, %v483_v28 }
0x164b   :  { %1579 = vrot.lane.b32.xlu0 %v1577_v30, %s4006_s23 }
0x164c   :  { %v662_v9 = vpop.permute.xlu1 %661 }
0x164d   :  { %665 = vst.msk [vmem:[#allocation3 + $0x8] sm:$0xff] %vm463_vm6, %v662_v9 }
0x164f   :  { %1761 = vrot.lane.b32.xlu0 %v1759_v48, %s4006_s23 }
0x1650   :  { %v1034_v36 = vpop.permute.xlu1 %1033  ;;  %v1787_v42 = vld [vmem:[#allocation4 + $0x38] sm:$0xff] }
0x1651   :  { %1037 = vst.msk [vmem:[#allocation3 + $0x18] sm:$0xff] %vm463_vm6, %v1034_v36 }
0x1653   :  { %1804 = vrot.lane.b32.xlu0 %v1784_v39, %s4004_s5 }
0x1654   :  { %v1773_v2 = vld [vmem:[#allocation3 + $0x8] sm:$0xff] }
0x1658   :  { %v1775_v13 = vld [vmem:[#allocation3 + $0x18] sm:$0xff] }
0x169d   :  { %v1769_v46 = vpop.permute.xlu0 %1768 }
0x169e   :  { %1771 = vst.msk [vmem:[#allocation4] sm:$0xff] %vm463_vm6, %v1769_v46  ;;  %v3308_v46 = vld [vmem:[%s5351_s10] ss:$0 sm:$0xff] }
0x16a1   :  { %v1223_v34 = vpop.permute.xlu0 %1222 }
0x16a2   :  { %1226 = vst.msk [vmem:[#allocation4 + $0x18] sm:$0xff] %vm463_vm6, %v1223_v34 }
0x16a5   :  { %v855_v4 = vpop.permute.xlu0 %854  ;;  %v1780_v17 = vld [vmem:[#allocation4] sm:$0xff] }
0x16a6   :  { %858 = vst.msk [vmem:[#allocation4 + $0x28] sm:$0xff] %vm463_vm6, %v855_v4  ;;  %1796 = vrot.lane.b32.xlu1 %v1780_v17, %s4004_s5  ;;  %v1799_v5 = vpop.permute.xlu1 %1798 }
0x16a7   :  { %v4883_v59 = vsel %vm463_vm6, %v1773_v2, %v1799_v5 }
0x16a9   :  { %v669_v6 = vpop.permute.xlu0 %668  ;;  %v1783_v54 = vld [vmem:[#allocation4 + $0x18] sm:$0xff] }
0x16aa   :  { %672 = vst.msk [vmem:[#allocation4 + $0x30] sm:$0xff] %vm463_vm6, %v669_v6  ;;  %1800 = vrot.lane.b32.xlu1 %v1782_v35, %s4004_s5 }
0x16ad   :  { %v477_v7 = vpop.permute.xlu0 %476  ;;  %v1785_v49 = vld [vmem:[#allocation4 + $0x28] sm:$0xff] }
0x16ae   :  { %479 = vst.msk [vmem:[#allocation3] sm:$0xff] %vm463_vm6, %v477_v7  ;;  %1802 = vrot.lane.b32.xlu1 %v1783_v54, %s4004_s5 }
0x16b1   :  { %v848_v45 = vpop.permute.xlu0 %847  ;;  %v1786_v25 = vld [vmem:[#allocation4 + $0x30] sm:$0xff] }
0x16b2   :  { %851 = vst.msk [vmem:[#allocation3 + $0x10] sm:$0xff] %vm463_vm6, %v848_v45  ;;  %1806 = vrot.lane.b32.xlu1 %v1785_v49, %s4004_s5  ;;  %1808 = vrot.lane.b32.xlu0 %v1786_v25, %s4004_s5  ;;  %v3317_v25 = vld [vmem:[%s5352_s11] ss:$0 sm:$0xff] }
0x16b5   :  { %v1216_v31 = vpop.permute.xlu0 %1215  ;;  %v1772_v12 = vld [vmem:[#allocation3] sm:$0xff] }
0x16b6   :  { %1219 = vst.msk [vmem:[#allocation3 + $0x20] sm:$0xff] %vm463_vm6, %v1216_v31  ;;  %1810 = vrot.lane.b32.xlu1 %v1787_v42, %s4004_s5 }
0x16b9   :  { %v1398_v3 = vpop.permute.xlu0 %1397  ;;  %v1774_v47 = vld [vmem:[#allocation3 + $0x10] sm:$0xff] }
0x16ba   :  { %1401 = vst.msk [vmem:[#allocation3 + $0x28] sm:$0xff] %vm463_vm6, %v1398_v3 }
0x16bd   :  { %v1580_v43 = vpop.permute.xlu0 %1579  ;;  %v1776_v58 = vld [vmem:[#allocation3 + $0x20] sm:$0xff] }
0x16be   :  { %1583 = vst.msk [vmem:[#allocation3 + $0x30] sm:$0xff] %vm463_vm6, %v1580_v43 }
0x16c1   :  { %v1762_v56 = vpop.permute.xlu0 %1761  ;;  %v1777_v30 = vld [vmem:[#allocation3 + $0x28] sm:$0xff] }
0x16c2   :  { %1765 = vst.msk [vmem:[#allocation3 + $0x38] sm:$0xff] %vm463_vm6, %v1762_v56 }
0x16c5   :  { %v1805_v52 = vpop.permute.xlu0 %1804  ;;  %v1778_v19 = vld [vmem:[#allocation3 + $0x30] sm:$0xff] }
0x16c6   :  { %v4898_v28 = vsel %vm463_vm6, %v1776_v58, %v1805_v52 }
0x16c9   :  { %v1779_v48 = vld [vmem:[#allocation3 + $0x38] sm:$0xff] }
0x1718   :  { %v1797_v55 = vpop.permute.xlu1 %1796 }
0x1719   :  { %v4880_v21 = vsel %vm463_vm6, %v1772_v12, %v1797_v55 }
0x171a   :  { %3390 = vmatprep.mubr.msk.f32.mxu0 %vm5359_vm5, %v4880_v21  ;;  %vm5372_vm5 = vmmov %vm5371_vm1 }
0x171b   :  { %3391 = vmatmul.mubr.msk.f32.vlgmr.msra.gmra.mrb[14].mxu0 %vm5360_vm9, %v4883_v59  ;;  %vm5373_vm9 = vmmov %vm5371_vm1 }
0x171c   :  { %v1801_v38 = vpop.permute.xlu1 %1800 }
0x171d   :  { %v4890_v40 = vsel %vm463_vm6, %v1774_v47, %v1801_v38 }
0x171e   :  { %3393 = vmatprep.mubr.msk.f32.mxu0 %vm5361_vm10, %v4890_v40  ;;  %vm5374_vm10 = vmmov %vm5371_vm1 }
0x1720   :  { %v1803_v44 = vpop.permute.xlu1 %1802 }
0x1721   :  { %v4895_v10 = vsel %vm463_vm6, %v1775_v13, %v1803_v44 }
0x1722   :  { %3394 = vmatmul.mubr.msk.f32.gmra.mrb[16].mxu0 %vm5362_vm13, %v4895_v10  ;;  %vm2090_vm13 = vcmask 7168  }
0x1723   :  { %3396 = vmatprep.mubr.msk.f32.mxu0 %vm5363_vm14, %v4898_v28  ;;  %vm4009_vm14 = vmmov 0  }
0x1724   :  { %v1809_v22 = vpop.permute.xlu0 %1808  ;;  %v1807_v9 = vpop.permute.xlu1 %1806 }
0x1725   :  { %v4905_v60 = vsel %vm463_vm6, %v1778_v19, %v1809_v22  ;;  %v4908_v62 = vsel %vm463_vm6, %v1777_v30, %v1807_v9 }
0x1726   :  { %3397 = vmatmul.mubr.msk.f32.gmra.mrb[18].mxu0 %vm5364_vm3, %v4908_v62  ;;  %vm5375_vm3 = vmmov %vm5371_vm1 }
0x1727   :  { %3399 = vmatprep.mubr.msk.f32.mxu0 %vm5365_vm7, %v4905_v60  ;;  %vm5376_vm7 = vmmov %vm5371_vm1 }
0x1728   :  { %v1811_v36 = vpop.permute.xlu1 %1810 }
0x1729   :  { %v4915_v39 = vsel %vm463_vm6, %v1779_v48, %v1811_v36 }
0x172a   :  { %3400 = vmatmul.mubr.msk.f32.gmra.mrb[20].mxu0 %vm5366_vm8, %v4915_v39  ;;  %vm5377_vm8 = vmmov %vm5371_vm1 }
0x172b   :  { %3418 = vmatprep.mubr.msk.f32.mxu0 %vm4009_vm14, %v4003_v0 }
0x17ee   :  { %v3392_v34 = vpop.f32.mrb[14].mxu0 }
0x17ef   :  { %v1930_v4 = vadd.f32 %v3392_v34, %v3308_v46  ;;  %v1924_v17 = vpop.f32.mrb[15].mxu0 }
0x17f0   :  { %v1925_v6 = vadd.f32 %v3308_v46, %v1924_v17 }
0x17f1   :  { %3798 = vtanh.f32 %v1930_v4 }
0x17f2   :  { %3800 = vtanh.f32 %v1925_v6 }
0x17f5   :  { %v3395_v35 = vpop.f32.mrb[16].mxu0 }
0x17f6   :  { %v1940_v7 = vadd.f32 %v3395_v35, %v3308_v46  ;;  %v1934_v54 = vpop.f32.mrb[17].mxu0 }
0x17f7   :  { %v1935_v45 = vadd.f32 %v3308_v46, %v1934_v54 }
0x17f8   :  { %3802 = vtanh.f32 %v1940_v7 }
0x17f9   :  { %3804 = vtanh.f32 %v1935_v45  ;;  %v3398_v49 = vpop.f32.mrb[18].mxu0 }
0x17fa   :  { %v1950_v31 = vadd.f32 %v3398_v49, %v3308_v46  ;;  %v1944_v42 = vpop.f32.mrb[19].mxu0 }
0x17fb   :  { %v3799_v3 = vpop.eup %3798  ;;  %v1945_v43 = vadd.f32 %v3308_v46, %v1944_v42 }
0x17fc   :  { %v3801_v56 = vpop.eup %3800  ;;  %3806 = vtanh.f32 %v1950_v31  ;;  %v1978_v5 = vmul.f32 %v3799_v3, %v3317_v25 }
0x17fd   :  { %3808 = vtanh.f32 %v1945_v43  ;;  %v3401_v12 = vpop.f32.mrb[20].mxu0  ;;  %v1977_v55 = vmul.f32 %v3801_v56, %v3317_v25 }
0x17fe   :  { %v1960_v2 = vadd.f32 %v3401_v12, %v3308_v46  ;;  %v1954_v47 = vpop.f32.mrb[21].mxu0  ;;  %v1988_v38 = vsel %vm5367_vm11, %v1978_v5, 0.0  ;;  %vm5378_vm11 = vmmov %vm5371_vm1 }
0x17ff   :  { %v1955_v52 = vadd.f32 %v3308_v46, %v1954_v47  ;;  %1989 = vadd.xlane.f32.xlu1 %v1988_v38  ;;  %v1985_v13 = vsel %vm5368_vm12, %v1977_v55, 0.0  ;;  %vm5379_vm12 = vmmov %vm5371_vm1 }
0x1800   :  { %3810 = vtanh.f32 %v1960_v2  ;;  %1986 = vadd.xlane.f32.xlu0 %v1985_v13 }
0x1801   :  { %3812 = vtanh.f32 %v1955_v52 }
0x1802   :  { %v3803_v44 = vpop.eup %3802 }
0x1803   :  { %v3805_v58 = vpop.eup %3804  ;;  %v1980_v9 = vmul.f32 %v3803_v44, %v3317_v25 }
0x1804   :  { %v1979_v19 = vmul.f32 %v3805_v58, %v3317_v25 }
0x1805   :  { %v1994_v4 = vsel %vm5370_vm2, %v1980_v9, 0.0  ;;  %vm5381_vm2 = vmmov %vm5371_vm1 }
0x1806   :  { %v3807_v22 = vpop.eup %3806  ;;  %v1991_v30 = vsel %vm5369_vm15, %v1979_v19, 0.0  ;;  %vm5380_vm15 = vmmov %vm5371_vm1 }
0x1807   :  { %v3809_v48 = vpop.eup %3808  ;;  %1992 = vadd.xlane.f32.xlu0 %v1991_v30  ;;  %v1982_v17 = vmul.f32 %v3807_v22, %v3317_v25 }
0x1808   :  { %v1981_v36 = vmul.f32 %v3809_v48, %v3317_v25 }
0x1809   :  { %v2000_v7 = vsel %vm5372_vm5, %v1982_v17, 0.0  ;;  %vm5382_vm5 = vmmov %vm5371_vm1 }
0x180a   :  { %v3811_v34 = vpop.eup %3810  ;;  %v1997_v46 = vsel %vm5371_vm1, %v1981_v36, 0.0 }
0x180b   :  { %v3813_v6 = vpop.eup %3812  ;;  %1995 = vadd.xlane.f32.xlu0 %v1994_v4  ;;  %1998 = vadd.xlane.f32.xlu1 %v1997_v46  ;;  %v1984_v45 = vmul.f32 %v3811_v34, %v3317_v25 }
0x180c   :  { %v1983_v35 = vmul.f32 %v3813_v6, %v3317_v25 }
0x180d   :  { %v2006_v49 = vsel %vm5374_vm10, %v1984_v45, 0.0  ;;  %vm5383_vm10 = vmmov %vm5371_vm1 }
0x180e   :  { %v2003_v54 = vsel %vm5373_vm9, %v1983_v35, 0.0  ;;  %vm2318_vm9 = vcmask 64512  }
0x180f   :  { %2001 = vadd.xlane.f32.xlu0 %v2000_v7  ;;  %2004 = vadd.xlane.f32.xlu1 %v2003_v54 }
0x1813   :  { %2007 = vadd.xlane.f32.xlu0 %v2006_v49 }
0x188c   :  { %v1990_v31 = vpop.xlane.xlu1 %1989 }
0x188d   :  { %v2016_v42 = vrot.slane %v1990_v31, 4  ;;  %v1987_v3 = vpop.xlane.xlu0 %1986 }
0x188e   :  { %v2010_v43 = vrot.slane %v1987_v3, 4 }
0x188f   :  { %v2017_v56 = vmax.f32 %v1990_v31, %v2016_v42 }
0x1890   :  { %v2011_v5 = vmax.f32 %v1987_v3, %v2010_v43 }
0x1891   :  { %v2018_v12 = vrot.slane %v2017_v56, 2 }
0x1892   :  { %v2012_v55 = vrot.slane %v2011_v5, 2 }
0x1893   :  { %v2019_v2 = vmax.f32 %v2017_v56, %v2018_v12 }
0x1894   :  { %v2013_v47 = vmax.f32 %v2011_v5, %v2012_v55  ;;  %v1993_v38 = vpop.xlane.xlu0 %1992 }
0x1895   :  { %v2020_v52 = vrot.slane %v2019_v2, 1  ;;  %v2022_v13 = vrot.slane %v1993_v38, 4 }
0x1896   :  { %v2014_v44 = vrot.slane %v2013_v47, 1 }
0x1897   :  { %v2021_v25 = vmax.f32 %v2019_v2, %v2020_v52  ;;  %v2023_v58 = vmax.f32 %v1993_v38, %v2022_v13 }
0x1898   :  { %v2015_v19 = vmax.f32 %v2013_v47, %v2014_v44  ;;  %v1996_v22 = vpop.xlane.xlu0 %1995  ;;  %v1999_v30 = vpop.xlane.xlu1 %1998 }
0x1899   :  { %v2059_v9 = vsub.f32 %v1990_v31, %v2021_v25  ;;  %v2024_v48 = vrot.slane %v2023_v58, 2  ;;  %v2028_v36 = vrot.slane %v1996_v22, 4  ;;  %v2034_v34 = vrot.slane %v1999_v30, 4 }
0x189a   :  { %v2058_v4 = vsub.f32 %v1987_v3, %v2015_v19 }
0x189b   :  { %v2068_v46 = vmul.f32 1.442695, %v2059_v9  ;;  %v2025_v17 = vmax.f32 %v2023_v58, %v2024_v48  ;;  %v2029_v6 = vmax.f32 %v1996_v22, %v2028_v36  ;;  %v2035_v35 = vmax.f32 %v1999_v30, %v2034_v34 }
0x189c   :  { %v2066_v7 = vmul.f32 1.442695, %v2058_v4  ;;  %v2002_v54 = vpop.xlane.xlu0 %2001  ;;  %v2005_v45 = vpop.xlane.xlu1 %2004 }
0x189d   :  { %3814 = vpow2.f32 %v2068_v46  ;;  %v2026_v49 = vrot.slane %v2025_v17, 1  ;;  %v2030_v42 = vrot.slane %v2029_v6, 2  ;;  %v2036_v43 = vrot.slane %v2035_v35, 2 }
0x189e   :  { %3816 = vpow2.f32 %v2066_v7  ;;  %v2040_v56 = vrot.slane %v2002_v54, 4  ;;  %v2046_v5 = vrot.slane %v2005_v45, 4 }
0x189f   :  { %v2027_v12 = vmax.f32 %v2025_v17, %v2026_v49  ;;  %v2031_v31 = vmax.f32 %v2029_v6, %v2030_v42  ;;  %v2037_v55 = vmax.f32 %v2035_v35, %v2036_v43 }
0x18a0   :  { %v2041_v2 = vmax.f32 %v2002_v54, %v2040_v56  ;;  %v2047_v47 = vmax.f32 %v2005_v45, %v2046_v5  ;;  %v2008_v3 = vpop.xlane.xlu0 %2007 }
0x18a1   :  { %v2060_v52 = vsub.f32 %v1993_v38, %v2027_v12  ;;  %v2032_v13 = vrot.slane %v2031_v31, 1  ;;  %v2038_v44 = vrot.slane %v2037_v55, 1  ;;  %v2052_v25 = vrot.slane %v2008_v3, 4 }
0x18a2   :  { %v2042_v58 = vrot.slane %v2041_v2, 2  ;;  %v2048_v19 = vrot.slane %v2047_v47, 2 }
0x18a3   :  { %v2070_v9 = vmul.f32 1.442695, %v2060_v52  ;;  %v2033_v48 = vmax.f32 %v2031_v31, %v2032_v13  ;;  %v2039_v36 = vmax.f32 %v2037_v55, %v2038_v44  ;;  %v2053_v34 = vmax.f32 %v2008_v3, %v2052_v25 }
0x18a4   :  { %v2043_v4 = vmax.f32 %v2041_v2, %v2042_v58  ;;  %v2049_v46 = vmax.f32 %v2047_v47, %v2048_v19 }
0x18a5   :  { %3818 = vpow2.f32 %v2070_v9  ;;  %v2061_v7 = vsub.f32 %v1996_v22, %v2033_v48  ;;  %v2062_v17 = vsub.f32 %v1999_v30, %v2039_v36  ;;  %v2054_v6 = vrot.slane %v2053_v34, 2 }
0x18a6   :  { %v2044_v35 = vrot.slane %v2043_v4, 1  ;;  %v2050_v49 = vrot.slane %v2049_v46, 1 }
0x18a7   :  { %v3815_v42 = vpop.eup %3814  ;;  %v2072_v43 = vmul.f32 1.442695, %v2061_v7  ;;  %v2074_v38 = vmul.f32 1.442695, %v2062_v17  ;;  %v2055_v56 = vmax.f32 %v2053_v34, %v2054_v6 }
0x18a8   :  { %v3817_v5 = vpop.eup %3816  ;;  %v2045_v12 = vmax.f32 %v2043_v4, %v2044_v35  ;;  %v2051_v63 = vmax.f32 %v2049_v46, %v2050_v49  ;;  %v4934_v31 = vmul.f32 %v3815_v42, %v4739_v18 }
0x18a9   :  { %3820 = vpow2.f32 %v2072_v43  ;;  %v2056_v55 = vrot.slane %v2055_v56, 1  ;;  %v4937_v2 = vmul.f32 %v3817_v5, %v4739_v18 }
0x18aa   :  { %3822 = vpow2.f32 %v2074_v38  ;;  %v2063_v22 = vsub.f32 %v2002_v54, %v2045_v12  ;;  %v2064_v30 = vsub.f32 %v2005_v45, %v2051_v63  ;;  %v2098_v47 = vsel %vm2090_vm13, %v4934_v31, 0.0 }
0x18ab   :  { %v2057_v52 = vmax.f32 %v2055_v56, %v2056_v55  ;;  %v2099_v13 = vrot.slane %v2098_v47, 4  ;;  %v2091_v44 = vsel %vm2090_vm13, %v4937_v2, 0.0 }
0x18ac   :  { %v2076_v25 = vmul.f32 1.442695, %v2063_v22  ;;  %v2078_v58 = vmul.f32 1.442695, %v2064_v30  ;;  %v2092_v19 = vrot.slane %v2091_v44, 4 }
0x18ad   :  { %v2065_v9 = vsub.f32 %v2008_v3, %v2057_v52  ;;  %v2100_v48 = vadd.f32 %v2099_v13, %v2098_v47 }
0x18ae   :  { %3824 = vpow2.f32 %v2076_v25  ;;  %v2093_v36 = vadd.f32 %v2092_v19, %v2091_v44 }
0x18af   :  { %v3819_v34 = vpop.eup %3818  ;;  %3826 = vpow2.f32 %v2078_v58  ;;  %v2080_v4 = vmul.f32 1.442695, %v2065_v9  ;;  %v2101_v54 = vrot.slane %v2100_v48, 2 }
0x18b0   :  { %v2094_v63 = vrot.slane %v2093_v36, 2  ;;  %v4944_v45 = vmul.f32 %v3819_v34, %v4739_v18 }
0x18b1   :  { %3828 = vpow2.f32 %v2080_v4  ;;  %v2102_v46 = vadd.f32 %v2101_v54, %v2100_v48 }
0x18b2   :  { %v2095_v7 = vadd.f32 %v2094_v63, %v2093_v36  ;;  %v2105_v17 = vsel %vm2090_vm13, %v4944_v45, 0.0 }
0x18b3   :  { %v3821_v6 = vpop.eup %3820  ;;  %v2103_v35 = vrot.slane %v2102_v46, 1  ;;  %v2106_v3 = vrot.slane %v2105_v17, 4 }
0x18b4   :  { %v3823_v49 = vpop.eup %3822  ;;  %v2096_v42 = vrot.slane %v2095_v7, 1  ;;  %v4949_v43 = vmul.f32 %v3821_v6, %v4739_v18 }
0x18b5   :  { %v2104_v38 = vadd.f32 %v2103_v35, %v2102_v46  ;;  %v2107_v56 = vadd.f32 %v2106_v3, %v2105_v17  ;;  %v4952_v5 = vmul.f32 %v3823_v49, %v4739_v18 }
0x18b6   :  { %v2097_v12 = vadd.f32 %v2096_v42, %v2095_v7  ;;  %v2112_v55 = vsel %vm2090_vm13, %v4949_v43, 0.0 }
0x18b7   :  { %3830 = vrcp.f32 %v2104_v38  ;;  %v2108_v22 = vrot.slane %v2107_v56, 2  ;;  %v2113_v30 = vrot.slane %v2112_v55, 4  ;;  %v2119_v47 = vsel %vm2090_vm13, %v4952_v5, 0.0 }
0x18b8   :  { %v3825_v52 = vpop.eup %3824  ;;  %3832 = vrcp.f32 %v2097_v12  ;;  %v2120_v13 = vrot.slane %v2119_v47, 4 }
0x18b9   :  { %v3827_v44 = vpop.eup %3826  ;;  %v2109_v25 = vadd.f32 %v2108_v22, %v2107_v56  ;;  %v2114_v58 = vadd.f32 %v2113_v30, %v2112_v55  ;;  %v4959_v19 = vmul.f32 %v3825_v52, %v4739_v18 }
0x18ba   :  { %v2121_v9 = vadd.f32 %v2120_v13, %v2119_v47  ;;  %v4962_v48 = vmul.f32 %v3827_v44, %v4739_v18 }
0x18bb   :  { %v3829_v36 = vpop.eup %3828  ;;  %v2110_v34 = vrot.slane %v2109_v25, 1  ;;  %v2115_v4 = vrot.slane %v2114_v58, 2  ;;  %v2126_v54 = vsel %vm2090_vm13, %v4959_v19, 0.0 }
0x18bc   :  { %v2122_v63 = vrot.slane %v2121_v9, 2  ;;  %v2127_v46 = vrot.slane %v2126_v54, 4  ;;  %v2133_v7 = vsel %vm2090_vm13, %v4962_v48, 0.0  ;;  %v4969_v17 = vmul.f32 %v3829_v36, %v4739_v18 }
0x18bd   :  { %v2111_v6 = vadd.f32 %v2110_v34, %v2109_v25  ;;  %v2116_v35 = vadd.f32 %v2115_v4, %v2114_v58  ;;  %v2134_v3 = vrot.slane %v2133_v7, 4 }
0x18be   :  { %v2123_v49 = vadd.f32 %v2122_v63, %v2121_v9  ;;  %v2128_v42 = vadd.f32 %v2127_v46, %v2126_v54  ;;  %v2140_v38 = vsel %vm2090_vm13, %v4969_v17, 0.0 }
0x18bf   :  { %3834 = vrcp.f32 %v2111_v6  ;;  %v2117_v56 = vrot.slane %v2116_v35, 1  ;;  %v2135_v12 = vadd.f32 %v2134_v3, %v2133_v7  ;;  %v2141_v55 = vrot.slane %v2140_v38, 4 }
0x18c0   :  { %v2124_v22 = vrot.slane %v2123_v49, 1  ;;  %v2129_v30 = vrot.slane %v2128_v42, 2 }
0x18c1   :  { %v3831_v47 = vpop.eup %3830  ;;  %v2118_v52 = vadd.f32 %v2117_v56, %v2116_v35  ;;  %v2136_v13 = vrot.slane %v2135_v12, 2  ;;  %v2142_v44 = vadd.f32 %v2141_v55, %v2140_v38 }
0x18c2   :  { %v3833_v18 = vpop.eup %3832  ;;  %v2150_v25 = vmul.f32 %v3831_v47, %v4934_v31  ;;  %v2125_v58 = vadd.f32 %v2124_v22, %v2123_v49  ;;  %v2130_v36 = vadd.f32 %v2129_v30, %v2128_v42  ;;  %v2234_v30 = vld [vmem:[%s5353_s12] sm:$0xff]  ;;  %v2235_v47 = vld [vmem:[%s5353_s12 + $0x8] sm:$0xff] }
0x18c3   :  { %v2148_v9 = vmul.f32 %v3833_v18, %v4937_v2  ;;  %3836 = vrcp.f32 %v2118_v52  ;;  %v2137_v34 = vadd.f32 %v2136_v13, %v2135_v12  ;;  %v2143_v4 = vrot.slane %v2142_v44, 2 }
0x18c4   :  { %v2164_v54 = vadd.f32 1e-08, %v2150_v25  ;;  %3838 = vrcp.f32 %v2125_v58  ;;  %v2131_v63 = vrot.slane %v2130_v36, 1  ;;  %v3606_v13 = vpack.c.bf16 %v2235_v47, %v2234_v30  ;;  %v2236_v25 = vld [vmem:[%s5353_s12 + $0x10] sm:$0xff]  ;;  %v2237_v58 = vld [vmem:[%s5353_s12 + $0x18] sm:$0xff] }
0x18c5   :  { %v2163_v46 = vadd.f32 1e-08, %v2148_v9  ;;  %v2138_v7 = vrot.slane %v2137_v34, 1  ;;  %v2144_v6 = vadd.f32 %v2143_v4, %v2142_v44  ;;  %v4008_v44 = vmov 0.0|0.0  }
0x18c6   :  { %2178 = vperm.xlu0 %3701, %v2164_v54   ;;  %v2132_v35 = vadd.f32 %v2131_v63, %v2130_v36  ;;  %3605 = vmatprep.subr.bf16.mxu0 %v4008_v44  ;;  %v3609_v9 = vpack.c.bf16 %v2237_v58, %v2236_v25 }
0x18c7   :  { %2173 = vperm.xlu1 %3700, %v2163_v46   ;;  %v2139_v3 = vadd.f32 %v2138_v7, %v2137_v34  ;;  %v2145_v38 = vrot.slane %v2144_v6, 1  ;;  %3607 = vmatpush3.bf16.msra.mxu0 %v3606_v13  ;;  %v2239_v46 = vld [vmem:[%s5353_s12 + $0x28] sm:$0xff] }
0x18c8   :  { %3840 = vrcp.f32 %v2132_v35  ;;  %3608 = vmatprep.subr.bf16.mxu0 %v4008_v44 }
0x18c9   :  { %v3835_v31 = vpop.eup %3834  ;;  %3842 = vrcp.f32 %v2139_v3  ;;  %v2146_v49 = vadd.f32 %v2145_v38, %v2144_v6  ;;  %v2241_v6 = vld [vmem:[%s5353_s12 + $0x38] sm:$0xff] }
0x18ca   :  { %v2152_v2 = vmul.f32 %v3835_v31, %v4944_v45 }
0x18cb   :  { %3844 = vrcp.f32 %v2146_v49  ;;  %3610 = vmatpush3.bf16.msra.mxu0 %v3609_v9 }
0x18cc   :  { %v2165_v42 = vadd.f32 1e-08, %v2152_v2  ;;  %3611 = vmatprep.subr.bf16.mxu0 %v4008_v44 }
0x18cd   :  { %v3837_v56 = vpop.eup %3836 }
0x18ce   :  { %v3839_v12 = vpop.eup %3838  ;;  %2183 = vperm.xlu1 %3700, %v2165_v42   ;;  %v2154_v55 = vmul.f32 %v3837_v56, %v4949_v43 }
0x18cf   :  { %v2156_v22 = vmul.f32 %v3839_v12, %v4952_v5 }
0x18d0   :  { %v2166_v52 = vadd.f32 1e-08, %v2154_v55 }
0x18d1   :  { %v2167_v45 = vadd.f32 1e-08, %v2156_v22 }
0x18d2   :  { %v3841_v18 = vpop.eup %3840  ;;  %2188 = vperm.xlu1 %3700, %v2166_v52  }
0x18d3   :  { %v3843_v43 = vpop.eup %3842  ;;  %2193 = vperm.xlu0 %3701, %v2167_v45   ;;  %v2158_v5 = vmul.f32 %v3841_v18, %v4959_v19  ;;  %v2238_v19 = vld [vmem:[%s5353_s12 + $0x20] sm:$0xff] }
0x18d4   :  { %v2160_v36 = vmul.f32 %v3843_v43, %v4962_v48  ;;  %v3612_v7 = vpack.c.bf16 %v2239_v46, %v2238_v19  ;;  %v2317_v46 = vld [vmem:[%s5343_s2 + $0x10] sm:$0xff] }
0x18d5   :  { %v3845_v34 = vpop.eup %3844  ;;  %v2168_v4 = vadd.f32 1e-08, %v2158_v5 }
0x18d6   :  { %v2169_v54 = vadd.f32 1e-08, %v2160_v36  ;;  %v2162_v63 = vmul.f32 %v3845_v34, %v4969_v17  ;;  %3613 = vmatpush3.bf16.msra.mxu0 %v3612_v7  ;;  %v2240_v17 = vld [vmem:[%s5353_s12 + $0x30] sm:$0xff] }
0x18d7   :  { %2198 = vperm.xlu1 %3700, %v2168_v4   ;;  %3614 = vmatprep.subr.bf16.mxu0 %v4008_v44  ;;  %v3615_v35 = vpack.c.bf16 %v2241_v6, %v2240_v17 }
0x18d8   :  { %2203 = vperm.xlu0 %3701, %v2169_v54   ;;  %v2170_v48 = vadd.f32 1e-08, %v2162_v63 }
0x18da   :  { %3616 = vmatpush3.bf16.msra.mxu0 %v3615_v35 }
0x18db   :  { %2208 = vperm.xlu1 %3700, %v2170_v48   ;;  %3421 = vmatprep.subr.mxu0 %v4003_v0  ;;  %v5054_v48 = vld [vmem:[#allocation10] sm:$0xff] }
0x1945   :  { %v2179_v3 = vpop.permute.xlu0 %2178 }
0x1946   :  { %v2174_v38 = vpop.permute.xlu1 %2173  ;;  %v2212_v31 = vmul.f32 %v2179_v3, %v4883_v59 }
0x1947   :  { %v2211_v49 = vmul.f32 %v2174_v38, %v4880_v21 }
0x1948   :  { %v2220_v42 = vsel %vm5375_vm3, %v2212_v31, 0.0  ;;  %vm5384_vm3 = vcmask 130048  }
0x1949   :  { %v2219_v56 = vsel %vm5376_vm7, %v2211_v49, 0.0  ;;  %vm5385_vm7 = vmmov %vm5384_vm3 }
0x194a   :  { %v2221_v22 = vadd.f32 %v2220_v42, %v2219_v56 }
0x194d   :  { %v2184_v2 = vpop.permute.xlu1 %2183 }
0x194e   :  { %v2213_v12 = vmul.f32 %v2184_v2, %v4890_v40 }
0x1950   :  { %v2222_v55 = vsel %vm5377_vm8, %v2213_v12, 0.0  ;;  %vm5386_vm8 = vmmov %vm5384_vm3 }
0x1951   :  { %v2189_v30 = vpop.permute.xlu1 %2188  ;;  %v2223_v13 = vadd.f32 %v2222_v55, %v2221_v22 }
0x1952   :  { %v2194_v47 = vpop.permute.xlu0 %2193  ;;  %v2214_v52 = vmul.f32 %v2189_v30, %v4895_v10 }
0x1953   :  { %v2215_v45 = vmul.f32 %v2194_v47, %v4898_v28  ;;  %v5092_v47 = vld [vmem:[%s5344_s3] sm:$0xff] }
0x1954   :  { %v2224_v59 = vsel %vm5378_vm11, %v2214_v52, 0.0  ;;  %vm2509_vm11 = vcmp.gt.f32.partialorder %v5092_v47, 0.5 }
0x1955   :  { %v2225_v21 = vadd.f32 %v2224_v59, %v2223_v13  ;;  %v2226_v18 = vsel %vm5379_vm12, %v2215_v45, 0.0 }
0x1956   :  { %v2199_v43 = vpop.permute.xlu1 %2198 }
0x1957   :  { %v2204_v5 = vpop.permute.xlu0 %2203  ;;  %v2227_v25 = vadd.f32 %v2226_v18, %v2225_v21  ;;  %v2216_v40 = vmul.f32 %v2199_v43, %v4908_v62  ;;  %v5387_v21 = vmov 0  }
0x1958   :  { %v2217_v58 = vmul.f32 %v2204_v5, %v4905_v60  ;;  %v2315_v60 = vld [vmem:[%s5343_s2] sm:$0xff]  ;;  %v5097_v18 = vsel %vm2509_vm11, 1, %v5387_v21  ;;  %v3325_v5 = vld [vmem:[%s5344_s3 + $0x10] sm:$0xff]  ;;  %vm5392_vm11 = vmmov %vm5371_vm1 }
0x1959   :  { %v2228_v36 = vsel %vm5380_vm15, %v2216_v40, 0.0  ;;  %vm2512_vm12 = vcmp.gt.f32.partialorder %v3325_v5, 0.5 }
0x195a   :  { %v2229_v9 = vadd.f32 %v2228_v36, %v2227_v25  ;;  %v2209_v34 = vpop.permute.xlu1 %2208  ;;  %v2230_v10 = vsel %vm5381_vm2, %v2217_v58, 0.0  ;;  %v5105_v36 = vsel %vm2512_vm12, 1, %v5387_v21 }
0x195b   :  { %v2218_v28 = vmul.f32 %v2209_v34, %v4915_v39  ;;  %v2316_v39 = vld [vmem:[%s5343_s2 + $0x8] sm:$0xff] }
0x195c   :  { %v2231_v4 = vadd.f32 %v2230_v10, %v2229_v9 }
0x195d   :  { %v2232_v54 = vsel %vm5371_vm1, %v2218_v28, 0.0 }
0x195e   :  { %v2233_v63 = vadd.f32 %v2232_v54, %v2231_v4 }
0x1960   :  { %3419 = vmatmul.mubr.msk.f32.vlgmr.msra.gmra.mrb[22].mxu0 %vm5382_vm5, %v2233_v63  ;;  %vm5388_vm5 = vmmov %vm5371_vm1 }
0x1961   :  { %3423 = vmatprep.mubr.msk.f32.mxu0 %vm4009_vm14, %v4003_v0 }
0x1a33   :  { %v2311_v62 = vpop.f32.mrb[22].mxu0 }
0x1a34   :  { %v3420_v19 = vpop.f32.mrb[23].mxu0  ;;  %3422 = vmatpush3.msra.mxu0 %v2311_v62 }
0x1a35   :  { %3424 = vmatmul.mubr.msk.f32.vlgmr.msra.gmra.mrb[24].mxu0 %vm2318_vm9, %v2315_v60  ;;  %3622 = vmatprep.subr.bf16.mxu0 %v4148_v11 }
0x1a36   :  { %3426 = vmatprep.mubr.msk.f32.mxu0 %vm4009_vm14, %v4003_v0  ;;  %3624 = vmatpush1.bf16.msra.mxu0 %v4161_v15 }
0x1a37   :  { %3626 = vmatprep.subr.bf16.mxu0 %v4165_v16 }
0x1a39   :  { %3427 = vmatmul.mubr.msk.f32.gmra.mrb[26].mxu0 %vm2318_vm9, %v2316_v39 }
0x1a3a   :  { %3429 = vmatprep.mubr.msk.f32.mxu0 %vm4009_vm14, %v4003_v0  ;;  %3628 = vmatpush1.bf16.msra.mxu0 %v4189_v23 }
0x1a3b   :  { %3630 = vmatprep.subr.bf16.mxu0 %v4195_v26 }
0x1a3d   :  { %3430 = vmatmul.mubr.msk.f32.gmra.mrb[28].mxu0 %vm2318_vm9, %v2317_v46  ;;  %vm5389_vm9 = vmmov %vm5371_vm1 }
0x1a3e   :  { %3632 = vmatpush1.bf16.msra.mxu0 %v4223_v32  ;;  %2582 = vmatprep.mubr.f32.mxu0 %v4003_v0 }
0x1a3f   :  { %3634 = vmatprep.subr.bf16.mxu0 %v4226_v33 }
0x1a42   :  { %3636 = vmatpush1.bf16.msra.mxu0 %v4242_v37 }
0x1a43   :  { %3654 = vmatprep.subr.bf16.mxu0 %v4148_v11 }
0x1a45   :  { %3326 = vmatmul.mubr.msk.f32.vlgmr.msra.gmra.mrb[30].mxu0 %vm5383_vm10, %v5054_v48 }
0x1a46   :  { %3656 = vmatpush1.bf16.msra.mxu0 %v4161_v15  ;;  %2941 = vmatprep.mubr.f32.mxu0 %v4003_v0 }
0x1a47   :  { %3658 = vmatprep.subr.bf16.mxu0 %v4165_v16 }
0x1a4a   :  { %3660 = vmatpush1.bf16.msra.mxu0 %v4189_v23 }
0x1a4b   :  { %3662 = vmatprep.subr.bf16.mxu0 %v4195_v26 }
0x1a4e   :  { %3664 = vmatpush1.bf16.msra.mxu0 %v4223_v32 }
0x1a4f   :  { %3666 = vmatprep.subr.bf16.mxu0 %v4226_v33 }
0x1a52   :  { %3668 = vmatpush1.bf16.msra.mxu0 %v4242_v37 }
0x1b08   :  { %v2394_v11 = vpop.f32.mrb[24].mxu0 }
0x1b09   :  { %3322 = vmatmul.mubr.msk.f32.vlgmr.msra.gmra.mrb[18].mxu1 %vm5384_vm3, %v2394_v11  ;;  %v3425_v7 = vpop.f32.mrb[25].mxu0 }
0x1b0a   :  { %2487 = vmatprep.mubr.f32.mxu1 %v4003_v0  ;;  %3640 = vmatpush1.bf16.msra.mxu1 %v4161_v15 }
0x1b0b   :  { %3642 = vmatprep.subr.bf16.mxu1 %v4165_v16 }
0x1b0c   :  { %v2399_v17 = vpop.f32.mrb[26].mxu0 }
0x1b0d   :  { %3323 = vmatmul.mubr.msk.f32.gmra.mrb[20].mxu1 %vm5385_vm7, %v2399_v17  ;;  %v3428_v6 = vpop.f32.mrb[27].mxu0  ;;  %vm5390_vm7 = vmmov %vm5371_vm1 }
0x1b0e   :  { %2493 = vmatprep.mubr.f32.mxu1 %v4003_v0  ;;  %3644 = vmatpush1.bf16.msra.mxu1 %v4189_v23 }
0x1b0f   :  { %3646 = vmatprep.subr.bf16.mxu1 %v4195_v26 }
0x1b10   :  { %v2404_v35 = vpop.f32.mrb[28].mxu0 }
0x1b11   :  { %3324 = vmatmul.mubr.msk.f32.gmra.mrb[22].mxu1 %vm5386_vm8, %v2404_v35  ;;  %v3431_v3 = vpop.f32.mrb[29].mxu0  ;;  %vm5391_vm8 = vmmov %vm5371_vm1 }
0x1b12   :  { %3648 = vmatpush1.bf16.msra.mxu1 %v4223_v32  ;;  %2763 = vmatprep.mubr.f32.mxu1 %v4003_v0 }
0x1b13   :  { %3650 = vmatprep.subr.bf16.mxu1 %v4226_v33 }
0x1b16   :  { %3652 = vmatpush1.bf16.msra.mxu1 %v4242_v37  ;;  %v2514_v37 = vld [vmem:[#allocation11] sm:$0xff] }
0x1b17   :  { %3669 = vmatprep.subr.bf16.mxu1 %v4008_v44 }
0x1b18   :  { %v2584_v15 = vpop.f32.mrb[30].mxu0 }
0x1b19   :  { %v2586_v16 = vpop.f32.mrb[31].mxu0 }
0x1bdc   :  { %v2483_v38 = vpop.f32.mrb[18].mxu1 }
0x1bdd   :  { %v2484_v23 = vadd.f32 %v2483_v38, %v4284_v53  ;;  %v5081_v26 = vpop.f32.mrb[19].mxu1 }
0x1bdf   :  { %v2590_v31 = vadd.f32 %v2584_v15, %v2484_v23 }
0x1be1   :  { %3846 = vtanh.f32 %v2590_v31  ;;  %v2594_v12 = vmul.f32 0.5, %v2590_v31 }
0x1be4   :  { %v5083_v49 = vpop.f32.mrb[22].mxu1 }
0x1be5   :  { %v2497_v32 = vpop.f32.mrb[23].mxu1 }
0x1be6   :  { %v2498_v2 = vadd.f32 %v2497_v32, %v4289_v57 }
0x1be8   :  { %v2593_v42 = vadd.f32 %v2586_v16, %v2498_v2 }
0x1bea   :  { %3848 = vtanh.f32 %v2593_v42  ;;  %v2620_v55 = vmul.f32 0.5, %v2593_v42 }
0x1beb   :  { %v3847_v33 = vpop.eup %3846  ;;  %3850 = vtanh.f32 %v2594_v12 }
0x1bec   :  { %2605 = vrot.lane.b32.xlu0 %v3847_v33, %s4004_s5  ;;  %3852 = vtanh.f32 %v2620_v55 }
0x1bf0   :  { %2600 = vrot.lane.b32.xlu0 %v2514_v37, %s4004_s5 }
0x1bf4   :  { %v3849_v56 = vpop.eup %3848 }
0x1bf5   :  { %2627 = vrot.lane.b32.xlu1 %v3849_v56, %s4004_s5  ;;  %v3851_v22 = vpop.eup %3850 }
0x1bf6   :  { %v2596_v30 = vmul.f32 0.5, %v3851_v22  ;;  %v3853_v45 = vpop.eup %3852 }
0x1bf7   :  { %v2622_v43 = vmul.f32 0.5, %v3853_v45 }
0x1bf8   :  { %v2597_v52 = vadd.f32 0.5, %v2596_v30 }
0x1bf9   :  { %v2623_v25 = vadd.f32 0.5, %v2622_v43 }
0x1bfb   :  { %v2625_v4 = vmul.f32 %v2623_v25, %v2514_v37 }
0x1c5e   :  { %v2606_v13 = vpop.permute.xlu0 %2605 }
0x1c5f   :  { %v2608_v59 = vmul.f32 %v2606_v13, %v2597_v52  ;;  %v3327_v13 = vld [vmem:[%s5344_s3 + $0x8] sm:$0xff] }
0x1c60   :  { %vm2693_vm10 = vcmp.gt.f32.partialorder %v3327_v13, 0.5 }
0x1c61   :  { %2610 = vrot.lane.b32.xlu1 %v2608_v59, %s4004_s5 }
0x1c62   :  { %v2601_v9 = vpop.permute.xlu0 %2600 }
0x1c63   :  { %v2603_v34 = vmul.f32 %v2601_v9, %v2597_v52 }
0x1c65   :  { %2644 = vperm.xlu1 %3700, %v5097_v18  }
0x1c67   :  { %v2628_v40 = vpop.permute.xlu1 %2627 }
0x1c68   :  { %v2630_v58 = vmul.f32 %v2628_v40, %v2623_v25 }
0x1c6a   :  { %2632 = vrot.lane.b32.xlu0 %v2630_v58, %s4004_s5  ;;  %v2823_v58 = vsel %vm2693_vm10, 1, %v5387_v21  ;;  %vm5397_vm10 = vmmov %vm5371_vm1 }
0x1c6e   :  { %2653 = vperm.xlu0 %3701, %v5105_v36  }
0x1cd3   :  { %v2611_v10 = vpop.permute.xlu1 %2610 }
0x1cd4   :  { %v2613_v28 = vadd.f32 %v2611_v10, %v2603_v34 }
0x1cd6   :  { %3854 = vtanh.f32 %v2613_v28 }
0x1cdc   :  { %v2633_v54 = vpop.permute.xlu0 %2632 }
0x1cdd   :  { %v2635_v63 = vadd.f32 %v2633_v54, %v2625_v4 }
0x1cdf   :  { %3856 = vtanh.f32 %v2635_v63 }
0x1ce0   :  { %v3855_v60 = vpop.eup %3854 }
0x1ce1   :  { %2616 = vrot.lane.b32.xlu1 %v3855_v60, %s4004_s5 }
0x1ce4   :  { %v5114_v19 = vpop.permute.xlu1 %2644 }
0x1ce5   :  { %2647 = vrot.lane.b32.xlu1 %v5054_v48, %s4006_s23  ;;  %vm2646_vm15 = vcmp.eq.s32.totalorder %v5114_v19, 1 }
0x1ce6   :  { %v2670_v6 = vsel %vm2646_vm15, %v2613_v28, %v2601_v9 }
0x1ce9   :  { %v3857_v62 = vpop.eup %3856 }
0x1cea   :  { %2638 = vrot.lane.b32.xlu0 %v3857_v62, %s4004_s5 }
0x1ced   :  { %v5119_v7 = vpop.permute.xlu0 %2653 }
0x1cee   :  { %2656 = vrot.lane.b32.xlu0 %v5054_v48, %s4004_s5  ;;  %vm2655_vm2 = vcmp.eq.s32.totalorder %v5119_v7, 1 }
0x1cef   :  { %v2671_v38 = vsel %vm2655_vm2, %v2635_v63, %v2514_v37 }
0x1d53   :  { %v2617_v39 = vpop.permute.xlu1 %2616 }
0x1d54   :  { %v5116_v46 = vmul.f32 %v2617_v39, %v2597_v52 }
0x1d57   :  { %v2648_v11 = vpop.permute.xlu1 %2647 }
0x1d58   :  { %v2650_v17 = vsel %vm2646_vm15, %v5116_v46, %v2648_v11 }
0x1d59   :  { %2661 = vrot.lane.b32.xlu1 %v2650_v17, %s4006_s23 }
0x1d5c   :  { %v2639_v48 = vpop.permute.xlu0 %2638 }
0x1d5d   :  { %2673 = vrot.lane.b32.xlu1 %v2670_v6, %s4007_s4  ;;  %v5128_v35 = vmul.f32 %v2639_v48, %v2623_v25 }
0x1d60   :  { %v2657_v3 = vpop.permute.xlu0 %2656 }
0x1d61   :  { %v2659_v15 = vsel %vm2655_vm2, %v5128_v35, %v2657_v3 }
0x1d62   :  { %2665 = vrot.lane.b32.xlu0 %v2659_v15, %s4007_s4 }
0x1dcb   :  { %v2662_v16 = vpop.permute.xlu1 %2661 }
0x1dcf   :  { %v2674_v23 = vpop.permute.xlu1 %2673 }
0x1dd0   :  { %v2676_v31 = vsel %vm463_vm6, %v2674_v23, %v2671_v38 }
0x1dd1   :  { %2677 = vst.msk [vmem:[#allocation11] sm:$0xff] %vm5371_vm1, %v2676_v31 }
0x1dd4   :  { %v2666_v32 = vpop.permute.xlu0 %2665 }
0x1dd5   :  { %v2668_v2 = vsel %vm463_vm6, %v2662_v16, %v2666_v32 }
0x1dd6   :  { %2669 = vst.msk [vmem:[#allocation10] sm:$0xff] %vm5388_vm5, %v2668_v2  ;;  %vm5394_vm5 = vmmov %vm5371_vm1 }
0x1ddd   :  { %v2694_v42 = vld [vmem:[#allocation10] sm:$0xff] }
0x1dde   :  { %3328 = vmatmul.mubr.msk.f32.vlgmr.msra.gmra.mrb[20].mxu1 %vm5389_vm9, %v2694_v42  ;;  %vm5396_vm9 = vmmov %vm5371_vm1 }
0x1ddf   :  { %3671 = vmatpush3.bf16.msra.mxu1 %v4831_v1  ;;  %3448 = vmatprep.mubr.msk.f32.mxu1 %vm4009_vm14, %v4003_v0 }
0x1de0   :  { %3672 = vmatprep.subr.bf16.mxu1 %v4008_v44 }
0x1de3   :  { %3674 = vmatpush3.bf16.msra.mxu1 %v4833_v61  ;;  %v2695_v61 = vld [vmem:[#allocation11] sm:$0xff] }
0x1de4   :  { %3675 = vmatprep.subr.bf16.mxu1 %v4008_v44 }
0x1de7   :  { %3677 = vmatpush3.bf16.msra.mxu1 %v4846_v20 }
0x1de8   :  { %3678 = vmatprep.subr.bf16.mxu1 %v4008_v44 }
0x1deb   :  { %3680 = vmatpush3.bf16.msra.mxu1 %v4856_v8 }
0x1eb1   :  { %v2765_v33 = vpop.f32.mrb[20].mxu1 }
0x1eb2   :  { %v3683_v37 = vadd.f32 %v2765_v33, %v4284_v53  ;;  %v2767_v56 = vpop.f32.mrb[21].mxu1 }
0x1eb3   :  { %v3684_v1 = vadd.f32 %v2767_v56, %v4289_v57  ;;  %v2496_v56 = vadd.f32 %v5083_v49, %v4284_v53 }
0x1eb4   :  { %3858 = vtanh.f32 %v3683_v37  ;;  %v2775_v20 = vmul.f32 0.5, %v3683_v37 }
0x1eb5   :  { %3860 = vtanh.f32 %v3684_v1  ;;  %v2801_v44 = vmul.f32 0.5, %v3684_v1  ;;  %v2486_v1 = vadd.f32 %v5081_v26, %v4289_v57 }
0x1eb6   :  { %3862 = vtanh.f32 %v2775_v20 }
0x1eb7   :  { %3864 = vtanh.f32 %v2801_v44 }
0x1ebe   :  { %v3859_v12 = vpop.eup %3858 }
0x1ebf   :  { %v3861_v55 = vpop.eup %3860  ;;  %2786 = vrot.lane.b32.xlu0 %v3859_v12, %s4004_s5 }
0x1ec0   :  { %2808 = vrot.lane.b32.xlu1 %v3861_v55, %s4004_s5  ;;  %v3863_v8 = vpop.eup %3862 }
0x1ec1   :  { %v3865_v22 = vpop.eup %3864  ;;  %v2777_v30 = vmul.f32 0.5, %v3863_v8 }
0x1ec2   :  { %v2803_v52 = vmul.f32 0.5, %v3865_v22 }
0x1ec3   :  { %2781 = vrot.lane.b32.xlu0 %v2695_v61, %s4004_s5  ;;  %v2778_v45 = vadd.f32 0.5, %v2777_v30 }
0x1ec4   :  { %v2804_v43 = vadd.f32 0.5, %v2803_v52 }
0x1ec6   :  { %v2806_v28 = vmul.f32 %v2804_v43, %v2695_v61 }
0x1f31   :  { %v2787_v59 = vpop.permute.xlu0 %2786 }
0x1f32   :  { %v2789_v5 = vmul.f32 %v2787_v59, %v2778_v45  ;;  %v2809_v25 = vpop.permute.xlu1 %2808 }
0x1f33   :  { %v2811_v40 = vmul.f32 %v2809_v25, %v2804_v43 }
0x1f34   :  { %2791 = vrot.lane.b32.xlu1 %v2789_v5, %s4004_s5 }
0x1f35   :  { %2813 = vrot.lane.b32.xlu0 %v2811_v40, %s4004_s5  ;;  %v2782_v9 = vpop.permute.xlu0 %2781  ;;  %v2684_v40 = vsel %vm2655_vm2, %v5128_v35, 0.0 }
0x1f36   :  { %v2784_v34 = vmul.f32 %v2782_v9, %v2778_v45 }
0x1f38   :  { %2825 = vperm.xlu1 %3700, %v2823_v58  }
0x1fa6   :  { %v2792_v10 = vpop.permute.xlu1 %2791 }
0x1fa7   :  { %v2794_v4 = vadd.f32 %v2792_v10, %v2784_v34  ;;  %v2814_v54 = vpop.permute.xlu0 %2813 }
0x1fa8   :  { %v2816_v63 = vadd.f32 %v2814_v54, %v2806_v28 }
0x1fa9   :  { %3866 = vtanh.f32 %v2794_v4 }
0x1faa   :  { %3868 = vtanh.f32 %v2816_v63 }
0x1fb3   :  { %v3867_v60 = vpop.eup %3866 }
0x1fb4   :  { %v3869_v62 = vpop.eup %3868  ;;  %2797 = vrot.lane.b32.xlu0 %v3867_v60, %s4004_s5 }
0x1fb5   :  { %2819 = vrot.lane.b32.xlu1 %v3869_v62, %s4004_s5 }
0x1fb7   :  { %v2826_v21 = vpop.permute.xlu1 %2825 }
0x1fb8   :  { %2828 = vrot.lane.b32.xlu0 %v2694_v42, %s4006_s23  ;;  %vm2827_vm3 = vcmp.eq.s32.totalorder %v2826_v21, 1 }
0x1fb9   :  { %2832 = vrot.lane.b32.xlu1 %v2694_v42, %s4004_s5  ;;  %v2846_v38 = vsel %vm2827_vm3, %v2794_v4, %v2782_v9  ;;  %v2847_v2 = vsel %vm2827_vm3, %v2816_v63, %v2695_v61 }
0x2026   :  { %v2798_v39 = vpop.permute.xlu0 %2797 }
0x2027   :  { %v2820_v11 = vpop.permute.xlu1 %2819  ;;  %v2800_v17 = vmul.f32 %v2798_v39, %v2778_v45 }
0x2028   :  { %v2822_v6 = vmul.f32 %v2820_v11, %v2804_v43 }
0x2029   :  { %v2854_v58 = vsel %vm2827_vm3, %v2800_v17, 0.0 }
0x202a   :  { %v2829_v48 = vpop.permute.xlu0 %2828  ;;  %v2861_v25 = vsel %vm2827_vm3, %v2822_v6, 0.0 }
0x202b   :  { %v2831_v3 = vsel %vm2827_vm3, %v2800_v17, %v2829_v48  ;;  %v2833_v15 = vpop.permute.xlu1 %2832 }
0x202c   :  { %v2835_v16 = vsel %vm2827_vm3, %v2822_v6, %v2833_v15  ;;  %2837 = vrot.lane.b32.xlu0 %v2831_v3, %s4006_s23  ;;  %v2678_v3 = vsel %vm2646_vm15, %v5116_v46, 0.0  ;;  %vm5393_vm15 = vmmov %vm5371_vm1 }
0x202d   :  { %2841 = vrot.lane.b32.xlu1 %v2835_v16, %s4007_s4  ;;  %vm5400_vm3 = vmmov %vm5371_vm1 }
0x2031   :  { %2849 = vrot.lane.b32.xlu1 %v2846_v38, %s4007_s4 }
0x209e   :  { %v2838_v23 = vpop.permute.xlu0 %2837 }
0x209f   :  { %v2842_v31 = vpop.permute.xlu1 %2841 }
0x20a0   :  { %v2844_v32 = vsel %vm463_vm6, %v2838_v23, %v2842_v31 }
0x20a1   :  { %2845 = vst.msk [vmem:[#allocation10] sm:$0xff] %vm5390_vm7, %v2844_v32  ;;  %vm5401_vm7 = vmmov %vm5371_vm1 }
0x20a3   :  { %v2850_v42 = vpop.permute.xlu1 %2849 }
0x20a4   :  { %v2852_v33 = vsel %vm463_vm6, %v2850_v42, %v2847_v2 }
0x20a5   :  { %2853 = vst.msk [vmem:[#allocation11] sm:$0xff] %vm5391_vm8, %v2852_v33  ;;  %vm5402_vm8 = vmmov %vm5371_vm1 }
0x20a8   :  { %v5177_v37 = vld [vmem:[#allocation10] sm:$0xff] }
0x20a9   :  { %3330 = vmatmul.mubr.msk.f32.vlgmr.msra.gmra.mrb[32].mxu0 %vm5392_vm11, %v5177_v37  ;;  %vm5403_vm11 = vmmov %vm5371_vm1 }
0x20ac   :  { %v5189_v43 = vld [vmem:[#allocation11] sm:$0xff] }
0x217c   :  { %v2943_v12 = vpop.f32.mrb[32].mxu0 }
0x217d   :  { %v2949_v55 = vadd.f32 %v2943_v12, %v2496_v56  ;;  %v2945_v20 = vpop.f32.mrb[33].mxu0 }
0x217e   :  { %v2951_v61 = vadd.f32 %v2945_v20, %v2486_v1 }
0x217f   :  { %3870 = vtanh.f32 %v2949_v55  ;;  %v2952_v53 = vmul.f32 0.5, %v2949_v55 }
0x2180   :  { %3872 = vtanh.f32 %v2951_v61  ;;  %v2978_v22 = vmul.f32 0.5, %v2951_v61 }
0x2182   :  { %3874 = vtanh.f32 %v2978_v22  ;;  %v3900_v22 = vld [vmem:[%s5351_s10] ss:$0 sm:$0xff]  ;;  %s4010_s10 = smov [#allocation18]  }
0x2183   :  { %3876 = vtanh.f32 %v2952_v53 }
0x2189   :  { %v3871_v44 = vpop.eup %3870 }
0x218a   :  { %v3873_v8 = vpop.eup %3872  ;;  %2963 = vrot.lane.b32.xlu1 %v3871_v44, %s4004_s5 }
0x218b   :  { %2985 = vrot.lane.b32.xlu0 %v3873_v8, %s4004_s5 }
0x218c   :  { %v3875_v49 = vpop.eup %3874 }
0x218d   :  { %v2980_v57 = vmul.f32 0.5, %v3875_v49  ;;  %v3877_v30 = vpop.eup %3876 }
0x218e   :  { %3011 = vperm.xlu1 %3700, %v5097_v18   ;;  %v2954_v45 = vmul.f32 0.5, %v3877_v30 }
0x218f   :  { %v2981_v26 = vadd.f32 0.5, %v2980_v57 }
0x2190   :  { %v2955_v5 = vadd.f32 0.5, %v2954_v45 }
0x2191   :  { %v2983_v9 = vmul.f32 %v2981_v26, %v5189_v43 }
0x21fc   :  { %v2964_v59 = vpop.permute.xlu1 %2963 }
0x21fd   :  { %v2986_v52 = vpop.permute.xlu0 %2985  ;;  %v2966_v18 = vmul.f32 %v2964_v59, %v2955_v5  ;;  %v3901_v59 = vld [vmem:[%s5352_s11] ss:$0 sm:$0xff]  ;;  %s3266_s11 = sshll.u32 %s4010_s10, 4  ;;  %s3267_s11 = int_to_ptr.vmem [resolvable:$true] %s3266_s11 }
0x21fe   :  { %v2988_v13 = vmul.f32 %v2986_v52, %v2981_v26  ;;  %p3975_p11 = scmp.lt.s32.totalorder %s3267_s11, %s3267_s11 }
0x2200   :  { %2990 = vrot.lane.b32.xlu0 %v2988_v13, %s4004_s5 }
0x2204   :  { %2958 = vrot.lane.b32.xlu0 %v5189_v43, %s4004_s5 }
0x2208   :  { %2968 = vrot.lane.b32.xlu0 %v2966_v18, %s4004_s5 }
0x220c   :  { %3002 = vperm.xlu0 %3701, %v5105_v36  }
0x220d   :  { %v5218_v39 = vpop.permute.xlu1 %3011 }
0x220e   :  { %vm3013_vm2 = vcmp.eq.s32.totalorder %v5218_v39, 1 }
0x2210   :  { %2863 = vrot.lane.b32.xlu0 %v2861_v25, %s4006_s23 }
0x2214   :  { %2686 = vrot.lane.b32.xlu0 %v2684_v40, %s4006_s23 }
0x2218   :  { %2856 = vrot.lane.b32.xlu0 %v2854_v58, %s4006_s23 }
0x2272   :  { %v2991_v34 = vpop.permute.xlu0 %2990 }
0x2273   :  { %v5204_v10 = vadd.f32 %v2991_v34, %v2983_v9 }
0x2275   :  { %3878 = vtanh.f32 %v5204_v10 }
0x2276   :  { %v2959_v36 = vpop.permute.xlu0 %2958 }
0x2277   :  { %v2961_v28 = vmul.f32 %v2959_v36, %v2955_v5 }
0x227a   :  { %v2969_v4 = vpop.permute.xlu0 %2968 }
0x227b   :  { %v2971_v54 = vadd.f32 %v2969_v4, %v2961_v28  ;;  %v3902_v28 = vld [vmem:[#allocation5] sm:$0xff] }
0x227d   :  { %3880 = vtanh.f32 %v2971_v54 }
0x227f   :  { %v3879_v63 = vpop.eup %3878 }
0x2280   :  { %2996 = vrot.lane.b32.xlu1 %v3879_v63, %s4004_s5 }
0x2287   :  { %v3881_v48 = vpop.eup %3880 }
0x228b   :  { %v5208_v7 = vpop.permute.xlu0 %3002 }
0x228c   :  { %vm3004_vm12 = vcmp.eq.s32.totalorder %v5208_v7, 1 }
0x228d   :  { %v5213_v35 = vsel %vm3004_vm12, %v2971_v54, %v2959_v36 }
0x228f   :  { %v2864_v60 = vpop.permute.xlu0 %2863 }
0x2290   :  { %2867 = vst.msk [vmem:[#allocation9 + $0x8] sm:$0xff] %vm463_vm6, %v2864_v60 }
0x2293   :  { %v2687_v62 = vpop.permute.xlu0 %2686 }
0x2294   :  { %2690 = vst.msk [vmem:[#allocation9 + $0x10] sm:$0xff] %vm463_vm6, %v2687_v62 }
0x2297   :  { %v2857_v21 = vpop.permute.xlu0 %2856  ;;  %v3053_v19 = vld [vmem:[#allocation9 + $0x8] sm:$0xff] }
0x2298   :  { %2860 = vst.msk [vmem:[#allocation8 + $0x8] sm:$0xff] %vm463_vm6, %v2857_v21 }
0x229b   :  { %v3054_v46 = vld [vmem:[#allocation9 + $0x10] sm:$0xff] }
0x229f   :  { %v3050_v1 = vld [vmem:[#allocation8 + $0x8] sm:$0xff] }
0x22f2   :  { %v2997_v11 = vpop.permute.xlu1 %2996 }
0x22f3   :  { %v5220_v17 = vmul.f32 %v2997_v11, %v2981_v26 }
0x22f5   :  { %v3043_v6 = vsel %vm3013_vm2, %v5220_v17, 0.0 }
0x22f6   :  { %3045 = vrot.lane.b32.xlu1 %v3043_v6, %s4006_s23 }
0x22fa   :  { %2974 = vrot.lane.b32.xlu1 %v3881_v48, %s4004_s5 }
0x22fe   :  { %2680 = vrot.lane.b32.xlu1 %v2678_v3, %s4006_s23 }
0x2368   :  { %v3046_v15 = vpop.permute.xlu1 %3045 }
0x2369   :  { %3048 = vst.msk [vmem:[#allocation9] sm:$0xff] %vm463_vm6, %v3046_v15 }
0x236c   :  { %v2975_v16 = vpop.permute.xlu1 %2974 }
0x236d   :  { %v5233_v38 = vmul.f32 %v2975_v16, %v2955_v5 }
0x236f   :  { %v3036_v23 = vsel %vm3004_vm12, %v5233_v38, 0.0 }
0x2370   :  { %3038 = vrot.lane.b32.xlu1 %v3036_v23, %s4006_s23  ;;  %v2681_v31 = vpop.permute.xlu1 %2680  ;;  %v3052_v32 = vld [vmem:[#allocation9] sm:$0xff] }
0x2371   :  { %2683 = vst.msk [vmem:[#allocation8] sm:$0xff] %vm463_vm6, %v2681_v31  ;;  %3058 = vrot.lane.b32.xlu0 %v3052_v32, %s4004_s5 }
0x2374   :  { %3060 = vrot.lane.b32.xlu1 %v3053_v19, %s4004_s5 }
0x2375   :  { %3062 = vrot.lane.b32.xlu0 %v3054_v46, %s4004_s5 }
0x2378   :  { %v3049_v33 = vld [vmem:[#allocation8] sm:$0xff] }
0x23e2   :  { %v3039_v2 = vpop.permute.xlu1 %3038 }
0x23e3   :  { %3042 = vst.msk [vmem:[#allocation8 + $0x10] sm:$0xff] %vm463_vm6, %v3039_v2  ;;  %v3059_v42 = vpop.permute.xlu0 %3058 }
0x23e4   :  { %v5245_v56 = vsel %vm463_vm6, %v3049_v33, %v3059_v42 }
0x23e5   :  { %3449 = vmatmul.mubr.msk.f32.vlgmr.msra.gmra.mrb[24].mxu1 %vm5393_vm15, %v5245_v56 }
0x23e6   :  { %v3061_v12 = vpop.permute.xlu1 %3060  ;;  %3451 = vmatprep.mubr.msk.f32.mxu1 %vm4009_vm14, %v4003_v0 }
0x23e7   :  { %v5252_v55 = vsel %vm463_vm6, %v3050_v1, %v3061_v12  ;;  %v3063_v20 = vpop.permute.xlu0 %3062 }
0x23e9   :  { %3452 = vmatmul.mubr.msk.f32.gmra.mrb[26].mxu1 %vm5371_vm1, %v5252_v55 }
0x23ea   :  { %v3051_v61 = vld [vmem:[#allocation8 + $0x10] sm:$0xff]  ;;  %3454 = vmatprep.mubr.msk.f32.mxu1 %vm4009_vm14, %v4003_v0  ;;  %vm5395_vm14 = vmmov %vm5371_vm1 }
0x23eb   :  { %v5259_v44 = vsel %vm463_vm6, %v3051_v61, %v3063_v20 }
0x23ed   :  { %3455 = vmatmul.mubr.msk.f32.gmra.mrb[28].mxu1 %vm5394_vm5, %v5259_v44 }
0x24b8   :  { %v3145_v8 = vpop.f32.mrb[24].mxu1 }
0x24b9   :  { %v3146_v53 = vadd.f32 %v3900_v22, %v3145_v8  ;;  %v3450_v49 = vpop.f32.mrb[25].mxu1 }
0x24bb   :  { %3882 = vtanh.f32 %v3146_v53 }
0x24bc   :  { %v3150_v57 = vpop.f32.mrb[26].mxu1 }
0x24bd   :  { %v3151_v26 = vadd.f32 %v3900_v22, %v3150_v57  ;;  %v3453_v30 = vpop.f32.mrb[27].mxu1 }
0x24bf   :  { %3884 = vtanh.f32 %v3151_v26 }
0x24c0   :  { %v3155_v52 = vpop.f32.mrb[28].mxu1 }
0x24c1   :  { %v3156_v0 = vadd.f32 %v3900_v22, %v3155_v52  ;;  %v3456_v13 = vpop.f32.mrb[29].mxu1 }
0x24c3   :  { %3886 = vtanh.f32 %v3156_v0 }
0x24c5   :  { %v3883_v45 = vpop.eup %3882 }
0x24c6   :  { %v3162_v5 = vmul.f32 %v3901_v59, %v3883_v45 }
0x24c8   :  { %v3165_v18 = vsel %vm5395_vm14, %v3162_v5, 0.0 }
0x24c9   :  { %v3885_v25 = vpop.eup %3884  ;;  %3166 = vadd.xlane.f32.xlu1 %v3165_v18 }
0x24ca   :  { %v3163_v40 = vmul.f32 %v3901_v59, %v3885_v25 }
0x24cc   :  { %v3168_v58 = vsel %vm5396_vm9, %v3163_v40, 0.0 }
0x24cd   :  { %v3887_v9 = vpop.eup %3886  ;;  %3169 = vadd.xlane.f32.xlu0 %v3168_v58 }
0x24ce   :  { %v3164_v34 = vmul.f32 %v3901_v59, %v3887_v9 }
0x24d0   :  { %v3171_v36 = vsel %vm5397_vm10, %v3164_v34, 0.0 }
0x24d1   :  { %3172 = vadd.xlane.f32.xlu0 %v3171_v36 }
0x24da   :  { %1728 = vrot.lane.b32.xlu1 %v3902_v28, %s4006_s23 }
0x24de   :  { %3005 = vrot.lane.b32.xlu1 %v5177_v37, %s4006_s23 }
0x24e2   :  { %3014 = vrot.lane.b32.xlu1 %v5177_v37, %s4004_s5 }
0x24e7   :  { %1737 = vrot.lane.b32.xlu0 %v3902_v28, %s4004_s5  ;;  %s3970_s5 = scalar_lea.vmem %s3267_s11, 128 }
0x24e8   :  { %p3971_p10 = scmp.ne.s32.totalorder %s3267_s11, %s3970_s5  ;;  %p3976_p12 = scmp.lt.s32.totalorder %s3970_s5, %s3970_s5 }
0x24ea   :  { %p3977_p13 = por %p3976_p12, %p3975_p11 }
0x24ec   :  { %p3978_p0 = pnand %p3977_p13, %p3971_p10 }
0x2556   :  { %v3167_v4 = vpop.xlane.xlu1 %3166 }
0x2557   :  { %v3175_v54 = vrot.slane %v3167_v4, 4 }
0x2559   :  { %v3176_v63 = vmax.f32 %v3167_v4, %v3175_v54 }
0x255a   :  { %v3170_v60 = vpop.xlane.xlu0 %3169 }
0x255b   :  { %v3177_v62 = vrot.slane %v3176_v63, 2  ;;  %v3181_v21 = vrot.slane %v3170_v60, 4 }
0x255d   :  { %v3178_v11 = vmax.f32 %v3176_v63, %v3177_v62  ;;  %v3182_v6 = vmax.f32 %v3170_v60, %v3181_v21 }
0x255e   :  { %v3173_v48 = vpop.xlane.xlu0 %3172 }
0x255f   :  { %v3179_v3 = vrot.slane %v3178_v11, 1  ;;  %v3183_v15 = vrot.slane %v3182_v6, 2  ;;  %v3187_v16 = vrot.slane %v3173_v48, 4 }
0x2561   :  { %v3180_v23 = vmax.f32 %v3178_v11, %v3179_v3  ;;  %v3184_v31 = vmax.f32 %v3182_v6, %v3183_v15  ;;  %v3188_v32 = vmax.f32 %v3173_v48, %v3187_v16  ;;  %v1729_v16 = vpop.permute.xlu1 %1728 }
0x2563   :  { %v3193_v19 = vsub.f32 %v3167_v4, %v3180_v23  ;;  %v3185_v46 = vrot.slane %v3184_v31, 1  ;;  %v3189_v37 = vrot.slane %v3188_v32, 2 }
0x2565   :  { %v3196_v2 = vmul.f32 1.442695, %v3193_v19  ;;  %v3186_v42 = vmax.f32 %v3184_v31, %v3185_v46  ;;  %v3190_v33 = vmax.f32 %v3188_v32, %v3189_v37  ;;  %v3006_v46 = vpop.permute.xlu1 %3005 }
0x2567   :  { %3888 = vpow2.f32 %v3196_v2  ;;  %v3194_v1 = vsub.f32 %v3170_v60, %v3186_v42  ;;  %v3191_v12 = vrot.slane %v3190_v33, 1  ;;  %v1731_v2 = vsel %vm1727_vm4, %v4838_v51, %v1729_v16  ;;  %v1738_v42 = vpop.permute.xlu0 %1737 }
0x2568   :  { %v3008_v51 = vsel %vm3004_vm12, %v5233_v38, %v3006_v46 }
0x2569   :  { %v3198_v20 = vmul.f32 1.442695, %v3194_v1  ;;  %v3192_v61 = vmax.f32 %v3190_v33, %v3191_v12  ;;  %v1740_v33 = vsel %vm1736_vm0, %v4791_v27, %v1738_v42  ;;  %v1751_v1 = vsel %vm1727_vm4, %v4770_v50, %v4759_v29  ;;  %v3015_v12 = vpop.permute.xlu1 %3014  ;;  %vm5398_vm4 = vmmov %vm5371_vm1 }
0x256b   :  { %3890 = vpow2.f32 %v3198_v20  ;;  %v3195_v8 = vsub.f32 %v3173_v48, %v3192_v61  ;;  %v3017_v20 = vsel %vm3013_vm2, %v5220_v17, %v3015_v12 }
0x256d   :  { %v3200_v22 = vmul.f32 1.442695, %v3195_v8 }
0x256f   :  { %3892 = vpow2.f32 %v3200_v22 }
0x2571   :  { %v3889_v53 = vpop.eup %3888 }
0x2572   :  { %v3202_v49 = vmul.f32 %v3889_v53, %v5092_v47 }
0x2574   :  { %v3205_v57 = vsel %vm2090_vm13, %v3202_v49, 0.0 }
0x2575   :  { %v3891_v26 = vpop.eup %3890  ;;  %v3206_v30 = vrot.slane %v3205_v57, 4 }
0x2576   :  { %v3203_v52 = vmul.f32 %v3891_v26, %v5092_v47 }
0x2577   :  { %v3207_v0 = vadd.f32 %v3206_v30, %v3205_v57  ;;  %v3903_v57 = vld [vmem:[#allocation6] sm:$0xff] }
0x2578   :  { %v3212_v13 = vsel %vm2090_vm13, %v3203_v52, 0.0 }
0x2579   :  { %v3893_v45 = vpop.eup %3892  ;;  %v3208_v59 = vrot.slane %v3207_v0, 2  ;;  %v3213_v5 = vrot.slane %v3212_v13, 4 }
0x257a   :  { %v3204_v18 = vmul.f32 %v3893_v45, %v5092_v47 }
0x257b   :  { %v3209_v25 = vadd.f32 %v3208_v59, %v3207_v0  ;;  %v3214_v40 = vadd.f32 %v3213_v5, %v3212_v13 }
0x257c   :  { %v3219_v58 = vsel %vm2090_vm13, %v3204_v18, 0.0  ;;  %vm5399_vm13 = vmmov %vm5371_vm1 }
0x257d   :  { %v3210_v9 = vrot.slane %v3209_v25, 1  ;;  %v3215_v34 = vrot.slane %v3214_v40, 2  ;;  %v3220_v36 = vrot.slane %v3219_v58, 4 }
0x257f   :  { %v3211_v28 = vadd.f32 %v3210_v9, %v3209_v25  ;;  %v3216_v4 = vadd.f32 %v3215_v34, %v3214_v40  ;;  %v3221_v54 = vadd.f32 %v3220_v36, %v3219_v58 }
0x2581   :  { %3894 = vrcp.f32 %v3211_v28  ;;  %v3217_v63 = vrot.slane %v3216_v4, 1  ;;  %v3222_v60 = vrot.slane %v3221_v54, 2 }
0x2583   :  { %v3218_v62 = vadd.f32 %v3217_v63, %v3216_v4  ;;  %v3223_v21 = vadd.f32 %v3222_v60, %v3221_v54 }
0x2585   :  { %3896 = vrcp.f32 %v3218_v62  ;;  %v3224_v11 = vrot.slane %v3223_v21, 1 }
0x2587   :  { %v3225_v6 = vadd.f32 %v3224_v11, %v3223_v21 }
0x2589   :  { %3898 = vrcp.f32 %v3225_v6 }
0x258b   :  { %v3895_v47 = vpop.eup %3894 }
0x258c   :  { %v3227_v48 = vmul.f32 %v3895_v47, %v3202_v49 }
0x258e   :  { %v3232_v3 = vadd.f32 1e-08, %v3227_v48 }
0x258f   :  { %v3897_v15 = vpop.eup %3896 }
0x2590   :  { %3237 = vperm.xlu0 %3701, %v3232_v3   ;;  %v3229_v23 = vmul.f32 %v3897_v15, %v3203_v52 }
0x2592   :  { %v3233_v31 = vadd.f32 1e-08, %v3229_v23 }
0x2593   :  { %v3899_v32 = vpop.eup %3898 }
0x2594   :  { %3242 = vperm.xlu1 %3700, %v3233_v31   ;;  %v3231_v19 = vmul.f32 %v3899_v32, %v3204_v18 }
0x2596   :  { %v3234_v37 = vadd.f32 1e-08, %v3231_v19 }
0x2598   :  { %3247 = vperm.xlu0 %3701, %v3234_v37   ;;  %1742 = vrot.lane.b32.xlu1 %v1731_v2, %s4006_s23 }
0x259c   :  { %1746 = vrot.lane.b32.xlu0 %v1740_v33, %s4007_s4  ;;  %1754 = vrot.lane.b32.xlu1 %v1751_v1, %s4007_s4 }
0x25a0   :  { %3019 = vrot.lane.b32.xlu0 %v3008_v51, %s4006_s23  ;;  %3023 = vrot.lane.b32.xlu1 %v3017_v20, %s4007_s4 }
0x25a4   :  { %3031 = vrot.lane.b32.xlu0 %v5213_v35, %s4007_s4 }
0x260f   :  { %v3238_v29 = vpop.permute.xlu0 %3237 }
0x2610   :  { %v3250_v27 = vmul.f32 %v3238_v29, %v5245_v56  ;;  %v1752_v56 = vsel %vm1736_vm0, %v4752_v41, %v3903_v57 }
0x2612   :  { %v3253_v8 = vsel %vm5399_vm13, %v3250_v27, 0.0 }
0x2613   :  { %v3243_v50 = vpop.permute.xlu1 %3242 }
0x2614   :  { %v3251_v14 = vmul.f32 %v3243_v50, %v5252_v55 }
0x2616   :  { %v3254_v7 = vsel %vm5398_vm4, %v3251_v14, 0.0 }
0x2617   :  { %v3248_v38 = vpop.permute.xlu0 %3247  ;;  %v1743_v61 = vpop.permute.xlu1 %1742  ;;  %v3255_v22 = vadd.f32 %v3254_v7, %v3253_v8 }
0x2618   :  { %v3252_v17 = vmul.f32 %v3248_v38, %v5259_v44 }
0x261a   :  { %v3256_v53 = vsel %vm5400_vm3, %v3252_v17, 0.0 }
0x261b   :  { %v3257_v35 = vadd.f32 %v3256_v53, %v3255_v22  ;;  %v1747_v49 = vpop.permute.xlu0 %1746  ;;  %v1755_v55 = vpop.permute.xlu1 %1754 }
0x261c   :  { %v1749_v26 = vsel %vm463_vm6, %v1743_v61, %v1747_v49  ;;  %v1757_v30 = vsel %vm463_vm6, %v1755_v55, %v1752_v56 }
0x261d   :  { %1750 = vst.msk [vmem:[#allocation5] sm:$0xff] %vm5401_vm7, %v1749_v26  ;;  %v3258_v44 = vsel %vm5403_vm11, %v3257_v35, 0.0 }
0x261e   :  { %1758 = vst.msk [vmem:[#allocation6] sm:$0xff] %vm5402_vm8, %v1757_v30  ;;  %3259 = vst [vmem:[#allocation18] sm:$0xff] %v3258_v44 }
0x261f   :  { %v3020_v52 = vpop.permute.xlu0 %3019  ;;  %v3024_v0 = vpop.permute.xlu1 %3023 }
0x2620   :  { %3981 = shalt.err (!%p3978_p0)
}
0x2621   :  { %s3982_s8 = scalar_lea.hbm %s5354_s13, 128 }
0x2622   :  { %p3983_p1 = scmp.ne.s32.totalorder %s5354_s13, %s3982_s8  ;;  %p3986_p2 = scmp.lt.u32.totalorder %s3982_s8, %s5354_s13 }
0x2624   :  { %p3988_p3 = pnand %p3986_p2, %p3983_p1 }
0x2626   :  { %3991 = shalt.err (!%p3988_p3)
}
0x2627   :  { %3269 = dma.vmem_to_hbm [thread:$0]  %s3267_s11, 128, %s5354_s13, [#allocation14]   ;;  %v3026_v41 = vsel %vm463_vm6, %v3020_v52, %v3024_v0  ;;  %vm5404_vm0 = vmmov %vm5371_vm1  ;;  %v3029_v24 = vsel %vm3013_vm2, %v5204_v10, %v5189_v43  ;;  %v3032_v13 = vpop.permute.xlu0 %3031 }
0x2628   :  { %3027 = vst.msk [vmem:[#allocation10] sm:$0xff] %vm5404_vm0, %v3026_v41  ;;  %v3034_v45 = vsel %vm463_vm6, %v3032_v13, %v3029_v24  ;;  %vm5405_vm12 = vmmov %vm5404_vm0 }
0x2629   :  { %3035 = vst.msk [vmem:[#allocation11] sm:$0xff] %vm5405_vm12, %v3034_v45 }
0x262a   :  { %3996 = dma.done.wait [#allocation14], 128  }
0x262b   :  { %3997 = vsyncadd [#allocation14], 4294967168 }
0x262c   :  { %3273 = vsyncpa [#allocation13], 1 }
0x262d   :  { %3274 = vsyncpa [#allocation16], 1 }
0x262e   :  { %3275 = vsyncpa [#allocation14], 1 }

</bundles_post_ra>
